<compile_context>
chip_gen: v7x
topology: tpu7x:2x2x1
jax: 0.10.0
libtpu: 0.0.40
codegen_flags: <defaults>
</compile_context>

<pallas_src>
import functools
import math

import jax
import jax.numpy as jnp
from jax.experimental import pallas as pl
from jax.experimental.pallas import tpu as pltpu

NEG_SLOPE = 0.01   # torch.nn.LeakyReLU default negative_slope
HIDDEN = 128       # MLP hidden_dim default


def realnvp_fused_kernel(w1_ref, b1_ref, w2_ref, b2_ref,
                         w3s_ref, b3s_ref, w3t_ref, b3t_ref, x_ref,
                         z_ref, logdet_ref, *,
                         n_layers, hidden, act_dtype, merged_l2):
    H = hidden
    h = x_ref[...]                                   # (D, TB) f32, lane = batch
    ld = jnp.zeros((1, h.shape[1]), jnp.float32)     # (1, TB) log-det accumulator

    # TODO(synk): for much larger hidden/n_layers, move the layer index onto a
    # grid axis (weights DMA'd per layer, h/ld carried in VMEM scratch) to
    # bound live ranges and stay inside v7x's 64 MiB VMEM.
    for l in range(n_layers):                        # static unroll (L is small)
        # Layer 1: s|t nets merged to (2H, D); binary mask folded into columns,
        # so the MLP consumes h directly (h*mask not needed).
        pre1 = (jnp.dot(w1_ref[l], h.astype(jnp.bfloat16),
                        preferred_element_type=jnp.float32) + b1_ref[l])
        pre1 = pre1.astype(act_dtype)
        h1 = jnp.maximum(pre1, NEG_SLOPE * pre1).astype(jnp.bfloat16)   # (2H, TB)

        # Layer 2: merged block-diagonal (2H, 2H) on v6e/v7x (256-wide MXU),
        # two separate (H, H) matmuls on v5e (128x128 MXUs).
        if merged_l2:
            pre2 = (jnp.dot(w2_ref[l], h1,
                            preferred_element_type=jnp.float32) + b2_ref[l])
            pre2 = pre2.astype(act_dtype)
            h2 = jnp.maximum(pre2, NEG_SLOPE * pre2).astype(jnp.bfloat16)
            h2s, h2t = h2[:H], h2[H:]
        else:
            w2l = w2_ref[l]                          # (2, H, H)
            b2l = b2_ref[l]                          # (2H, 1)
            pre2s = (jnp.dot(w2l[0], h1[:H],
                             preferred_element_type=jnp.float32)
                     + b2l[:H]).astype(act_dtype)
            pre2t = (jnp.dot(w2l[1], h1[H:],
                             preferred_element_type=jnp.float32)
                     + b2l[H:]).astype(act_dtype)
            h2s = jnp.maximum(pre2s, NEG_SLOPE * pre2s).astype(jnp.bfloat16)
            h2t = jnp.maximum(pre2t, NEG_SLOPE * pre2t).astype(jnp.bfloat16)

        # Layer 3: (1 - mask) folded into weight rows / bias host-side, so
        # masked coordinates get s = t = 0 exactly (exp(0) = 1 -> passthrough).
        s = jnp.dot(w3s_ref[l], h2s, preferred_element_type=jnp.float32) + b3s_ref[l]
        t = jnp.dot(w3t_ref[l], h2t, preferred_element_type=jnp.float32) + b3t_ref[l]

        h = h * jnp.exp(s) + t          # == x*mask + (1-mask)*(x*exp(s) + t)
        ld = ld + jnp.sum(s, axis=0, keepdims=True)

    z_ref[...] = h
    logdet_ref[...] = ld


def _device_kind():
    try:
        return jax.devices()[0].device_kind.lower()
    except Exception:
        return ""


def realnvp_forward(x, packed):
    """Full RealNVP.forward: returns (z, log_det_J) with log_det_J shape (B,)."""
    w1, b1, w2, b2, w3s, b3s, w3t, b3t = packed
    B, D = x.shape
    n_layers = w1.shape[0]
    H = w3s.shape[-1]
    merged_l2 = (w2.ndim == 3)

    kind = _device_kind()
    # f32 activation tail on v5e (no bf16 VPU); bf16 tail on v6e/v7x.
    act_dtype = jnp.float32 if "v5" in kind else jnp.bfloat16

    # Lane-dense layout: batch lives on the lane (last) dimension.
    if B <= 1024:
        TB, Bp = B, B                       # one tile, block == full array dims
    else:
        TB = 1024 if "v7" in kind else 2048  # >=2 grid steps on v7x (2 TCs)
        Bp = ((B + TB - 1) // TB) * TB       # pad lanes to a multiple of TB
    x_t = x.T                                # (D, B)
    if Bp != B:
        x_t = jnp.pad(x_t, ((0, 0), (0, Bp - B)))   # zero-pad -> finite exp()

    grid = (Bp // TB,)

    def const_spec(a):
        nd = a.ndim
        return pl.BlockSpec(a.shape, lambda i, _nd=nd: (0,) * _nd)

    in_specs = [const_spec(a) for a in (w1, b1, w2, b2, w3s, b3s, w3t, b3t)]
    in_specs.append(pl.BlockSpec((D, TB), lambda i: (0, i)))
    out_specs = (pl.BlockSpec((D, TB), lambda i: (0, i)),
                 pl.BlockSpec((1, TB), lambda i: (0, i)))

    l2_flops = 2 * (2 * H) * (2 * H) if merged_l2 else 4 * H * H
    flops = int(B * n_layers * (2 * D * 2 * H + l2_flops + 2 * 2 * H * D))
    transcendentals = int(B * D * n_layers)
    bytes_accessed = int(2 * B * D * 4 + B * 4
                         + sum(int(a.size) * a.dtype.itemsize for a in packed))

    kernel = functools.partial(realnvp_fused_kernel, n_layers=n_layers,
                               hidden=H, act_dtype=act_dtype,
                               merged_l2=merged_l2)
    z_t, logdet = pl.pallas_call(
        kernel,
        grid=grid,
        in_specs=in_specs,
        out_specs=out_specs,
        out_shape=(jax.ShapeDtypeStruct((D, Bp), jnp.float32),
                   jax.ShapeDtypeStruct((1, Bp), jnp.float32)),
        compiler_params=pltpu.CompilerParams(
            dimension_semantics=("parallel",),
            vmem_limit_bytes=32 * 1024 * 1024),
        cost_estimate=pl.CostEstimate(
            flops=flops, transcendentals=transcendentals,
            bytes_accessed=bytes_accessed),
    )(w1, b1, w2, b2, w3s, b3s, w3t, b3t, x_t)

    return z_t[:, :B].T, logdet[0, :B]


def build_realnvp(key, dim, n_layers, hidden=HIDDEN, merge_layer2=True):
    """Deterministic params, pre-packed (transposed, masks folded) for the kernel."""
    def init_linear(k, fan_in, fan_out):
        kw, kb = jax.random.split(k)
        bound = 1.0 / math.sqrt(fan_in)   # PyTorch nn.Linear default init range
        w = jax.random.uniform(kw, (fan_in, fan_out), jnp.float32, -bound, bound)
        b = jax.random.uniform(kb, (fan_out,), jnp.float32, -bound, bound)
        return w, b

    W1, B1, W2, B2, W3S, B3S, W3T, B3T = ([] for _ in range(8))
    zero_hh = jnp.zeros((hidden, hidden), jnp.float32)
    for i in range(n_layers):
        mask = jnp.array([(i + j) % 2 for j in range(dim)], jnp.float32)  # (D,)
        inv_mask = 1.0 - mask

        key, ks1, ks2, ks3, kt1, kt2, kt3 = jax.random.split(key, 7)
        sw1, sb1 = init_linear(ks1, dim, hidden)
        sw2, sb2 = init_linear(ks2, hidden, hidden)
        sw3, sb3 = init_linear(ks3, hidden, dim)
        tw1, tb1 = init_linear(kt1, dim, hidden)
        tw2, tb2 = init_linear(kt2, hidden, hidden)
        tw3, tb3 = init_linear(kt3, hidden, dim)

        # Layer 1: merge s|t -> (D, 2H), fold binary mask into input rows, transpose.
        w1 = (jnp.concatenate([sw1, tw1], axis=1) * mask[:, None]).T   # (2H, D)
        b1 = jnp.concatenate([sb1, tb1], axis=0)[:, None]              # (2H, 1)

        # Layer 2: block-diagonal merged (2H, 2H) for the 256x256 MXU, or split
        # (2, H, H) for v5e's 128x128 MXUs.  (Transposed for the (..., TB) layout.)
        if merge_layer2:
            w2 = jnp.block([[sw2.T, zero_hh], [zero_hh, tw2.T]])       # (2H, 2H)
        else:
            w2 = jnp.stack([sw2.T, tw2.T])                             # (2, H, H)
        b2 = jnp.concatenate([sb2, tb2], axis=0)[:, None]              # (2H, 1)

        # Layer 3: fold (1 - mask) into output columns -> zero rows after transpose.
        w3s = (sw3 * inv_mask[None, :]).T                              # (D, H)
        b3s = (sb3 * inv_mask)[:, None]                                # (D, 1)
        w3t = (tw3 * inv_mask[None, :]).T                              # (D, H)
        b3t = (tb3 * inv_mask)[:, None]                                # (D, 1)

        W1.append(w1.astype(jnp.bfloat16));  B1.append(b1)
        W2.append(w2.astype(jnp.bfloat16));  B2.append(b2)
        W3S.append(w3s.astype(jnp.bfloat16)); B3S.append(b3s)
        W3T.append(w3t.astype(jnp.bfloat16)); B3T.append(b3t)

    return (jnp.stack(W1),    # (L, 2H, D)          bf16 (mask folded)
            jnp.stack(B1),    # (L, 2H, 1)          f32
            jnp.stack(W2),    # (L, 2H, 2H) / (L,2,H,H)  bf16
            jnp.stack(B2),    # (L, 2H, 1)          f32
            jnp.stack(W3S),   # (L, D, H)           bf16 ((1-mask) folded)
            jnp.stack(B3S),   # (L, D, 1)           f32  ((1-mask) folded)
            jnp.stack(W3T),   # (L, D, H)           bf16 ((1-mask) folded)
            jnp.stack(B3T))   # (L, D, 1)           f32  ((1-mask) folded)


if __name__ == "__main__":
    # TODO(synk): base_dist-dependent methods (log_prob, sample) and inverse()
    # are not part of the requested forward pass and are omitted.
    dim, n_layers, batch = 4, 4, 8
    key = jax.random.PRNGKey(0)
    k_params, k_x = jax.random.split(key)
    merge_l2 = "v5" not in _device_kind()   # split 256-wide matmul on v5e only
    packed = build_realnvp(k_params, dim, n_layers, merge_layer2=merge_l2)
    x = jax.random.normal(k_x, (batch, dim), dtype=jnp.float32)

    z, log_det_J = realnvp_forward(x, packed)
    jax.block_until_ready((z, log_det_J))
    assert z.shape == (batch, dim) and log_det_J.shape == (batch,)
    assert bool(jnp.all(jnp.isfinite(z))) and bool(jnp.all(jnp.isfinite(log_det_J)))
    print("KERNEL_OK")
</pallas_src>

<mosaic_0001>
module attributes {stable_mosaic.version = 11 : i64} {
  func.func @realnvp_fused_kernel(%arg0: i32, %arg1: memref<4x256x4xbf16, #tpu.memory_space<vmem>>, %arg2: memref<4x256x1xf32, #tpu.memory_space<vmem>>, %arg3: memref<4x256x256xbf16, #tpu.memory_space<vmem>>, %arg4: memref<4x256x1xf32, #tpu.memory_space<vmem>>, %arg5: memref<4x4x128xbf16, #tpu.memory_space<vmem>>, %arg6: memref<4x4x1xf32, #tpu.memory_space<vmem>>, %arg7: memref<4x4x128xbf16, #tpu.memory_space<vmem>>, %arg8: memref<4x4x1xf32, #tpu.memory_space<vmem>>, %arg9: memref<4x8xf32, #tpu.memory_space<vmem>>, %arg10: memref<4x8xf32, #tpu.memory_space<vmem>>, %arg11: memref<1x8xf32, #tpu.memory_space<vmem>>) attributes {dimension_semantics = [#tpu.dimension_semantics<parallel>], iteration_bounds = array<i64: 1>, scalar_prefetch = 0 : i64, scratch_operands = 0 : i64, tpu.core_type = #tpu.core_type<tc>, window_params = [{pipeline_mode = #tpu.pipeline_mode<synchronous>, transform_indices = @transform_0, window_bounds = array<i64: 4, 256, 4>}, {pipeline_mode = #tpu.pipeline_mode<synchronous>, transform_indices = @transform_1, window_bounds = array<i64: 4, 256, 1>}, {pipeline_mode = #tpu.pipeline_mode<synchronous>, transform_indices = @transform_2, window_bounds = array<i64: 4, 256, 256>}, {pipeline_mode = #tpu.pipeline_mode<synchronous>, transform_indices = @transform_3, window_bounds = array<i64: 4, 256, 1>}, {pipeline_mode = #tpu.pipeline_mode<synchronous>, transform_indices = @transform_4, window_bounds = array<i64: 4, 4, 128>}, {pipeline_mode = #tpu.pipeline_mode<synchronous>, transform_indices = @transform_5, window_bounds = array<i64: 4, 4, 1>}, {pipeline_mode = #tpu.pipeline_mode<synchronous>, transform_indices = @transform_6, window_bounds = array<i64: 4, 4, 128>}, {pipeline_mode = #tpu.pipeline_mode<synchronous>, transform_indices = @transform_7, window_bounds = array<i64: 4, 4, 1>}, {transform_indices = @transform_8, window_bounds = array<i64: 4, 8>}, {transform_indices = @transform_9, window_bounds = array<i64: 4, 8>}, {transform_indices = @transform_10, window_bounds = array<i64: 1, 8>}]} {
    %c0 = arith.constant 0 : index
    %c0_0 = arith.constant 0 : index
    %0 = vector.load %arg9[%c0, %c0_0] : memref<4x8xf32, #tpu.memory_space<vmem>>, vector<4x8xf32>
    %cst = arith.constant 0.000000e+00 : f32
    %1 = vector.broadcast %cst : f32 to vector<1x8xf32>
    %c0_1 = arith.constant 0 : index
    %c0_2 = arith.constant 0 : index
    %c0_3 = arith.constant 0 : index
    %2 = vector.load %arg1[%c0_1, %c0_2, %c0_3] : memref<4x256x4xbf16, #tpu.memory_space<vmem>>, vector<1x256x4xbf16>
    %3 = vector.shape_cast %2 : vector<1x256x4xbf16> to vector<256x4xbf16>
    %4 = arith.truncf %0 : vector<4x8xf32> to vector<4x8xbf16>
    %cst_4 = arith.constant dense<0.000000e+00> : vector<256x8xf32>
    %5 = tpu.matmul %3, %4, %cst_4 {dimension_numbers = #tpu.dot_dimension_numbers<[1], [0], [0], [1], [0, 0, 1, 1], [], []>} : vector<256x4xbf16>, vector<4x8xbf16>, vector<256x8xf32> -> vector<256x8xf32>
    %c0_5 = arith.constant 0 : index
    %c0_6 = arith.constant 0 : index
    %c0_7 = arith.constant 0 : index
    %6 = vector.load %arg2[%c0_5, %c0_6, %c0_7] : memref<4x256x1xf32, #tpu.memory_space<vmem>>, vector<1x256x1xf32>
    %7 = vector.shape_cast %6 : vector<1x256x1xf32> to vector<256x1xf32>
    %8 = vector.broadcast %7 : vector<256x1xf32> to vector<256x8xf32>
    %9 = arith.addf %5, %8 : vector<256x8xf32>
    %10 = arith.truncf %9 : vector<256x8xf32> to vector<256x8xbf16>
    %cst_8 = arith.constant 1.000980e-02 : bf16
    %11 = vector.broadcast %cst_8 : bf16 to vector<256x8xbf16>
    %12 = arith.mulf %11, %10 : vector<256x8xbf16>
    %13 = arith.maximumf %10, %12 : vector<256x8xbf16>
    %c0_9 = arith.constant 0 : index
    %c0_10 = arith.constant 0 : index
    %c0_11 = arith.constant 0 : index
    %14 = vector.load %arg3[%c0_9, %c0_10, %c0_11] : memref<4x256x256xbf16, #tpu.memory_space<vmem>>, vector<1x256x256xbf16>
    %15 = vector.shape_cast %14 : vector<1x256x256xbf16> to vector<256x256xbf16>
    %cst_12 = arith.constant dense<0.000000e+00> : vector<256x8xf32>
    %16 = tpu.matmul %15, %13, %cst_12 {dimension_numbers = #tpu.dot_dimension_numbers<[1], [0], [0], [1], [0, 0, 1, 1], [], []>} : vector<256x256xbf16>, vector<256x8xbf16>, vector<256x8xf32> -> vector<256x8xf32>
    %c0_13 = arith.constant 0 : index
    %c0_14 = arith.constant 0 : index
    %c0_15 = arith.constant 0 : index
    %17 = vector.load %arg4[%c0_13, %c0_14, %c0_15] : memref<4x256x1xf32, #tpu.memory_space<vmem>>, vector<1x256x1xf32>
    %18 = vector.shape_cast %17 : vector<1x256x1xf32> to vector<256x1xf32>
    %19 = vector.broadcast %18 : vector<256x1xf32> to vector<256x8xf32>
    %20 = arith.addf %16, %19 : vector<256x8xf32>
    %21 = arith.truncf %20 : vector<256x8xf32> to vector<256x8xbf16>
    %cst_16 = arith.constant 1.000980e-02 : bf16
    %22 = vector.broadcast %cst_16 : bf16 to vector<256x8xbf16>
    %23 = arith.mulf %22, %21 : vector<256x8xbf16>
    %24 = arith.maximumf %21, %23 : vector<256x8xbf16>
    %25 = vector.extract_strided_slice %24 {offsets = [0, 0], sizes = [128, 8], strides = [1, 1]} : vector<256x8xbf16> to vector<128x8xbf16>
    %26 = vector.extract_strided_slice %24 {offsets = [128, 0], sizes = [128, 8], strides = [1, 1]} : vector<256x8xbf16> to vector<128x8xbf16>
    %c0_17 = arith.constant 0 : index
    %c0_18 = arith.constant 0 : index
    %c0_19 = arith.constant 0 : index
    %27 = vector.load %arg5[%c0_17, %c0_18, %c0_19] : memref<4x4x128xbf16, #tpu.memory_space<vmem>>, vector<1x4x128xbf16>
    %28 = vector.shape_cast %27 : vector<1x4x128xbf16> to vector<4x128xbf16>
    %cst_20 = arith.constant dense<0.000000e+00> : vector<4x8xf32>
    %29 = tpu.matmul %28, %25, %cst_20 {dimension_numbers = #tpu.dot_dimension_numbers<[1], [0], [0], [1], [0, 0, 1, 1], [], []>} : vector<4x128xbf16>, vector<128x8xbf16>, vector<4x8xf32> -> vector<4x8xf32>
    %c0_21 = arith.constant 0 : index
    %c0_22 = arith.constant 0 : index
    %c0_23 = arith.constant 0 : index
    %30 = vector.load %arg6[%c0_21, %c0_22, %c0_23] : memref<4x4x1xf32, #tpu.memory_space<vmem>>, vector<1x4x1xf32>
    %31 = vector.shape_cast %30 : vector<1x4x1xf32> to vector<4x1xf32>
    %32 = vector.broadcast %31 : vector<4x1xf32> to vector<4x8xf32>
    %33 = arith.addf %29, %32 : vector<4x8xf32>
    %c0_24 = arith.constant 0 : index
    %c0_25 = arith.constant 0 : index
    %c0_26 = arith.constant 0 : index
    %34 = vector.load %arg7[%c0_24, %c0_25, %c0_26] : memref<4x4x128xbf16, #tpu.memory_space<vmem>>, vector<1x4x128xbf16>
    %35 = vector.shape_cast %34 : vector<1x4x128xbf16> to vector<4x128xbf16>
    %cst_27 = arith.constant dense<0.000000e+00> : vector<4x8xf32>
    %36 = tpu.matmul %35, %26, %cst_27 {dimension_numbers = #tpu.dot_dimension_numbers<[1], [0], [0], [1], [0, 0, 1, 1], [], []>} : vector<4x128xbf16>, vector<128x8xbf16>, vector<4x8xf32> -> vector<4x8xf32>
    %c0_28 = arith.constant 0 : index
    %c0_29 = arith.constant 0 : index
    %c0_30 = arith.constant 0 : index
    %37 = vector.load %arg8[%c0_28, %c0_29, %c0_30] : memref<4x4x1xf32, #tpu.memory_space<vmem>>, vector<1x4x1xf32>
    %38 = vector.shape_cast %37 : vector<1x4x1xf32> to vector<4x1xf32>
    %39 = vector.broadcast %38 : vector<4x1xf32> to vector<4x8xf32>
    %40 = arith.addf %36, %39 : vector<4x8xf32>
    %41 = math.exp %33 : vector<4x8xf32>
    %42 = arith.mulf %0, %41 : vector<4x8xf32>
    %43 = arith.addf %42, %40 : vector<4x8xf32>
    %cst_31 = arith.constant dense<0.000000e+00> : vector<8xf32>
    %44 = vector.multi_reduction <add>, %33, %cst_31 [0] : vector<4x8xf32> to vector<8xf32>
    %45 = vector.shape_cast %44 : vector<8xf32> to vector<1x8xf32>
    %46 = arith.addf %1, %45 : vector<1x8xf32>
    %c1 = arith.constant 1 : index
    %c0_32 = arith.constant 0 : index
    %c0_33 = arith.constant 0 : index
    %47 = vector.load %arg1[%c1, %c0_32, %c0_33] : memref<4x256x4xbf16, #tpu.memory_space<vmem>>, vector<1x256x4xbf16>
    %48 = vector.shape_cast %47 : vector<1x256x4xbf16> to vector<256x4xbf16>
    %49 = arith.truncf %43 : vector<4x8xf32> to vector<4x8xbf16>
    %cst_34 = arith.constant dense<0.000000e+00> : vector<256x8xf32>
    %50 = tpu.matmul %48, %49, %cst_34 {dimension_numbers = #tpu.dot_dimension_numbers<[1], [0], [0], [1], [0, 0, 1, 1], [], []>} : vector<256x4xbf16>, vector<4x8xbf16>, vector<256x8xf32> -> vector<256x8xf32>
    %c1_35 = arith.constant 1 : index
    %c0_36 = arith.constant 0 : index
    %c0_37 = arith.constant 0 : index
    %51 = vector.load %arg2[%c1_35, %c0_36, %c0_37] : memref<4x256x1xf32, #tpu.memory_space<vmem>>, vector<1x256x1xf32>
    %52 = vector.shape_cast %51 : vector<1x256x1xf32> to vector<256x1xf32>
    %53 = vector.broadcast %52 : vector<256x1xf32> to vector<256x8xf32>
    %54 = arith.addf %50, %53 : vector<256x8xf32>
    %55 = arith.truncf %54 : vector<256x8xf32> to vector<256x8xbf16>
    %cst_38 = arith.constant 1.000980e-02 : bf16
    %56 = vector.broadcast %cst_38 : bf16 to vector<256x8xbf16>
    %57 = arith.mulf %56, %55 : vector<256x8xbf16>
    %58 = arith.maximumf %55, %57 : vector<256x8xbf16>
    %c1_39 = arith.constant 1 : index
    %c0_40 = arith.constant 0 : index
    %c0_41 = arith.constant 0 : index
    %59 = vector.load %arg3[%c1_39, %c0_40, %c0_41] : memref<4x256x256xbf16, #tpu.memory_space<vmem>>, vector<1x256x256xbf16>
    %60 = vector.shape_cast %59 : vector<1x256x256xbf16> to vector<256x256xbf16>
    %cst_42 = arith.constant dense<0.000000e+00> : vector<256x8xf32>
    %61 = tpu.matmul %60, %58, %cst_42 {dimension_numbers = #tpu.dot_dimension_numbers<[1], [0], [0], [1], [0, 0, 1, 1], [], []>} : vector<256x256xbf16>, vector<256x8xbf16>, vector<256x8xf32> -> vector<256x8xf32>
    %c1_43 = arith.constant 1 : index
    %c0_44 = arith.constant 0 : index
    %c0_45 = arith.constant 0 : index
    %62 = vector.load %arg4[%c1_43, %c0_44, %c0_45] : memref<4x256x1xf32, #tpu.memory_space<vmem>>, vector<1x256x1xf32>
    %63 = vector.shape_cast %62 : vector<1x256x1xf32> to vector<256x1xf32>
    %64 = vector.broadcast %63 : vector<256x1xf32> to vector<256x8xf32>
    %65 = arith.addf %61, %64 : vector<256x8xf32>
    %66 = arith.truncf %65 : vector<256x8xf32> to vector<256x8xbf16>
    %cst_46 = arith.constant 1.000980e-02 : bf16
    %67 = vector.broadcast %cst_46 : bf16 to vector<256x8xbf16>
    %68 = arith.mulf %67, %66 : vector<256x8xbf16>
    %69 = arith.maximumf %66, %68 : vector<256x8xbf16>
    %70 = vector.extract_strided_slice %69 {offsets = [0, 0], sizes = [128, 8], strides = [1, 1]} : vector<256x8xbf16> to vector<128x8xbf16>
    %71 = vector.extract_strided_slice %69 {offsets = [128, 0], sizes = [128, 8], strides = [1, 1]} : vector<256x8xbf16> to vector<128x8xbf16>
    %c1_47 = arith.constant 1 : index
    %c0_48 = arith.constant 0 : index
    %c0_49 = arith.constant 0 : index
    %72 = vector.load %arg5[%c1_47, %c0_48, %c0_49] : memref<4x4x128xbf16, #tpu.memory_space<vmem>>, vector<1x4x128xbf16>
    %73 = vector.shape_cast %72 : vector<1x4x128xbf16> to vector<4x128xbf16>
    %cst_50 = arith.constant dense<0.000000e+00> : vector<4x8xf32>
    %74 = tpu.matmul %73, %70, %cst_50 {dimension_numbers = #tpu.dot_dimension_numbers<[1], [0], [0], [1], [0, 0, 1, 1], [], []>} : vector<4x128xbf16>, vector<128x8xbf16>, vector<4x8xf32> -> vector<4x8xf32>
    %c1_51 = arith.constant 1 : index
    %c0_52 = arith.constant 0 : index
    %c0_53 = arith.constant 0 : index
    %75 = vector.load %arg6[%c1_51, %c0_52, %c0_53] : memref<4x4x1xf32, #tpu.memory_space<vmem>>, vector<1x4x1xf32>
    %76 = vector.shape_cast %75 : vector<1x4x1xf32> to vector<4x1xf32>
    %77 = vector.broadcast %76 : vector<4x1xf32> to vector<4x8xf32>
    %78 = arith.addf %74, %77 : vector<4x8xf32>
    %c1_54 = arith.constant 1 : index
    %c0_55 = arith.constant 0 : index
    %c0_56 = arith.constant 0 : index
    %79 = vector.load %arg7[%c1_54, %c0_55, %c0_56] : memref<4x4x128xbf16, #tpu.memory_space<vmem>>, vector<1x4x128xbf16>
    %80 = vector.shape_cast %79 : vector<1x4x128xbf16> to vector<4x128xbf16>
    %cst_57 = arith.constant dense<0.000000e+00> : vector<4x8xf32>
    %81 = tpu.matmul %80, %71, %cst_57 {dimension_numbers = #tpu.dot_dimension_numbers<[1], [0], [0], [1], [0, 0, 1, 1], [], []>} : vector<4x128xbf16>, vector<128x8xbf16>, vector<4x8xf32> -> vector<4x8xf32>
    %c1_58 = arith.constant 1 : index
    %c0_59 = arith.constant 0 : index
    %c0_60 = arith.constant 0 : index
    %82 = vector.load %arg8[%c1_58, %c0_59, %c0_60] : memref<4x4x1xf32, #tpu.memory_space<vmem>>, vector<1x4x1xf32>
    %83 = vector.shape_cast %82 : vector<1x4x1xf32> to vector<4x1xf32>
    %84 = vector.broadcast %83 : vector<4x1xf32> to vector<4x8xf32>
    %85 = arith.addf %81, %84 : vector<4x8xf32>
    %86 = math.exp %78 : vector<4x8xf32>
    %87 = arith.mulf %43, %86 : vector<4x8xf32>
    %88 = arith.addf %87, %85 : vector<4x8xf32>
    %cst_61 = arith.constant dense<0.000000e+00> : vector<8xf32>
    %89 = vector.multi_reduction <add>, %78, %cst_61 [0] : vector<4x8xf32> to vector<8xf32>
    %90 = vector.shape_cast %89 : vector<8xf32> to vector<1x8xf32>
    %91 = arith.addf %46, %90 : vector<1x8xf32>
    %c2 = arith.constant 2 : index
    %c0_62 = arith.constant 0 : index
    %c0_63 = arith.constant 0 : index
    %92 = vector.load %arg1[%c2, %c0_62, %c0_63] : memref<4x256x4xbf16, #tpu.memory_space<vmem>>, vector<1x256x4xbf16>
    %93 = vector.shape_cast %92 : vector<1x256x4xbf16> to vector<256x4xbf16>
    %94 = arith.truncf %88 : vector<4x8xf32> to vector<4x8xbf16>
    %cst_64 = arith.constant dense<0.000000e+00> : vector<256x8xf32>
    %95 = tpu.matmul %93, %94, %cst_64 {dimension_numbers = #tpu.dot_dimension_numbers<[1], [0], [0], [1], [0, 0, 1, 1], [], []>} : vector<256x4xbf16>, vector<4x8xbf16>, vector<256x8xf32> -> vector<256x8xf32>
    %c2_65 = arith.constant 2 : index
    %c0_66 = arith.constant 0 : index
    %c0_67 = arith.constant 0 : index
    %96 = vector.load %arg2[%c2_65, %c0_66, %c0_67] : memref<4x256x1xf32, #tpu.memory_space<vmem>>, vector<1x256x1xf32>
    %97 = vector.shape_cast %96 : vector<1x256x1xf32> to vector<256x1xf32>
    %98 = vector.broadcast %97 : vector<256x1xf32> to vector<256x8xf32>
    %99 = arith.addf %95, %98 : vector<256x8xf32>
    %100 = arith.truncf %99 : vector<256x8xf32> to vector<256x8xbf16>
    %cst_68 = arith.constant 1.000980e-02 : bf16
    %101 = vector.broadcast %cst_68 : bf16 to vector<256x8xbf16>
    %102 = arith.mulf %101, %100 : vector<256x8xbf16>
    %103 = arith.maximumf %100, %102 : vector<256x8xbf16>
    %c2_69 = arith.constant 2 : index
    %c0_70 = arith.constant 0 : index
    %c0_71 = arith.constant 0 : index
    %104 = vector.load %arg3[%c2_69, %c0_70, %c0_71] : memref<4x256x256xbf16, #tpu.memory_space<vmem>>, vector<1x256x256xbf16>
    %105 = vector.shape_cast %104 : vector<1x256x256xbf16> to vector<256x256xbf16>
    %cst_72 = arith.constant dense<0.000000e+00> : vector<256x8xf32>
    %106 = tpu.matmul %105, %103, %cst_72 {dimension_numbers = #tpu.dot_dimension_numbers<[1], [0], [0], [1], [0, 0, 1, 1], [], []>} : vector<256x256xbf16>, vector<256x8xbf16>, vector<256x8xf32> -> vector<256x8xf32>
    %c2_73 = arith.constant 2 : index
    %c0_74 = arith.constant 0 : index
    %c0_75 = arith.constant 0 : index
    %107 = vector.load %arg4[%c2_73, %c0_74, %c0_75] : memref<4x256x1xf32, #tpu.memory_space<vmem>>, vector<1x256x1xf32>
    %108 = vector.shape_cast %107 : vector<1x256x1xf32> to vector<256x1xf32>
    %109 = vector.broadcast %108 : vector<256x1xf32> to vector<256x8xf32>
    %110 = arith.addf %106, %109 : vector<256x8xf32>
    %111 = arith.truncf %110 : vector<256x8xf32> to vector<256x8xbf16>
    %cst_76 = arith.constant 1.000980e-02 : bf16
    %112 = vector.broadcast %cst_76 : bf16 to vector<256x8xbf16>
    %113 = arith.mulf %112, %111 : vector<256x8xbf16>
    %114 = arith.maximumf %111, %113 : vector<256x8xbf16>
    %115 = vector.extract_strided_slice %114 {offsets = [0, 0], sizes = [128, 8], strides = [1, 1]} : vector<256x8xbf16> to vector<128x8xbf16>
    %116 = vector.extract_strided_slice %114 {offsets = [128, 0], sizes = [128, 8], strides = [1, 1]} : vector<256x8xbf16> to vector<128x8xbf16>
    %c2_77 = arith.constant 2 : index
    %c0_78 = arith.constant 0 : index
    %c0_79 = arith.constant 0 : index
    %117 = vector.load %arg5[%c2_77, %c0_78, %c0_79] : memref<4x4x128xbf16, #tpu.memory_space<vmem>>, vector<1x4x128xbf16>
    %118 = vector.shape_cast %117 : vector<1x4x128xbf16> to vector<4x128xbf16>
    %cst_80 = arith.constant dense<0.000000e+00> : vector<4x8xf32>
    %119 = tpu.matmul %118, %115, %cst_80 {dimension_numbers = #tpu.dot_dimension_numbers<[1], [0], [0], [1], [0, 0, 1, 1], [], []>} : vector<4x128xbf16>, vector<128x8xbf16>, vector<4x8xf32> -> vector<4x8xf32>
    %c2_81 = arith.constant 2 : index
    %c0_82 = arith.constant 0 : index
    %c0_83 = arith.constant 0 : index
    %120 = vector.load %arg6[%c2_81, %c0_82, %c0_83] : memref<4x4x1xf32, #tpu.memory_space<vmem>>, vector<1x4x1xf32>
    %121 = vector.shape_cast %120 : vector<1x4x1xf32> to vector<4x1xf32>
    %122 = vector.broadcast %121 : vector<4x1xf32> to vector<4x8xf32>
    %123 = arith.addf %119, %122 : vector<4x8xf32>
    %c2_84 = arith.constant 2 : index
    %c0_85 = arith.constant 0 : index
    %c0_86 = arith.constant 0 : index
    %124 = vector.load %arg7[%c2_84, %c0_85, %c0_86] : memref<4x4x128xbf16, #tpu.memory_space<vmem>>, vector<1x4x128xbf16>
    %125 = vector.shape_cast %124 : vector<1x4x128xbf16> to vector<4x128xbf16>
    %cst_87 = arith.constant dense<0.000000e+00> : vector<4x8xf32>
    %126 = tpu.matmul %125, %116, %cst_87 {dimension_numbers = #tpu.dot_dimension_numbers<[1], [0], [0], [1], [0, 0, 1, 1], [], []>} : vector<4x128xbf16>, vector<128x8xbf16>, vector<4x8xf32> -> vector<4x8xf32>
    %c2_88 = arith.constant 2 : index
    %c0_89 = arith.constant 0 : index
    %c0_90 = arith.constant 0 : index
    %127 = vector.load %arg8[%c2_88, %c0_89, %c0_90] : memref<4x4x1xf32, #tpu.memory_space<vmem>>, vector<1x4x1xf32>
    %128 = vector.shape_cast %127 : vector<1x4x1xf32> to vector<4x1xf32>
    %129 = vector.broadcast %128 : vector<4x1xf32> to vector<4x8xf32>
    %130 = arith.addf %126, %129 : vector<4x8xf32>
    %131 = math.exp %123 : vector<4x8xf32>
    %132 = arith.mulf %88, %131 : vector<4x8xf32>
    %133 = arith.addf %132, %130 : vector<4x8xf32>
    %cst_91 = arith.constant dense<0.000000e+00> : vector<8xf32>
    %134 = vector.multi_reduction <add>, %123, %cst_91 [0] : vector<4x8xf32> to vector<8xf32>
    %135 = vector.shape_cast %134 : vector<8xf32> to vector<1x8xf32>
    %136 = arith.addf %91, %135 : vector<1x8xf32>
    %c3 = arith.constant 3 : index
    %c0_92 = arith.constant 0 : index
    %c0_93 = arith.constant 0 : index
    %137 = vector.load %arg1[%c3, %c0_92, %c0_93] : memref<4x256x4xbf16, #tpu.memory_space<vmem>>, vector<1x256x4xbf16>
    %138 = vector.shape_cast %137 : vector<1x256x4xbf16> to vector<256x4xbf16>
    %139 = arith.truncf %133 : vector<4x8xf32> to vector<4x8xbf16>
    %cst_94 = arith.constant dense<0.000000e+00> : vector<256x8xf32>
    %140 = tpu.matmul %138, %139, %cst_94 {dimension_numbers = #tpu.dot_dimension_numbers<[1], [0], [0], [1], [0, 0, 1, 1], [], []>} : vector<256x4xbf16>, vector<4x8xbf16>, vector<256x8xf32> -> vector<256x8xf32>
    %c3_95 = arith.constant 3 : index
    %c0_96 = arith.constant 0 : index
    %c0_97 = arith.constant 0 : index
    %141 = vector.load %arg2[%c3_95, %c0_96, %c0_97] : memref<4x256x1xf32, #tpu.memory_space<vmem>>, vector<1x256x1xf32>
    %142 = vector.shape_cast %141 : vector<1x256x1xf32> to vector<256x1xf32>
    %143 = vector.broadcast %142 : vector<256x1xf32> to vector<256x8xf32>
    %144 = arith.addf %140, %143 : vector<256x8xf32>
    %145 = arith.truncf %144 : vector<256x8xf32> to vector<256x8xbf16>
    %cst_98 = arith.constant 1.000980e-02 : bf16
    %146 = vector.broadcast %cst_98 : bf16 to vector<256x8xbf16>
    %147 = arith.mulf %146, %145 : vector<256x8xbf16>
    %148 = arith.maximumf %145, %147 : vector<256x8xbf16>
    %c3_99 = arith.constant 3 : index
    %c0_100 = arith.constant 0 : index
    %c0_101 = arith.constant 0 : index
    %149 = vector.load %arg3[%c3_99, %c0_100, %c0_101] : memref<4x256x256xbf16, #tpu.memory_space<vmem>>, vector<1x256x256xbf16>
    %150 = vector.shape_cast %149 : vector<1x256x256xbf16> to vector<256x256xbf16>
    %cst_102 = arith.constant dense<0.000000e+00> : vector<256x8xf32>
    %151 = tpu.matmul %150, %148, %cst_102 {dimension_numbers = #tpu.dot_dimension_numbers<[1], [0], [0], [1], [0, 0, 1, 1], [], []>} : vector<256x256xbf16>, vector<256x8xbf16>, vector<256x8xf32> -> vector<256x8xf32>
    %c3_103 = arith.constant 3 : index
    %c0_104 = arith.constant 0 : index
    %c0_105 = arith.constant 0 : index
    %152 = vector.load %arg4[%c3_103, %c0_104, %c0_105] : memref<4x256x1xf32, #tpu.memory_space<vmem>>, vector<1x256x1xf32>
    %153 = vector.shape_cast %152 : vector<1x256x1xf32> to vector<256x1xf32>
    %154 = vector.broadcast %153 : vector<256x1xf32> to vector<256x8xf32>
    %155 = arith.addf %151, %154 : vector<256x8xf32>
    %156 = arith.truncf %155 : vector<256x8xf32> to vector<256x8xbf16>
    %cst_106 = arith.constant 1.000980e-02 : bf16
    %157 = vector.broadcast %cst_106 : bf16 to vector<256x8xbf16>
    %158 = arith.mulf %157, %156 : vector<256x8xbf16>
    %159 = arith.maximumf %156, %158 : vector<256x8xbf16>
    %160 = vector.extract_strided_slice %159 {offsets = [0, 0], sizes = [128, 8], strides = [1, 1]} : vector<256x8xbf16> to vector<128x8xbf16>
    %161 = vector.extract_strided_slice %159 {offsets = [128, 0], sizes = [128, 8], strides = [1, 1]} : vector<256x8xbf16> to vector<128x8xbf16>
    %c3_107 = arith.constant 3 : index
    %c0_108 = arith.constant 0 : index
    %c0_109 = arith.constant 0 : index
    %162 = vector.load %arg5[%c3_107, %c0_108, %c0_109] : memref<4x4x128xbf16, #tpu.memory_space<vmem>>, vector<1x4x128xbf16>
    %163 = vector.shape_cast %162 : vector<1x4x128xbf16> to vector<4x128xbf16>
    %cst_110 = arith.constant dense<0.000000e+00> : vector<4x8xf32>
    %164 = tpu.matmul %163, %160, %cst_110 {dimension_numbers = #tpu.dot_dimension_numbers<[1], [0], [0], [1], [0, 0, 1, 1], [], []>} : vector<4x128xbf16>, vector<128x8xbf16>, vector<4x8xf32> -> vector<4x8xf32>
    %c3_111 = arith.constant 3 : index
    %c0_112 = arith.constant 0 : index
    %c0_113 = arith.constant 0 : index
    %165 = vector.load %arg6[%c3_111, %c0_112, %c0_113] : memref<4x4x1xf32, #tpu.memory_space<vmem>>, vector<1x4x1xf32>
    %166 = vector.shape_cast %165 : vector<1x4x1xf32> to vector<4x1xf32>
    %167 = vector.broadcast %166 : vector<4x1xf32> to vector<4x8xf32>
    %168 = arith.addf %164, %167 : vector<4x8xf32>
    %c3_114 = arith.constant 3 : index
    %c0_115 = arith.constant 0 : index
    %c0_116 = arith.constant 0 : index
    %169 = vector.load %arg7[%c3_114, %c0_115, %c0_116] : memref<4x4x128xbf16, #tpu.memory_space<vmem>>, vector<1x4x128xbf16>
    %170 = vector.shape_cast %169 : vector<1x4x128xbf16> to vector<4x128xbf16>
    %cst_117 = arith.constant dense<0.000000e+00> : vector<4x8xf32>
    %171 = tpu.matmul %170, %161, %cst_117 {dimension_numbers = #tpu.dot_dimension_numbers<[1], [0], [0], [1], [0, 0, 1, 1], [], []>} : vector<4x128xbf16>, vector<128x8xbf16>, vector<4x8xf32> -> vector<4x8xf32>
    %c3_118 = arith.constant 3 : index
    %c0_119 = arith.constant 0 : index
    %c0_120 = arith.constant 0 : index
    %172 = vector.load %arg8[%c3_118, %c0_119, %c0_120] : memref<4x4x1xf32, #tpu.memory_space<vmem>>, vector<1x4x1xf32>
    %173 = vector.shape_cast %172 : vector<1x4x1xf32> to vector<4x1xf32>
    %174 = vector.broadcast %173 : vector<4x1xf32> to vector<4x8xf32>
    %175 = arith.addf %171, %174 : vector<4x8xf32>
    %176 = math.exp %168 : vector<4x8xf32>
    %177 = arith.mulf %133, %176 : vector<4x8xf32>
    %178 = arith.addf %177, %175 : vector<4x8xf32>
    %cst_121 = arith.constant dense<0.000000e+00> : vector<8xf32>
    %179 = vector.multi_reduction <add>, %168, %cst_121 [0] : vector<4x8xf32> to vector<8xf32>
    %180 = vector.shape_cast %179 : vector<8xf32> to vector<1x8xf32>
    %181 = arith.addf %136, %180 : vector<1x8xf32>
    %c0_122 = arith.constant 0 : index
    %c0_123 = arith.constant 0 : index
    %182 = vector.load %arg10[%c0_122, %c0_123] : memref<4x8xf32, #tpu.memory_space<vmem>>, vector<4x8xf32>
    tpu.vector_store %arg10[%c0_122, %c0_123], %178 {strides = array<i32>} : memref<4x8xf32, #tpu.memory_space<vmem>>, vector<4x8xf32>,
    %c0_124 = arith.constant 0 : index
    %c0_125 = arith.constant 0 : index
    %183 = vector.load %arg11[%c0_124, %c0_125] : memref<1x8xf32, #tpu.memory_space<vmem>>, vector<1x8xf32>
    tpu.vector_store %arg11[%c0_124, %c0_125], %181 {strides = array<i32>} : memref<1x8xf32, #tpu.memory_space<vmem>>, vector<1x8xf32>,
    return
  }
  func.func @transform_0(%arg0: i32) -> (i32, i32, i32) {
    %c0_i32 = arith.constant 0 : i32
    %c0_i32_0 = arith.constant 0 : i32
    %c0_i32_1 = arith.constant 0 : i32
    %c0_i32_2 = arith.constant 0 : i32
    return %c0_i32, %c0_i32_0, %c0_i32_1 : i32, i32, i32
  }
  func.func @transform_1(%arg0: i32) -> (i32, i32, i32) {
    %c0_i32 = arith.constant 0 : i32
    %c0_i32_0 = arith.constant 0 : i32
    %c0_i32_1 = arith.constant 0 : i32
    %c0_i32_2 = arith.constant 0 : i32
    return %c0_i32, %c0_i32_0, %c0_i32_1 : i32, i32, i32
  }
  func.func @transform_2(%arg0: i32) -> (i32, i32, i32) {
    %c0_i32 = arith.constant 0 : i32
    %c0_i32_0 = arith.constant 0 : i32
    %c0_i32_1 = arith.constant 0 : i32
    %c0_i32_2 = arith.constant 0 : i32
    return %c0_i32, %c0_i32_0, %c0_i32_1 : i32, i32, i32
  }
  func.func @transform_3(%arg0: i32) -> (i32, i32, i32) {
    %c0_i32 = arith.constant 0 : i32
    %c0_i32_0 = arith.constant 0 : i32
    %c0_i32_1 = arith.constant 0 : i32
    %c0_i32_2 = arith.constant 0 : i32
    return %c0_i32, %c0_i32_0, %c0_i32_1 : i32, i32, i32
  }
  func.func @transform_4(%arg0: i32) -> (i32, i32, i32) {
    %c0_i32 = arith.constant 0 : i32
    %c0_i32_0 = arith.constant 0 : i32
    %c0_i32_1 = arith.constant 0 : i32
    %c0_i32_2 = arith.constant 0 : i32
    return %c0_i32, %c0_i32_0, %c0_i32_1 : i32, i32, i32
  }
  func.func @transform_5(%arg0: i32) -> (i32, i32, i32) {
    %c0_i32 = arith.constant 0 : i32
    %c0_i32_0 = arith.constant 0 : i32
    %c0_i32_1 = arith.constant 0 : i32
    %c0_i32_2 = arith.constant 0 : i32
    return %c0_i32, %c0_i32_0, %c0_i32_1 : i32, i32, i32
  }
  func.func @transform_6(%arg0: i32) -> (i32, i32, i32) {
    %c0_i32 = arith.constant 0 : i32
    %c0_i32_0 = arith.constant 0 : i32
    %c0_i32_1 = arith.constant 0 : i32
    %c0_i32_2 = arith.constant 0 : i32
    return %c0_i32, %c0_i32_0, %c0_i32_1 : i32, i32, i32
  }
  func.func @transform_7(%arg0: i32) -> (i32, i32, i32) {
    %c0_i32 = arith.constant 0 : i32
    %c0_i32_0 = arith.constant 0 : i32
    %c0_i32_1 = arith.constant 0 : i32
    %c0_i32_2 = arith.constant 0 : i32
    return %c0_i32, %c0_i32_0, %c0_i32_1 : i32, i32, i32
  }
  func.func @transform_8(%arg0: i32) -> (i32, i32) {
    %c0_i32 = arith.constant 0 : i32
    %c0_i32_0 = arith.constant 0 : i32
    return %c0_i32, %arg0 : i32, i32
  }
  func.func @transform_9(%arg0: i32) -> (i32, i32) {
    %c0_i32 = arith.constant 0 : i32
    %c0_i32_0 = arith.constant 0 : i32
    return %c0_i32, %arg0 : i32, i32
  }
  func.func @transform_10(%arg0: i32) -> (i32, i32) {
    %c0_i32 = arith.constant 0 : i32
    %c0_i32_0 = arith.constant 0 : i32
    return %c0_i32, %arg0 : i32, i32
  }
}

</mosaic_0001>

<bundles_post_ra>
// kernel: tpu_custom_call.1
= control target key start
LH: loop header
LB: loop body
LE: loop exit
PB: predicated region body
PF: predicated region fallthrough
CT: control target
= control target key end

     0   :  { %16 = vsyncpa [#allocation3], 0  ;;  %vm393_vm0 = vcmask 1041408   ;;  %v7029_v3 = vmov 0   ;;  %vm344_vm1 = vcmask 31744   ;;  %s9347_s0 = inlined_call_operand.vmem [shape: bf16[4,256,4], index: 0, kind: input, shape index: {}]   ;;  %s9348_s1 = inlined_call_operand.vmem [shape: f32[4,256,1], index: 1, kind: input, shape index: {}]   ;;  %s9349_s2 = inlined_call_operand.vmem [shape: bf16[4,256,256], index: 2, kind: input, shape index: {}]   ;;  %s9350_s3 = inlined_call_operand.vmem [shape: f32[4,256,1], index: 3, kind: input, shape index: {}]   ;;  %s9351_s4 = inlined_call_operand.vmem [shape: bf16[4,4,128], index: 4, kind: input, shape index: {}]   ;;  %s9352_s5 = inlined_call_operand.vmem [shape: f32[4,4,1], index: 5, kind: input, shape index: {}]   ;;  %s9353_s6 = inlined_call_operand.vmem [shape: bf16[4,4,128], index: 6, kind: input, shape index: {}]   ;;  %s9354_s7 = inlined_call_operand.vmem [shape: f32[4,4,1], index: 7, kind: input, shape index: {}]   ;;  %s9355_s8 = inlined_call_operand.vmem [shape: f32[4,8], index: 8, kind: input, shape index: {}]   ;;  %s9356_s9 = inlined_call_operand.hbm [shape: f32[4,8], index: 9, kind: output, shape index: {0}]   ;;  %s9357_s10 = inlined_call_operand.hbm [shape: f32[1,8], index: 10, kind: output, shape index: {1}]  }
   0x1   :  { %v88_v0 = vld [vmem:[%s9348_s1 + $0x80] sm:$0xff]  ;;  %6715 = vset.pattern.permute.xlu1 %v7029_v3  ;;  %6714 = vset.pattern.permute.xlu0 %v7029_v3  ;;  %v89_v5 = vld [vmem:[%s9348_s1 + $0x88] sm:$0xff]  ;;  %v6718_v10 = vld [vmem:[%s9347_s0 + $0x10] sm:$0xff]  }
   0x2   :  { %v72_v1 = vld [vmem:[%s9348_s1] sm:$0xff]  ;;  %186 = vperm.xlu0 %6714, %v88_v0   ;;  %v73_v8 = vld [vmem:[%s9348_s1 + $0x8] sm:$0xff]  ;;  %v90_v11 = vld [vmem:[%s9348_s1 + $0x90] sm:$0xff] }
   0x3   :  { %v38_v2 = vld [vmem:[%s9355_s8] sm:$0xf]  ;;  %106 = vperm.xlu1 %6715, %v72_v1   ;;  %v6717_v9 = vld [vmem:[%s9347_s0 + $0x8] sm:$0xff]   ;;  %v91_v12 = vld [vmem:[%s9348_s1 + $0x98] sm:$0xff] }
   0x4   :  { %v71_v4 = vpack.c.bf16 %v38_v2, %v38_v2  ;;  %v6716_v6 = vld [vmem:[%s9347_s0] sm:$0xff]   ;;  %v74_v13 = vld [vmem:[%s9348_s1 + $0x10] sm:$0xff]  ;;  %v75_v14 = vld [vmem:[%s9348_s1 + $0x18] sm:$0xff] }
   0x5   :  { %6395 = vmatprep.mubr.msk.bf16.mxu0 %vm344_vm1, %v6716_v6  ;;  %v6719_v15 = vld [vmem:[%s9347_s0 + $0x18] sm:$0xff]   ;;  %v6720_v16 = vld [vmem:[%s9347_s0 + $0x20] sm:$0xff]   ;;  %v93_v18 = vld [vmem:[%s9348_s1 + $0xa8] sm:$0xff] }
   0x6   :  { %6705 = vmatprep.subr.msk.bf16.mxu0 %vm393_vm0, %v71_v4  ;;  %v395_v7 = vsel %vm393_vm0, %v71_v4, 0  ;;  %191 = vperm.xlu0 %6714, %v89_v5   ;;  %v92_v17 = vld [vmem:[%s9348_s1 + $0xa0] sm:$0xff]  ;;  %v77_v20 = vld [vmem:[%s9348_s1 + $0x28] sm:$0xff]  ;;  %v6722_v22 = vld [vmem:[%s9347_s0 + $0x30] sm:$0xff]  }
   0x7   :  { %6394 = vmatpush3.bf16.msra.mxu0 %v395_v7  ;;  %111 = vperm.xlu1 %6715, %v73_v8   ;;  %v76_v19 = vld [vmem:[%s9348_s1 + $0x20] sm:$0xff]  ;;  %v6721_v21 = vld [vmem:[%s9347_s0 + $0x28] sm:$0xff]   ;;  %v94_v23 = vld [vmem:[%s9348_s1 + $0xb0] sm:$0xff] }
   0x8   :  { %v95_v24 = vld [vmem:[%s9348_s1 + $0xb8] sm:$0xff]  ;;  %v78_v25 = vld [vmem:[%s9348_s1 + $0x30] sm:$0xff]  ;;  %v6724_v28 = vld [vmem:[%s9347_s0 + $0x40] sm:$0xff]  }
   0x9   :  { %v79_v26 = vld [vmem:[%s9348_s1 + $0x38] sm:$0xff]  ;;  %v96_v29 = vld [vmem:[%s9348_s1 + $0xc0] sm:$0xff]  ;;  %v97_v30 = vld [vmem:[%s9348_s1 + $0xc8] sm:$0xff] }
   0xa   :  { %6396 = vmatmul.mubr.msk.bf16.vlgmr.msra.gmra.mrb[0].mxu0 %vm344_vm1, %v6717_v9  ;;  %196 = vperm.xlu0 %6714, %v90_v11   ;;  %v6723_v27 = vld [vmem:[%s9347_s0 + $0x38] sm:$0xff]   ;;  %v80_v31 = vld [vmem:[%s9348_s1 + $0x40] sm:$0xff]  ;;  %v81_v32 = vld [vmem:[%s9348_s1 + $0x48] sm:$0xff] }
   0xb   :  { %6399 = vmatprep.mubr.msk.bf16.mxu0 %vm344_vm1, %v6718_v10  ;;  %201 = vperm.xlu1 %6715, %v91_v12   ;;  %v6725_v33 = vld [vmem:[%s9347_s0 + $0x48] sm:$0xff]   ;;  %v6726_v34 = vld [vmem:[%s9347_s0 + $0x50] sm:$0xff]   ;;  %v99_v36 = vld [vmem:[%s9348_s1 + $0xd8] sm:$0xff] }
   0xc   :  { %v98_v35 = vld [vmem:[%s9348_s1 + $0xd0] sm:$0xff]  ;;  %v83_v38 = vld [vmem:[%s9348_s1 + $0x58] sm:$0xff]  ;;  %v6728_v40 = vld [vmem:[%s9347_s0 + $0x60] sm:$0xff]  }
   0xd   :  { %v82_v37 = vld [vmem:[%s9348_s1 + $0x50] sm:$0xff]  ;;  %v6727_v39 = vld [vmem:[%s9347_s0 + $0x58] sm:$0xff]   ;;  %v100_v41 = vld [vmem:[%s9348_s1 + $0xe0] sm:$0xff] }
   0xe   :  { %116 = vperm.xlu0 %6714, %v74_v13   ;;  %v101_v42 = vld [vmem:[%s9348_s1 + $0xe8] sm:$0xff]  ;;  %v84_v43 = vld [vmem:[%s9348_s1 + $0x60] sm:$0xff]  ;;  %v6730_v46 = vld [vmem:[%s9347_s0 + $0x70] sm:$0xff]  }
   0xf   :  { %121 = vperm.xlu1 %6715, %v75_v14   ;;  %v85_v44 = vld [vmem:[%s9348_s1 + $0x68] sm:$0xff]  ;;  %v102_v47 = vld [vmem:[%s9348_s1 + $0xf0] sm:$0xff]  ;;  %v103_v48 = vld [vmem:[%s9348_s1 + $0xf8] sm:$0xff] }
  0x10   :  { %v6729_v45 = vld [vmem:[%s9347_s0 + $0x68] sm:$0xff]   ;;  %v86_v49 = vld [vmem:[%s9348_s1 + $0x70] sm:$0xff]  ;;  %v87_v50 = vld [vmem:[%s9348_s1 + $0x78] sm:$0xff] }
  0x11   :  { %v6731_v51 = vld [vmem:[%s9347_s0 + $0x78] sm:$0xff]   ;;  %v638_v52 = vld [vmem:[%s9350_s3] sm:$0xff]  ;;  %v639_v53 = vld [vmem:[%s9350_s3 + $0x8] sm:$0xff] }
  0x12   :  { %6400 = vmatmul.mubr.msk.bf16.gmra.mrb[4].mxu0 %vm344_vm1, %v6719_v15  ;;  %206 = vperm.xlu0 %6714, %v92_v17   ;;  %v640_v54 = vld [vmem:[%s9350_s3 + $0x10] sm:$0xff]  ;;  %v641_v55 = vld [vmem:[%s9350_s3 + $0x18] sm:$0xff]  ;;  %v642_v56 = vld [vmem:[%s9350_s3 + $0x20] sm:$0xff] }
  0x13   :  { %6403 = vmatprep.mubr.msk.bf16.mxu0 %vm344_vm1, %v6720_v16  ;;  %211 = vperm.xlu1 %6715, %v93_v18   ;;  %v643_v57 = vld [vmem:[%s9350_s3 + $0x28] sm:$0xff]  ;;  %v644_v58 = vld [vmem:[%s9350_s3 + $0x30] sm:$0xff]  ;;  %v645_v59 = vld [vmem:[%s9350_s3 + $0x38] sm:$0xff] }
  0x14   :  { %v646_v60 = vld [vmem:[%s9350_s3 + $0x40] sm:$0xff]  ;;  %v647_v61 = vld [vmem:[%s9350_s3 + $0x48] sm:$0xff]  ;;  %v648_v62 = vld [vmem:[%s9350_s3 + $0x50] sm:$0xff] }
  0x15   :  { %v649_v63 = vld [vmem:[%s9350_s3 + $0x58] sm:$0xff]  ;;  %v650_v0 = vld [vmem:[%s9350_s3 + $0x60] sm:$0xff]  ;;  %v651_v1 = vld [vmem:[%s9350_s3 + $0x68] sm:$0xff] }
  0x16   :  { %126 = vperm.xlu0 %6714, %v76_v19   ;;  %v652_v2 = vld [vmem:[%s9350_s3 + $0x70] sm:$0xff]  ;;  %v653_v3 = vld [vmem:[%s9350_s3 + $0x78] sm:$0xff]  ;;  %v654_v4 = vld [vmem:[%s9350_s3 + $0x80] sm:$0xff] }
  0x17   :  { %131 = vperm.xlu1 %6715, %v77_v20   ;;  %v655_v5 = vld [vmem:[%s9350_s3 + $0x88] sm:$0xff]  ;;  %v656_v6 = vld [vmem:[%s9350_s3 + $0x90] sm:$0xff]  ;;  %v657_v7 = vld [vmem:[%s9350_s3 + $0x98] sm:$0xff] }
  0x18   :  { %v658_v8 = vld [vmem:[%s9350_s3 + $0xa0] sm:$0xff]  ;;  %v659_v9 = vld [vmem:[%s9350_s3 + $0xa8] sm:$0xff]  ;;  %v660_v10 = vld [vmem:[%s9350_s3 + $0xb0] sm:$0xff] }
  0x19   :  { %v661_v11 = vld [vmem:[%s9350_s3 + $0xb8] sm:$0xff]  ;;  %v662_v12 = vld [vmem:[%s9350_s3 + $0xc0] sm:$0xff]  ;;  %v663_v13 = vld [vmem:[%s9350_s3 + $0xc8] sm:$0xff] }
  0x1a   :  { %6404 = vmatmul.mubr.msk.bf16.gmra.mrb[8].mxu0 %vm344_vm1, %v6721_v21  ;;  %216 = vperm.xlu0 %6714, %v94_v23   ;;  %v664_v14 = vld [vmem:[%s9350_s3 + $0xd0] sm:$0xff]  ;;  %v665_v15 = vld [vmem:[%s9350_s3 + $0xd8] sm:$0xff]  ;;  %v666_v16 = vld [vmem:[%s9350_s3 + $0xe0] sm:$0xff] }
  0x1b   :  { %6407 = vmatprep.mubr.msk.bf16.mxu0 %vm344_vm1, %v6722_v22  ;;  %221 = vperm.xlu1 %6715, %v95_v24   ;;  %v667_v17 = vld [vmem:[%s9350_s3 + $0xe8] sm:$0xff]  ;;  %v668_v18 = vld [vmem:[%s9350_s3 + $0xf0] sm:$0xff]  ;;  %v669_v19 = vld [vmem:[%s9350_s3 + $0xf8] sm:$0xff] }
  0x1c   :  { %v1200_v20 = vld [vmem:[%s9352_s5] sm:$0xf] }
  0x1d   :  { %v1247_v21 = vld [vmem:[%s9354_s7] sm:$0xf] }
  0x1e   :  { %136 = vperm.xlu0 %6714, %v78_v25   ;;  %v5265_v24 = vld [vmem:[%s9348_s1 + $0x180] sm:$0xff]  ;;  %v5266_v25 = vld [vmem:[%s9348_s1 + $0x188] sm:$0xff] }
  0x1f   :  { %141 = vperm.xlu1 %6715, %v79_v26  }
  0x22   :  { %6408 = vmatmul.mubr.msk.bf16.gmra.mrb[12].mxu0 %vm344_vm1, %v6723_v27  ;;  %226 = vperm.xlu0 %6714, %v96_v29   ;;  %v5250_v29 = vld [vmem:[%s9348_s1 + $0x108] sm:$0xff] }
  0x23   :  { %6411 = vmatprep.mubr.msk.bf16.mxu0 %vm344_vm1, %v6724_v28  ;;  %231 = vperm.xlu1 %6715, %v97_v30   ;;  %v5249_v28 = vld [vmem:[%s9348_s1 + $0x100] sm:$0xff] }
  0x26   :  { %146 = vperm.xlu0 %6714, %v80_v31  }
  0x27   :  { %151 = vperm.xlu1 %6715, %v81_v32  }
  0x2a   :  { %6412 = vmatmul.mubr.msk.bf16.gmra.mrb[16].mxu0 %vm344_vm1, %v6725_v33  ;;  %236 = vperm.xlu0 %6714, %v98_v35  }
  0x2b   :  { %6415 = vmatprep.mubr.msk.bf16.mxu0 %vm344_vm1, %v6726_v34  ;;  %241 = vperm.xlu1 %6715, %v99_v36  }
  0x2e   :  { %156 = vperm.xlu0 %6714, %v82_v37  }
  0x2f   :  { %161 = vperm.xlu1 %6715, %v83_v38  }
  0x32   :  { %6416 = vmatmul.mubr.msk.bf16.gmra.mrb[20].mxu0 %vm344_vm1, %v6727_v39  ;;  %246 = vperm.xlu0 %6714, %v100_v41  }
  0x33   :  { %6419 = vmatprep.mubr.msk.bf16.mxu0 %vm344_vm1, %v6728_v40  ;;  %251 = vperm.xlu1 %6715, %v101_v42  }
  0x36   :  { %166 = vperm.xlu0 %6714, %v84_v43  }
  0x37   :  { %171 = vperm.xlu1 %6715, %v85_v44  }
  0x3a   :  { %6420 = vmatmul.mubr.msk.bf16.gmra.mrb[24].mxu0 %vm344_vm1, %v6729_v45  ;;  %256 = vperm.xlu0 %6714, %v102_v47  }
  0x3b   :  { %6423 = vmatprep.mubr.msk.bf16.mxu0 %vm344_vm1, %v6730_v46  ;;  %261 = vperm.xlu1 %6715, %v103_v48  }
  0x3e   :  { %176 = vperm.xlu0 %6714, %v86_v49  }
  0x3f   :  { %181 = vperm.xlu1 %6715, %v87_v50  }
  0x42   :  { %6424 = vmatmul.mubr.msk.bf16.gmra.mrb[28].mxu0 %vm344_vm1, %v6731_v51  ;;  %672 = vperm.xlu0 %6714, %v638_v52  }
  0x43   :  { %677 = vperm.xlu1 %6715, %v639_v53  }
  0x46   :  { %682 = vperm.xlu0 %6714, %v640_v54  }
  0x47   :  { %687 = vperm.xlu1 %6715, %v641_v55  }
  0x4a   :  { %692 = vperm.xlu0 %6714, %v642_v56  }
  0x4b   :  { %697 = vperm.xlu1 %6715, %v643_v57  }
  0x4e   :  { %702 = vperm.xlu0 %6714, %v644_v58  }
  0x4f   :  { %707 = vperm.xlu1 %6715, %v645_v59  }
  0x52   :  { %712 = vperm.xlu0 %6714, %v646_v60  }
  0x53   :  { %717 = vperm.xlu1 %6715, %v647_v61  }
  0x56   :  { %722 = vperm.xlu0 %6714, %v648_v62  }
  0x57   :  { %727 = vperm.xlu1 %6715, %v649_v63  }
  0x5a   :  { %732 = vperm.xlu0 %6714, %v650_v0  }
  0x5b   :  { %737 = vperm.xlu1 %6715, %v651_v1  }
  0x5e   :  { %742 = vperm.xlu0 %6714, %v652_v2  }
  0x5f   :  { %747 = vperm.xlu1 %6715, %v653_v3  }
  0x62   :  { %752 = vperm.xlu0 %6714, %v654_v4  }
  0x63   :  { %757 = vperm.xlu1 %6715, %v655_v5  }
  0x66   :  { %762 = vperm.xlu0 %6714, %v656_v6  }
  0x67   :  { %767 = vperm.xlu1 %6715, %v657_v7  }
  0x6a   :  { %772 = vperm.xlu0 %6714, %v658_v8  }
  0x6b   :  { %777 = vperm.xlu1 %6715, %v659_v9  }
  0x6e   :  { %782 = vperm.xlu0 %6714, %v660_v10  }
  0x6f   :  { %787 = vperm.xlu1 %6715, %v661_v11  }
  0x72   :  { %792 = vperm.xlu0 %6714, %v662_v12  }
  0x73   :  { %797 = vperm.xlu1 %6715, %v663_v13  }
  0x76   :  { %802 = vperm.xlu0 %6714, %v664_v14  }
  0x77   :  { %807 = vperm.xlu1 %6715, %v665_v15  }
  0x7a   :  { %812 = vperm.xlu0 %6714, %v666_v16  }
  0x7b   :  { %817 = vperm.xlu1 %6715, %v667_v17  }
  0x7e   :  { %822 = vperm.xlu0 %6714, %v668_v18  }
  0x7f   :  { %827 = vperm.xlu1 %6715, %v669_v19  }
  0x81   :  { %v7356_v22 = vpop.permute.xlu0 %186 }
  0x82   :  { %v7358_v23 = vpop.permute.xlu1 %106  ;;  %1203 = vperm.xlu0 %6714, %v1200_v20  }
  0x83   :  { %1250 = vperm.xlu1 %6715, %v1247_v21  }
  0x85   :  { %v7366_v26 = vpop.permute.xlu0 %191 }
  0x86   :  { %v7368_v27 = vpop.permute.xlu1 %111  ;;  %1455 = vperm.xlu0 %6714, %v5265_v24  }
  0x87   :  { %1460 = vperm.xlu1 %6715, %v5266_v25  }
  0x88   :  { %17 = vsyncpa [#allocation5], 0  ;;  %v5267_v32 = vld [vmem:[%s9348_s1 + $0x190] sm:$0xff]  ;;  %v5268_v33 = vld [vmem:[%s9348_s1 + $0x198] sm:$0xff]  ;;  %vm7031_vm2 = vmmov 0   ;;  %vm1297_vm3 = vcmask 60416  }
  0x89   :  { %v7376_v30 = vpop.permute.xlu0 %196  ;;  %v5251_v36 = vld [vmem:[%s9348_s1 + $0x110] sm:$0xff]  ;;  %v5252_v37 = vld [vmem:[%s9348_s1 + $0x118] sm:$0xff]  ;;  %v5269_v40 = vld [vmem:[%s9348_s1 + $0x1a0] sm:$0xff]  ;;  %vm5123_vm4 = vcmask 57344  }
  0x8a   :  { %v7378_v31 = vpop.permute.xlu1 %201  ;;  %1375 = vperm.xlu0 %6714, %v5249_v28   ;;  %v5270_v41 = vld [vmem:[%s9348_s1 + $0x1a8] sm:$0xff]  ;;  %v5253_v44 = vld [vmem:[%s9348_s1 + $0x120] sm:$0xff]  ;;  %v5271_v48 = vld [vmem:[%s9348_s1 + $0x1b0] sm:$0xff] }
  0x8b   :  { %1380 = vperm.xlu1 %6715, %v5250_v29   ;;  %v5254_v45 = vld [vmem:[%s9348_s1 + $0x128] sm:$0xff]  ;;  %v5272_v49 = vld [vmem:[%s9348_s1 + $0x1b8] sm:$0xff]  ;;  %v5255_v52 = vld [vmem:[%s9348_s1 + $0x130] sm:$0xff] }
  0x8c   :  { %v5256_v53 = vld [vmem:[%s9348_s1 + $0x138] sm:$0xff]  ;;  %v5273_v56 = vld [vmem:[%s9348_s1 + $0x1c0] sm:$0xff]  ;;  %v5274_v57 = vld [vmem:[%s9348_s1 + $0x1c8] sm:$0xff] }
  0x8d   :  { %v7386_v34 = vpop.permute.xlu0 %116  ;;  %v6734_v58 = vld [vmem:[%s9349_s2 + $0x44] ss:$8 sps:$4 sm:$0xff]   ;;  %v5275_v2 = vld [vmem:[%s9348_s1 + $0x1d0] sm:$0xff]  ;;  %v5276_v3 = vld [vmem:[%s9348_s1 + $0x1d8] sm:$0xff] }
  0x8e   :  { %v7388_v35 = vpop.permute.xlu1 %121  ;;  %1465 = vperm.xlu0 %6714, %v5267_v32   ;;  %v6737_v59 = vld [vmem:[%s9349_s2 + $0x4] ss:$8 sps:$4 sm:$0xff]   ;;  %1054 = vmatprep.mubr.bf16.mxu1 %v6734_v58  ;;  %v5259_v6 = vld [vmem:[%s9348_s1 + $0x150] sm:$0xff]  ;;  %v5260_v7 = vld [vmem:[%s9348_s1 + $0x158] sm:$0xff] }
  0x8f   :  { %1470 = vperm.xlu1 %6715, %v5268_v33   ;;  %v5257_v62 = vld [vmem:[%s9348_s1 + $0x140] sm:$0xff]  ;;  %v5258_v63 = vld [vmem:[%s9348_s1 + $0x148] sm:$0xff]  ;;  %1022 = vmatprep.mubr.bf16.mxu0 %v6737_v59  ;;  %v5279_v18 = vld [vmem:[%s9348_s1 + $0x1f0] sm:$0xff] }
  0x90   :  { %v5277_v10 = vld [vmem:[%s9348_s1 + $0x1e0] sm:$0xff]  ;;  %v5278_v11 = vld [vmem:[%s9348_s1 + $0x1e8] sm:$0xff]  ;;  %v5280_v19 = vld [vmem:[%s9348_s1 + $0x1f8] sm:$0xff] }
  0x91   :  { %v7396_v38 = vpop.permute.xlu0 %206  ;;  %v5261_v14 = vld [vmem:[%s9348_s1 + $0x160] sm:$0xff]  ;;  %v5262_v15 = vld [vmem:[%s9348_s1 + $0x168] sm:$0xff]  ;;  %v5263_v24 = vld [vmem:[%s9348_s1 + $0x170] sm:$0xff] }
  0x92   :  { %v7398_v39 = vpop.permute.xlu1 %211  ;;  %1385 = vperm.xlu0 %6714, %v5251_v36   ;;  %v5264_v25 = vld [vmem:[%s9348_s1 + $0x178] sm:$0xff]  ;;  %v5345_v32 = vld [vmem:[%s9350_s3 + $0x100] sm:$0xff]  ;;  %v5346_v33 = vld [vmem:[%s9350_s3 + $0x108] sm:$0xff] }
  0x93   :  { %1390 = vperm.xlu1 %6715, %v5252_v37  }
  0x95   :  { %v7406_v42 = vpop.permute.xlu0 %126 }
  0x96   :  { %v7408_v43 = vpop.permute.xlu1 %131  ;;  %1475 = vperm.xlu0 %6714, %v5269_v40   ;;  %v5347_v40 = vld [vmem:[%s9350_s3 + $0x110] sm:$0xff] }
  0x97   :  { %1480 = vperm.xlu1 %6715, %v5270_v41   ;;  %v5348_v41 = vld [vmem:[%s9350_s3 + $0x118] sm:$0xff] }
  0x99   :  { %v7416_v46 = vpop.permute.xlu0 %216 }
  0x9a   :  { %v7418_v47 = vpop.permute.xlu1 %221  ;;  %1395 = vperm.xlu0 %6714, %v5253_v44  }
  0x9b   :  { %1400 = vperm.xlu1 %6715, %v5254_v45  }
  0x9d   :  { %v7426_v50 = vpop.permute.xlu0 %136 }
  0x9e   :  { %v7428_v51 = vpop.permute.xlu1 %141  ;;  %1485 = vperm.xlu0 %6714, %v5271_v48   ;;  %v5349_v48 = vld [vmem:[%s9350_s3 + $0x120] sm:$0xff] }
  0x9f   :  { %1490 = vperm.xlu1 %6715, %v5272_v49   ;;  %v5350_v49 = vld [vmem:[%s9350_s3 + $0x128] sm:$0xff] }
  0xa1   :  { %v7436_v54 = vpop.permute.xlu0 %226 }
  0xa2   :  { %v7438_v55 = vpop.permute.xlu1 %231  ;;  %1405 = vperm.xlu0 %6714, %v5255_v52  }
  0xa3   :  { %1410 = vperm.xlu1 %6715, %v5256_v53  }
  0xa5   :  { %v7452_v60 = vpop.permute.xlu0 %146 }
  0xa6   :  { %v7454_v61 = vpop.permute.xlu1 %151  ;;  %1495 = vperm.xlu0 %6714, %v5273_v56   ;;  %v5351_v56 = vld [vmem:[%s9350_s3 + $0x130] sm:$0xff] }
  0xa7   :  { %1500 = vperm.xlu1 %6715, %v5274_v57   ;;  %v5352_v57 = vld [vmem:[%s9350_s3 + $0x138] sm:$0xff] }
  0xa9   :  { %v7462_v0 = vpop.permute.xlu0 %236 }
  0xaa   :  { %v7464_v1 = vpop.permute.xlu1 %241  ;;  %1415 = vperm.xlu0 %6714, %v5257_v62   ;;  %v5353_v62 = vld [vmem:[%s9350_s3 + $0x140] sm:$0xff] }
  0xab   :  { %1420 = vperm.xlu1 %6715, %v5258_v63   ;;  %v5354_v63 = vld [vmem:[%s9350_s3 + $0x148] sm:$0xff] }
  0xad   :  { %v7472_v4 = vpop.permute.xlu0 %156 }
  0xae   :  { %v7474_v5 = vpop.permute.xlu1 %161  ;;  %1505 = vperm.xlu0 %6714, %v5275_v2  }
  0xaf   :  { %1510 = vperm.xlu1 %6715, %v5276_v3  }
  0xb1   :  { %v7482_v8 = vpop.permute.xlu0 %246 }
  0xb2   :  { %v7484_v9 = vpop.permute.xlu1 %251  ;;  %1425 = vperm.xlu0 %6714, %v5259_v6   ;;  %v5355_v6 = vld [vmem:[%s9350_s3 + $0x150] sm:$0xff] }
  0xb3   :  { %1430 = vperm.xlu1 %6715, %v5260_v7   ;;  %v5356_v7 = vld [vmem:[%s9350_s3 + $0x158] sm:$0xff] }
  0xb5   :  { %v7492_v12 = vpop.permute.xlu0 %166 }
  0xb6   :  { %v7494_v13 = vpop.permute.xlu1 %171  ;;  %1515 = vperm.xlu0 %6714, %v5277_v10  }
  0xb7   :  { %1520 = vperm.xlu1 %6715, %v5278_v11  }
  0xb9   :  { %v7502_v16 = vpop.permute.xlu0 %256 }
  0xba   :  { %v7504_v17 = vpop.permute.xlu1 %261  ;;  %1435 = vperm.xlu0 %6714, %v5261_v14  }
  0xbb   :  { %1440 = vperm.xlu1 %6715, %v5262_v15  }
  0xbd   :  { %v7512_v20 = vpop.permute.xlu0 %176 }
  0xbe   :  { %v7514_v21 = vpop.permute.xlu1 %181  ;;  %1525 = vperm.xlu0 %6714, %v5279_v18   ;;  %v5357_v18 = vld [vmem:[%s9350_s3 + $0x160] sm:$0xff] }
  0xbf   :  { %1530 = vperm.xlu1 %6715, %v5280_v19   ;;  %v5358_v19 = vld [vmem:[%s9350_s3 + $0x168] sm:$0xff] }
  0xc1   :  { %v7522_v28 = vpop.permute.xlu0 %672 }
  0xc2   :  { %v7524_v29 = vpop.permute.xlu1 %677  ;;  %1445 = vperm.xlu0 %6714, %v5263_v24  }
  0xc3   :  { %1450 = vperm.xlu1 %6715, %v5264_v25  }
  0xc5   :  { %v7532_v36 = vpop.permute.xlu0 %682 }
  0xc6   :  { %v7534_v37 = vpop.permute.xlu1 %687  ;;  %1941 = vperm.xlu0 %6714, %v5345_v32  }
  0xc7   :  { %1946 = vperm.xlu1 %6715, %v5346_v33  }
  0xc9   :  { %v7542_v44 = vpop.permute.xlu0 %692 }
  0xca   :  { %v7544_v45 = vpop.permute.xlu1 %697  ;;  %1951 = vperm.xlu0 %6714, %v5347_v40  }
  0xcb   :  { %1956 = vperm.xlu1 %6715, %v5348_v41  }
  0xcd   :  { %v7552_v52 = vpop.permute.xlu0 %702 }
  0xce   :  { %v7554_v53 = vpop.permute.xlu1 %707  ;;  %1961 = vperm.xlu0 %6714, %v5349_v48  }
  0xcf   :  { %1966 = vperm.xlu1 %6715, %v5350_v49  }
  0xd1   :  { %v7562_v58 = vpop.permute.xlu0 %712 }
  0xd2   :  { %v7564_v59 = vpop.permute.xlu1 %717  ;;  %1971 = vperm.xlu0 %6714, %v5351_v56  }
  0xd3   :  { %1976 = vperm.xlu1 %6715, %v5352_v57   ;;  %v5359_v57 = vld [vmem:[%s9350_s3 + $0x170] sm:$0xff] }
  0xd5   :  { %v7572_v2 = vpop.permute.xlu0 %722 }
  0xd6   :  { %v7574_v3 = vpop.permute.xlu1 %727  ;;  %1981 = vperm.xlu0 %6714, %v5353_v62  }
  0xd7   :  { %1986 = vperm.xlu1 %6715, %v5354_v63  }
  0xd9   :  { %v7582_v10 = vpop.permute.xlu0 %732 }
  0xda   :  { %v7584_v11 = vpop.permute.xlu1 %737  ;;  %1991 = vperm.xlu0 %6714, %v5355_v6  }
  0xdb   :  { %1996 = vperm.xlu1 %6715, %v5356_v7   ;;  %v5362_v7 = vld [vmem:[%s9350_s3 + $0x188] sm:$0xff] }
  0xdd   :  { %v6397_v14 = vpop.f32.mrb[0].mxu0  ;;  %v7594_v33 = vpop.permute.xlu0 %742 }
  0xde   :  { %v431_v15 = vpop.f32.mrb[1].mxu0  ;;  %v440_v25 = vadd.f32 %v6397_v14, %v7386_v34  ;;  %v7596_v40 = vpop.permute.xlu1 %747  ;;  %2001 = vperm.xlu0 %6714, %v5357_v18   ;;  %v5360_v34 = vld [vmem:[%s9350_s3 + $0x178] sm:$0xff] }
  0xdf   :  { %v6398_v24 = vpop.f32.mrb[2].mxu0  ;;  %2006 = vperm.xlu1 %6715, %v5358_v19   ;;  %v432_v48 = vadd.f32 %v431_v15, %v7358_v23 }
  0xe0   :  { %v443_v32 = vadd.f32 %v6398_v24, %v7388_v35  ;;  %v434_v41 = vpop.f32.mrb[3].mxu0 }
  0xe1   :  { %v435_v56 = vadd.f32 %v434_v41, %v7368_v27  ;;  %v7610_v62 = vpop.permute.xlu0 %752  ;;  %v5361_v27 = vld [vmem:[%s9350_s3 + $0x180] sm:$0xff] }
  0xe2   :  { %v7599_v49 = vpack.c.bf16 %v443_v32, %v440_v25  ;;  %v7612_v63 = vpop.permute.xlu1 %757  ;;  %2011 = vperm.xlu0 %6714, %v5359_v57  }
  0xe3   :  { %v7608_v35 = vpack.c.bf16 %v435_v56, %v432_v48  ;;  %2016 = vperm.xlu1 %6715, %v5360_v34   ;;  %v5363_v56 = vld [vmem:[%s9350_s3 + $0x190] sm:$0xff] }
  0xe5   :  { %v6401_v23 = vpop.f32.mrb[4].mxu0  ;;  %v7622_v19 = vpop.permute.xlu0 %762 }
  0xe6   :  { %v447_v6 = vpop.f32.mrb[5].mxu0  ;;  %v456_v15 = vadd.f32 %v6401_v23, %v7426_v50  ;;  %v7624_v24 = vpop.permute.xlu1 %767  ;;  %2021 = vperm.xlu0 %6714, %v5361_v27   ;;  %v5364_v50 = vld [vmem:[%s9350_s3 + $0x198] sm:$0xff] }
  0xe7   :  { %v6402_v14 = vpop.f32.mrb[6].mxu0  ;;  %2026 = vperm.xlu1 %6715, %v5362_v7   ;;  %v448_v32 = vadd.f32 %v447_v6, %v7406_v42  ;;  %v5366_v6 = vld [vmem:[%s9350_s3 + $0x1a8] sm:$0xff] }
  0xe8   :  { %v459_v18 = vadd.f32 %v6402_v14, %v7428_v51  ;;  %v450_v25 = vpop.f32.mrb[7].mxu0 }
  0xe9   :  { %v451_v48 = vadd.f32 %v450_v25, %v7408_v43  ;;  %v7638_v57 = vpop.permute.xlu0 %772  ;;  %v5365_v43 = vld [vmem:[%s9350_s3 + $0x1a0] sm:$0xff] }
  0xea   :  { %v7627_v41 = vpack.c.bf16 %v459_v18, %v456_v15  ;;  %v7640_v34 = vpop.permute.xlu1 %777  ;;  %2031 = vperm.xlu0 %6714, %v5363_v56  }
  0xeb   :  { %v7636_v51 = vpack.c.bf16 %v451_v48, %v448_v32  ;;  %2036 = vperm.xlu1 %6715, %v5364_v50   ;;  %v5367_v50 = vld [vmem:[%s9350_s3 + $0x1b0] sm:$0xff] }
  0xed   :  { %v6405_v42 = vpop.f32.mrb[8].mxu0  ;;  %v7650_v15 = vpop.permute.xlu0 %782 }
  0xee   :  { %v463_v23 = vpop.f32.mrb[9].mxu0  ;;  %v472_v7 = vadd.f32 %v6405_v42, %v7472_v4  ;;  %v7652_v18 = vpop.permute.xlu1 %787  ;;  %2041 = vperm.xlu0 %6714, %v5365_v43   ;;  %v5368_v4 = vld [vmem:[%s9350_s3 + $0x1b8] sm:$0xff] }
  0xef   :  { %v6406_v27 = vpop.f32.mrb[10].mxu0  ;;  %9360 = vst [vmem:[#allocation8_spill] sm:$0xff] %v7652_v18  ;;  %2046 = vperm.xlu1 %6715, %v5366_v6   ;;  %v464_v32 = vadd.f32 %v463_v23, %v7452_v60  ;;  %v5370_v6 = vld [vmem:[%s9350_s3 + $0x1c8] sm:$0xff] }
  0xf0   :  { %v475_v14 = vadd.f32 %v6406_v27, %v7474_v5  ;;  %v466_v25 = vpop.f32.mrb[11].mxu0 }
  0xf1   :  { %v467_v56 = vadd.f32 %v466_v25, %v7454_v61  ;;  %v7666_v42 = vpop.permute.xlu0 %792  ;;  %v5369_v61 = vld [vmem:[%s9350_s3 + $0x1c0] sm:$0xff] }
  0xf2   :  { %v7655_v48 = vpack.c.bf16 %v475_v14, %v472_v7  ;;  %9361 = vst [vmem:[#allocation9_spill] sm:$0xff] %v7666_v42  ;;  %v7668_v43 = vpop.permute.xlu1 %797  ;;  %2051 = vperm.xlu0 %6714, %v5367_v50   ;;  %v5371_v42 = vld [vmem:[%s9350_s3 + $0x1d0] sm:$0xff] }
  0xf3   :  { %v7664_v5 = vpack.c.bf16 %v467_v56, %v464_v32  ;;  %9362 = vst [vmem:[#allocation10_spill] sm:$0xff] %v7668_v43  ;;  %2056 = vperm.xlu1 %6715, %v5368_v4  }
  0xf5   :  { %v6409_v60 = vpop.f32.mrb[12].mxu0  ;;  %v7678_v25 = vpop.permute.xlu0 %802 }
  0xf6   :  { %v479_v23 = vpop.f32.mrb[13].mxu0  ;;  %v488_v7 = vadd.f32 %v6409_v60, %v7512_v20  ;;  %9363 = vst [vmem:[#allocation11_spill] sm:$0xff] %v7678_v25  ;;  %v7680_v32 = vpop.permute.xlu1 %807  ;;  %2061 = vperm.xlu0 %6714, %v5369_v61   ;;  %v5372_v20 = vld [vmem:[%s9350_s3 + $0x1d8] sm:$0xff] }
  0xf7   :  { %v6410_v27 = vpop.f32.mrb[14].mxu0  ;;  %9364 = vst [vmem:[#allocation12_spill] sm:$0xff] %v7680_v32  ;;  %2066 = vperm.xlu1 %6715, %v5370_v6   ;;  %v480_v50 = vadd.f32 %v479_v23, %v7492_v12  ;;  %v5374_v6 = vld [vmem:[%s9350_s3 + $0x1e8] sm:$0xff] }
  0xf8   :  { %v491_v14 = vadd.f32 %v6410_v27, %v7514_v21  ;;  %v482_v56 = vpop.f32.mrb[15].mxu0 }
  0xf9   :  { %v483_v43 = vadd.f32 %v482_v56, %v7494_v13  ;;  %v7694_v60 = vpop.permute.xlu0 %812  ;;  %v5373_v13 = vld [vmem:[%s9350_s3 + $0x1e0] sm:$0xff] }
  0xfa   :  { %v7683_v4 = vpack.c.bf16 %v491_v14, %v488_v7  ;;  %9365 = vst [vmem:[#allocation13_spill] sm:$0xff] %v7694_v60  ;;  %v7696_v61 = vpop.permute.xlu1 %817  ;;  %2071 = vperm.xlu0 %6714, %v5371_v42   ;;  %v5375_v60 = vld [vmem:[%s9350_s3 + $0x1f0] sm:$0xff] }
  0xfb   :  { %v7692_v21 = vpack.c.bf16 %v483_v43, %v480_v50  ;;  %9366 = vst [vmem:[#allocation14_spill] sm:$0xff] %v7696_v61  ;;  %2076 = vperm.xlu1 %6715, %v5372_v20  }
  0xfd   :  { %v6413_v12 = vpop.f32.mrb[16].mxu0  ;;  %v7706_v14 = vpop.permute.xlu0 %822 }
  0xfe   :  { %v495_v23 = vpop.f32.mrb[17].mxu0  ;;  %v504_v43 = vadd.f32 %v6413_v12, %v7376_v30  ;;  %9367 = vst [vmem:[#allocation15_spill] sm:$0xff] %v7706_v14  ;;  %v7708_v56 = vpop.permute.xlu1 %827  ;;  %2081 = vperm.xlu0 %6714, %v5373_v13   ;;  %v5376_v30 = vld [vmem:[%s9350_s3 + $0x1f8] sm:$0xff] }
  0xff   :  { %v6414_v27 = vpop.f32.mrb[18].mxu0  ;;  %9368 = vst [vmem:[#allocation16_spill] sm:$0xff] %v7708_v56  ;;  %2086 = vperm.xlu1 %6715, %v5374_v6   ;;  %v496_v50 = vadd.f32 %v495_v23, %v7356_v22  ;;  %v5410_v22 = vld [vmem:[%s9352_s5 + $0x4] sm:$0xf]  ;;  %v574_v23 = vmul.bf16 1009007652, %v7608_v35 }
 0x100   :  { %v507_v7 = vadd.f32 %v6414_v27, %v7378_v31  ;;  %v498_v42 = vpop.f32.mrb[19].mxu0 }
 0x101   :  { %v499_v61 = vadd.f32 %v498_v42, %v7366_v26  ;;  %v7718_v12 = vpop.permute.xlu0 %1203 }
 0x102   :  { %v567_v20 = vpack.c.bf16 %v507_v7, %v504_v43  ;;  %9369 = vst [vmem:[#allocation17_spill] sm:$0xff] %v7718_v12  ;;  %v7720_v27 = vpop.permute.xlu1 %1250  ;;  %2091 = vperm.xlu0 %6714, %v5375_v60   ;;  %v575_v60 = vmul.bf16 1009007652, %v7599_v49 }
 0x103   :  { %v566_v31 = vpack.c.bf16 %v499_v61, %v496_v50  ;;  %9370 = vst [vmem:[#allocation18_spill] sm:$0xff] %v7720_v27  ;;  %2096 = vperm.xlu1 %6715, %v5376_v30   ;;  %v5412_v61 = vld [vmem:[%s9354_s7 + $0x4] sm:$0xf]  ;;  %v590_v30 = vmax.bf16 %v574_v23, %v7608_v35 }
 0x104   :  { %v583_v26 = vmul.bf16 1009007652, %v567_v20 }
 0x105   :  { %v6417_v13 = vpop.f32.mrb[20].mxu0  ;;  %v582_v6 = vmul.bf16 1009007652, %v566_v31  ;;  %v7731_v27 = vpop.permute.xlu0 %1455 }
 0x106   :  { %v511_v43 = vpop.f32.mrb[21].mxu0  ;;  %v520_v42 = vadd.f32 %v6417_v13, %v7416_v46  ;;  %v7733_v12 = vpop.permute.xlu1 %1460  ;;  %2474 = vperm.xlu0 %6714, %v5410_v22   ;;  %v599_v32 = vmax.bf16 %v583_v26, %v567_v20 }
 0x107   :  { %v6418_v7 = vpop.f32.mrb[22].mxu0  ;;  %v598_v56 = vmax.bf16 %v582_v6, %v566_v31  ;;  %2523 = vperm.xlu1 %6715, %v5412_v61   ;;  %v512_v25 = vadd.f32 %v511_v43, %v7396_v38  ;;  %v5462_v31 = vld [vmem:[%s9348_s1 + $0x288] sm:$0xff] }
 0x108   :  { %v523_v50 = vadd.f32 %v6418_v7, %v7418_v47  ;;  %v514_v14 = vpop.f32.mrb[23].mxu0  ;;  %v5461_v47 = vld [vmem:[%s9348_s1 + $0x280] sm:$0xff] }
 0x109   :  { %v515_v46 = vadd.f32 %v514_v14, %v7398_v39  ;;  %5822 = vmatprep.subr.bf16.mxu0 %v598_v56  ;;  %6689 = vmatprep.subr.bf16.mxu1 %v598_v56  ;;  %v7745_v20 = vpop.permute.xlu0 %1375  ;;  %v591_v39 = vmax.bf16 %v575_v60, %v7599_v49  ;;  %v576_v14 = vmul.bf16 1009007652, %v7636_v51 }
 0x10a   :  { %v569_v18 = vpack.c.bf16 %v523_v50, %v520_v42  ;;  %5823 = vmatpush3.bf16.msra.mxu0 %v590_v30  ;;  %6697 = vmatpush3.bf16.msra.mxu1 %v590_v30  ;;  %v7747_v38 = vpop.permute.xlu1 %1380  ;;  %v577_v42 = vmul.bf16 1009007652, %v7627_v41 }
 0x10b   :  { %v568_v35 = vpack.c.bf16 %v515_v46, %v512_v25  ;;  %5824 = vmatprep.subr.bf16.mxu0 %v599_v32  ;;  %6690 = vmatprep.subr.bf16.mxu1 %v599_v32  ;;  %v5445_v25 = vld [vmem:[%s9348_s1 + $0x200] sm:$0xff]  ;;  %v5446_v32 = vld [vmem:[%s9348_s1 + $0x208] sm:$0xff]  ;;  %v592_v50 = vmax.bf16 %v576_v14, %v7636_v51 }
 0x10c   :  { %v585_v56 = vmul.bf16 1009007652, %v569_v18  ;;  %2727 = vperm.xlu0 %6714, %v5461_v47   ;;  %2732 = vperm.xlu1 %6715, %v5462_v31   ;;  %v5464_v31 = vld [vmem:[%s9348_s1 + $0x298] sm:$0xff] }
 0x10d   :  { %v6421_v22 = vpop.f32.mrb[24].mxu0  ;;  %v584_v23 = vmul.bf16 1009007652, %v568_v35  ;;  %v7759_v43 = vpop.permute.xlu0 %1465 }
 0x10e   :  { %v527_v26 = vpop.f32.mrb[25].mxu0  ;;  %5825 = vmatpush3.bf16.msra.mxu0 %v591_v39  ;;  %6698 = vmatpush3.bf16.msra.mxu1 %v591_v39  ;;  %v536_v49 = vadd.f32 %v6421_v22, %v7462_v0  ;;  %v7761_v61 = vpop.permute.xlu1 %1470  ;;  %v601_v30 = vmax.bf16 %v585_v56, %v569_v18 }
 0x10f   :  { %v6422_v13 = vpop.f32.mrb[26].mxu0  ;;  %v600_v7 = vmax.bf16 %v584_v23, %v568_v35  ;;  %v528_v46 = vadd.f32 %v527_v26, %v7436_v54  ;;  %v578_v35 = vmul.bf16 1009007652, %v7664_v5  ;;  %v5447_v23 = vld [vmem:[%s9348_s1 + $0x210] sm:$0xff]  ;;  %v5448_v26 = vld [vmem:[%s9348_s1 + $0x218] sm:$0xff] }
 0x110   :  { %v539_v6 = vadd.f32 %v6422_v13, %v7464_v1  ;;  %v530_v60 = vpop.f32.mrb[27].mxu0  ;;  %2647 = vperm.xlu0 %6714, %v5445_v25   ;;  %2652 = vperm.xlu1 %6715, %v5446_v32   ;;  %v5463_v1 = vld [vmem:[%s9348_s1 + $0x290] sm:$0xff] }
 0x111   :  { %v531_v0 = vadd.f32 %v530_v60, %v7438_v55  ;;  %5826 = vmatprep.subr.bf16.mxu0 %v600_v7  ;;  %6691 = vmatprep.subr.bf16.mxu1 %v600_v7  ;;  %v7773_v18 = vpop.permute.xlu0 %1385  ;;  %v593_v55 = vmax.bf16 %v577_v42, %v7627_v41  ;;  %v579_v7 = vmul.bf16 1009007652, %v7655_v48  ;;  %v594_v42 = vmax.bf16 %v578_v35, %v7664_v5  ;;  %v5450_v35 = vld [vmem:[%s9348_s1 + $0x228] sm:$0xff] }
 0x112   :  { %v571_v47 = vpack.c.bf16 %v539_v6, %v536_v49  ;;  %5827 = vmatpush3.bf16.msra.mxu0 %v592_v50  ;;  %6699 = vmatpush3.bf16.msra.mxu1 %v592_v50  ;;  %v7775_v54 = vpop.permute.xlu1 %1390 }
 0x113   :  { %v570_v51 = vpack.c.bf16 %v531_v0, %v528_v46  ;;  %5828 = vmatprep.subr.bf16.mxu0 %v601_v30  ;;  %6692 = vmatprep.subr.bf16.mxu1 %v601_v30  ;;  %v5466_v0 = vld [vmem:[%s9348_s1 + $0x2a8] sm:$0xff] }
 0x114   :  { %v587_v39 = vmul.bf16 1009007652, %v571_v47  ;;  %2737 = vperm.xlu0 %6714, %v5463_v1   ;;  %2742 = vperm.xlu1 %6715, %v5464_v31   ;;  %v580_v1 = vmul.bf16 1009007652, %v7692_v21 }
 0x115   :  { %v6425_v14 = vpop.f32.mrb[28].mxu0  ;;  %v586_v56 = vmul.bf16 1009007652, %v570_v51  ;;  %v7787_v13 = vpop.permute.xlu0 %1475 }
 0x116   :  { %v543_v22 = vpop.f32.mrb[29].mxu0  ;;  %5829 = vmatpush3.bf16.msra.mxu0 %v593_v55  ;;  %6700 = vmatpush3.bf16.msra.mxu1 %v593_v55  ;;  %v552_v41 = vadd.f32 %v6425_v14, %v7502_v16  ;;  %v7789_v49 = vpop.permute.xlu1 %1480  ;;  %v603_v60 = vmax.bf16 %v587_v39, %v571_v47  ;;  %v5449_v55 = vld [vmem:[%s9348_s1 + $0x220] sm:$0xff] }
 0x117   :  { %v6426_v25 = vpop.f32.mrb[30].mxu0  ;;  %v602_v6 = vmax.bf16 %v586_v56, %v570_v51  ;;  %v544_v30 = vadd.f32 %v543_v22, %v7482_v8  ;;  %v581_v56 = vmul.bf16 1009007652, %v7683_v4  ;;  %v596_v22 = vmax.bf16 %v580_v1, %v7692_v21  ;;  %v5454_v1 = vld [vmem:[%s9348_s1 + $0x248] sm:$0xff] }
 0x118   :  { %v555_v32 = vadd.f32 %v6426_v25, %v7504_v17  ;;  %v546_v50 = vpop.f32.mrb[31].mxu0  ;;  %2657 = vperm.xlu0 %6714, %v5447_v23   ;;  %2662 = vperm.xlu1 %6715, %v5448_v26   ;;  %v5465_v17 = vld [vmem:[%s9348_s1 + $0x2a0] sm:$0xff]  ;;  %v5467_v26 = vld [vmem:[%s9348_s1 + $0x2b0] sm:$0xff]  ;;  %v5468_v25 = vld [vmem:[%s9348_s1 + $0x2b8] sm:$0xff] }
 0x119   :  { %v547_v16 = vadd.f32 %v546_v50, %v7484_v9  ;;  %5830 = vmatprep.subr.bf16.mxu0 %v602_v6  ;;  %6693 = vmatprep.subr.bf16.mxu1 %v602_v6  ;;  %v7801_v47 = vpop.permute.xlu0 %1395  ;;  %v595_v9 = vmax.bf16 %v579_v7, %v7655_v48  ;;  %v6732_v6 = vld [vmem:[%s9349_s2 + $0x40] ss:$8 sps:$4 sm:$0xff]   ;;  %v5452_v50 = vld [vmem:[%s9348_s1 + $0x238] sm:$0xff] }
 0x11a   :  { %v573_v46 = vpack.c.bf16 %v555_v32, %v552_v41  ;;  %5831 = vmatpush3.bf16.msra.mxu0 %v594_v42  ;;  %6701 = vmatpush3.bf16.msra.mxu1 %v594_v42  ;;  %v7803_v8 = vpop.permute.xlu1 %1400  ;;  %v597_v32 = vmax.bf16 %v581_v56, %v7683_v4  ;;  %v6735_v7 = vld [vmem:[%s9349_s2] ss:$8 sps:$4 sm:$0xff]   ;;  %v5451_v42 = vld [vmem:[%s9348_s1 + $0x230] sm:$0xff] }
 0x11b   :  { %v572_v5 = vpack.c.bf16 %v547_v16, %v544_v30  ;;  %5832 = vmatprep.subr.bf16.mxu0 %v603_v60  ;;  %6694 = vmatprep.subr.bf16.mxu1 %v603_v60  ;;  %v6738_v4 = vld [vmem:[%s9349_s2 + $0x14] ss:$8 sps:$4 sm:$0xff]   ;;  %v5469_v16 = vld [vmem:[%s9348_s1 + $0x2c0] sm:$0xff] }
 0x11c   :  { %2747 = vperm.xlu0 %6714, %v5465_v17   ;;  %2752 = vperm.xlu1 %6715, %v5466_v0   ;;  %v589_v31 = vmul.bf16 1009007652, %v573_v46  ;;  %v6740_v60 = vld [vmem:[%s9349_s2 + $0x54] ss:$8 sps:$4 sm:$0xff]   ;;  %v5470_v17 = vld [vmem:[%s9348_s1 + $0x2c8] sm:$0xff] }
 0x11d   :  { %v588_v51 = vmul.bf16 1009007652, %v572_v5  ;;  %v7813_v39 = vpop.permute.xlu0 %1485 }
 0x11e   :  { %5833 = vmatpush3.bf16.msra.mxu0 %v595_v9  ;;  %6702 = vmatpush3.bf16.msra.mxu1 %v595_v9  ;;  %v7815_v14 = vpop.permute.xlu1 %1490  ;;  %v605_v23 = vmax.bf16 %v589_v31, %v573_v46  ;;  %v5453_v9 = vld [vmem:[%s9348_s1 + $0x240] sm:$0xff]  ;;  %v6742_v31 = vld [vmem:[%s9349_s2 + $0x10] ss:$8 sps:$4 sm:$0xff]  }
 0x11f   :  { %v604_v48 = vmax.bf16 %v588_v51, %v572_v5  ;;  %v6743_v51 = vld [vmem:[%s9349_s2 + $0x50] ss:$8 sps:$4 sm:$0xff]  }
 0x120   :  { %2667 = vperm.xlu0 %6714, %v5449_v55   ;;  %2672 = vperm.xlu1 %6715, %v5450_v35   ;;  %v6744_v55 = vld [vmem:[%s9349_s2 + $0x24] ss:$8 sps:$4 sm:$0xff]  }
 0x121   :  { %5834 = vmatprep.subr.bf16.mxu0 %v604_v48  ;;  %6695 = vmatprep.subr.bf16.mxu1 %v604_v48  ;;  %v7825_v41 = vpop.permute.xlu0 %1405  ;;  %v6746_v35 = vld [vmem:[%s9349_s2 + $0x64] ss:$8 sps:$4 sm:$0xff]  }
 0x122   :  { %5835 = vmatpush3.bf16.msra.mxu0 %v596_v22  ;;  %6703 = vmatpush3.bf16.msra.mxu1 %v596_v22  ;;  %v7827_v21 = vpop.permute.xlu1 %1410  ;;  %v5471_v22 = vld [vmem:[%s9348_s1 + $0x2d0] sm:$0xff] }
 0x123   :  { %5836 = vmatprep.subr.bf16.mxu0 %v605_v23  ;;  %6696 = vmatprep.subr.bf16.mxu1 %v605_v23  ;;  %v5472_v23 = vld [vmem:[%s9348_s1 + $0x2d8] sm:$0xff] }
 0x124   :  { %2757 = vperm.xlu0 %6714, %v5467_v26   ;;  %2762 = vperm.xlu1 %6715, %v5468_v25  }
 0x125   :  { %v7848_v30 = vpop.permute.xlu0 %1495 }
 0x126   :  { %5837 = vmatpush3.bf16.msra.mxu0 %v597_v32  ;;  %6704 = vmatpush3.bf16.msra.mxu1 %v597_v32  ;;  %9371 = vst [vmem:[#allocation19_spill] sm:$0xff] %v7848_v30  ;;  %v7850_v46 = vpop.permute.xlu1 %1500  ;;  %v5455_v32 = vld [vmem:[%s9348_s1 + $0x250] sm:$0xff] }
 0x127   :  { %9372 = vst [vmem:[#allocation20_spill] sm:$0xff] %v7850_v46 }
 0x128   :  { %2677 = vperm.xlu0 %6714, %v5451_v42   ;;  %2682 = vperm.xlu1 %6715, %v5452_v50   ;;  %v6749_v42 = vld [vmem:[%s9349_s2 + $0x60] ss:$8 sps:$4 sm:$0xff]   ;;  %v6750_v50 = vld [vmem:[%s9349_s2 + $0x34] ss:$8 sps:$4 sm:$0xff]  }
 0x129   :  { %1023 = vmatmul.mubr.bf16.vlgmr.msra.gmra.mrb[32].mxu0 %v6735_v7  ;;  %1055 = vmatmul.mubr.bf16.vlgmr.msra.gmra.mrb[0].mxu1 %v6732_v6  ;;  %v7858_v0 = vpop.permute.xlu0 %1415  ;;  %v5456_v6 = vld [vmem:[%s9348_s1 + $0x258] sm:$0xff]  ;;  %v6748_v7 = vld [vmem:[%s9349_s2 + $0x20] ss:$8 sps:$4 sm:$0xff]  }
 0x12a   :  { %1030 = vmatprep.mubr.bf16.mxu0 %v6738_v4  ;;  %1062 = vmatprep.mubr.bf16.mxu1 %v6740_v60  ;;  %v7860_v5 = vpop.permute.xlu1 %1420  ;;  %v6752_v4 = vld [vmem:[%s9349_s2 + $0x74] ss:$8 sps:$4 sm:$0xff]  }
 0x12c   :  { %2767 = vperm.xlu0 %6714, %v5469_v16   ;;  %2772 = vperm.xlu1 %6715, %v5470_v17   ;;  %v5473_v17 = vld [vmem:[%s9348_s1 + $0x2e0] sm:$0xff] }
 0x12d   :  { %v7880_v48 = vpop.permute.xlu0 %1505 }
 0x12e   :  { %9373 = vst [vmem:[#allocation21_spill] sm:$0xff] %v7880_v48  ;;  %v7882_v56 = vpop.permute.xlu1 %1510 }
 0x12f   :  { %9374 = vst [vmem:[#allocation22_spill] sm:$0xff] %v7882_v56 }
 0x130   :  { %2687 = vperm.xlu0 %6714, %v5453_v9   ;;  %2692 = vperm.xlu1 %6715, %v5454_v1   ;;  %v5474_v9 = vld [vmem:[%s9348_s1 + $0x2e8] sm:$0xff] }
 0x131   :  { %1031 = vmatmul.mubr.bf16.gmra.mrb[36].mxu0 %v6742_v31  ;;  %1063 = vmatmul.mubr.bf16.gmra.mrb[4].mxu1 %v6743_v51  ;;  %v7890_v26 = vpop.permute.xlu0 %1425  ;;  %v5457_v51 = vld [vmem:[%s9348_s1 + $0x260] sm:$0xff] }
 0x132   :  { %1038 = vmatprep.mubr.bf16.mxu0 %v6744_v55  ;;  %1070 = vmatprep.mubr.bf16.mxu1 %v6746_v35  ;;  %v7892_v25 = vpop.permute.xlu1 %1430  ;;  %v5458_v55 = vld [vmem:[%s9348_s1 + $0x268] sm:$0xff]  ;;  %v6754_v35 = vld [vmem:[%s9349_s2 + $0x30] ss:$8 sps:$4 sm:$0xff]  }
 0x134   :  { %2777 = vperm.xlu0 %6714, %v5471_v22   ;;  %2782 = vperm.xlu1 %6715, %v5472_v23   ;;  %v6755_v22 = vld [vmem:[%s9349_s2 + $0x70] ss:$8 sps:$4 sm:$0xff]   ;;  %v6756_v23 = vld [vmem:[%s9349_s2 + $0x84] ss:$8 sps:$4 sm:$0xff]  }
 0x135   :  { %v7912_v60 = vpop.permute.xlu0 %1515 }
 0x136   :  { %9375 = vst [vmem:[#allocation23_spill] sm:$0xff] %v7912_v60  ;;  %v7914_v16 = vpop.permute.xlu1 %1520 }
 0x137   :  { %9376 = vst [vmem:[#allocation24_spill] sm:$0xff] %v7914_v16 }
 0x138   :  { %2697 = vperm.xlu0 %6714, %v5455_v32   ;;  %2702 = vperm.xlu1 %6715, %v5456_v6  }
 0x139   :  { %1039 = vmatmul.mubr.bf16.gmra.mrb[40].mxu0 %v6748_v7  ;;  %1071 = vmatmul.mubr.bf16.gmra.mrb[8].mxu1 %v6749_v42  ;;  %v7922_v1 = vpop.permute.xlu0 %1435  ;;  %v5475_v7 = vld [vmem:[%s9348_s1 + $0x2f0] sm:$0xff]  ;;  %v5476_v42 = vld [vmem:[%s9348_s1 + $0x2f8] sm:$0xff] }
 0x13a   :  { %1046 = vmatprep.mubr.bf16.mxu0 %v6750_v50  ;;  %1078 = vmatprep.mubr.bf16.mxu1 %v6752_v4  ;;  %v7924_v31 = vpop.permute.xlu1 %1440 }
 0x13c   :  { %2787 = vperm.xlu0 %6714, %v5473_v17   ;;  %2792 = vperm.xlu1 %6715, %v5474_v9   ;;  %v5459_v17 = vld [vmem:[%s9348_s1 + $0x270] sm:$0xff]  ;;  %v5460_v9 = vld [vmem:[%s9348_s1 + $0x278] sm:$0xff] }
 0x13d   :  { %v7941_v32 = vpop.permute.xlu0 %1525 }
 0x13e   :  { %9377 = vst [vmem:[#allocation25_spill] sm:$0xff] %v7941_v32  ;;  %v7943_v6 = vpop.permute.xlu1 %1530 }
 0x13f   :  { %9378 = vst [vmem:[#allocation26_spill] sm:$0xff] %v7943_v6 }
 0x140   :  { %2707 = vperm.xlu0 %6714, %v5457_v51   ;;  %2712 = vperm.xlu1 %6715, %v5458_v55   ;;  %v6758_v51 = vld [vmem:[%s9349_s2 + $0x80] ss:$8 sps:$4 sm:$0xff]   ;;  %v6759_v55 = vld [vmem:[%s9349_s2 + $0x94] ss:$8 sps:$4 sm:$0xff]  }
 0x141   :  { %1047 = vmatmul.mubr.bf16.gmra.mrb[44].mxu0 %v6754_v35  ;;  %1079 = vmatmul.mubr.bf16.gmra.mrb[12].mxu1 %v6755_v22  ;;  %v7951_v50 = vpop.permute.xlu0 %1445 }
 0x142   :  { %1086 = vmatprep.mubr.bf16.mxu1 %v6756_v23  ;;  %v7953_v4 = vpop.permute.xlu1 %1450  ;;  %v5541_v23 = vld [vmem:[%s9350_s3 + $0x200] sm:$0xff] }
 0x144   :  { %2797 = vperm.xlu0 %6714, %v5475_v7   ;;  %2802 = vperm.xlu1 %6715, %v5476_v42   ;;  %v5542_v7 = vld [vmem:[%s9350_s3 + $0x208] sm:$0xff] }
 0x145   :  { %v7967_v35 = vpop.permute.xlu0 %1941 }
 0x146   :  { %9379 = vst [vmem:[#allocation27_spill] sm:$0xff] %v7967_v35  ;;  %v7969_v22 = vpop.permute.xlu1 %1946 }
 0x147   :  { %9380 = vst [vmem:[#allocation28_spill] sm:$0xff] %v7969_v22 }
 0x148   :  { %2717 = vperm.xlu0 %6714, %v5459_v17   ;;  %2722 = vperm.xlu1 %6715, %v5460_v9   ;;  %v5543_v17 = vld [vmem:[%s9350_s3 + $0x210] sm:$0xff]  ;;  %v5544_v9 = vld [vmem:[%s9350_s3 + $0x218] sm:$0xff] }
 0x149   :  { %1087 = vmatmul.mubr.bf16.gmra.mrb[16].mxu1 %v6758_v51  ;;  %v7977_v42 = vpop.permute.xlu0 %1951  ;;  %v6761_v51 = vld [vmem:[%s9349_s2 + $0x90] ss:$8 sps:$4 sm:$0xff]  }
 0x14a   :  { %1094 = vmatprep.mubr.bf16.mxu1 %v6759_v55  ;;  %9381 = vst [vmem:[#allocation29_spill] sm:$0xff] %v7977_v42  ;;  %v7979_v16 = vpop.permute.xlu1 %1956  ;;  %v6762_v55 = vld [vmem:[%s9349_s2 + $0xa4] ss:$8 sps:$4 sm:$0xff]  }
 0x14b   :  { %9382 = vst [vmem:[#allocation30_spill] sm:$0xff] %v7979_v16  ;;  %v5546_v16 = vld [vmem:[%s9350_s3 + $0x228] sm:$0xff] }
 0x14c   :  { %3213 = vperm.xlu0 %6714, %v5541_v23   ;;  %3218 = vperm.xlu1 %6715, %v5542_v7   ;;  %v5545_v7 = vld [vmem:[%s9350_s3 + $0x220] sm:$0xff] }
 0x14d   :  { %v7993_v23 = vpop.permute.xlu0 %1961 }
 0x14e   :  { %9383 = vst [vmem:[#allocation31_spill] sm:$0xff] %v7993_v23  ;;  %v8001_v42 = vpop.permute.xlu1 %1966 }
 0x14f   :  { %9384 = vst [vmem:[#allocation32_spill] sm:$0xff] %v8001_v42  ;;  %v5550_v42 = vld [vmem:[%s9350_s3 + $0x248] sm:$0xff] }
 0x150   :  { %3223 = vperm.xlu0 %6714, %v5543_v17   ;;  %3228 = vperm.xlu1 %6715, %v5544_v9   ;;  %v5547_v17 = vld [vmem:[%s9350_s3 + $0x230] sm:$0xff]  ;;  %v5548_v9 = vld [vmem:[%s9350_s3 + $0x238] sm:$0xff] }
 0x151   :  { %1095 = vmatmul.mubr.bf16.gmra.mrb[20].mxu1 %v6761_v51  ;;  %v8003_v22 = vpop.permute.xlu0 %1971  ;;  %v6764_v51 = vld [vmem:[%s9349_s2 + $0xa0] ss:$8 sps:$4 sm:$0xff]  }
 0x152   :  { %1102 = vmatprep.mubr.bf16.mxu1 %v6762_v55  ;;  %9385 = vst [vmem:[#allocation33_spill] sm:$0xff] %v8003_v22  ;;  %v6765_v55 = vld [vmem:[%s9349_s2 + $0xb4] ss:$8 sps:$4 sm:$0xff]   ;;  %v5549_v22 = vld [vmem:[%s9350_s3 + $0x240] sm:$0xff] }
 0x154   :  { %3233 = vperm.xlu0 %6714, %v5545_v7   ;;  %3238 = vperm.xlu1 %6715, %v5546_v16   ;;  %v8017_v7 = vpop.permute.xlu1 %1976 }
 0x155   :  { %9386 = vst [vmem:[#allocation34_spill] sm:$0xff] %v8017_v7  ;;  %v8019_v16 = vpop.permute.xlu0 %1981 }
 0x156   :  { %9387 = vst [vmem:[#allocation35_spill] sm:$0xff] %v8019_v16  ;;  %v6768_v16 = vld [vmem:[%s9349_s2 + $0xc4] ss:$8 sps:$4 sm:$0xff]  }
 0x158   :  { %3243 = vperm.xlu0 %6714, %v5547_v17   ;;  %3248 = vperm.xlu1 %6715, %v5548_v9   ;;  %v5551_v17 = vld [vmem:[%s9350_s3 + $0x250] sm:$0xff]  ;;  %v5552_v9 = vld [vmem:[%s9350_s3 + $0x258] sm:$0xff]  ;;  %v8039_v7 = vpop.permute.xlu1 %1986 }
 0x159   :  { %1103 = vmatmul.mubr.bf16.gmra.mrb[24].mxu1 %v6764_v51  ;;  %v6767_v51 = vld [vmem:[%s9349_s2 + $0xb0] ss:$8 sps:$4 sm:$0xff]   ;;  %9388 = vst [vmem:[#allocation36_spill] sm:$0xff] %v8039_v7 }
 0x15a   :  { %1110 = vmatprep.mubr.bf16.mxu1 %v6765_v55  ;;  %v5554_v55 = vld [vmem:[%s9350_s3 + $0x268] sm:$0xff] }
 0x15c   :  { %3253 = vperm.xlu0 %6714, %v5549_v22   ;;  %3258 = vperm.xlu1 %6715, %v5550_v42   ;;  %v8041_v22 = vpop.permute.xlu0 %1991  ;;  %v5553_v42 = vld [vmem:[%s9350_s3 + $0x260] sm:$0xff]  ;;  %v8049_v23 = vpop.permute.xlu1 %1996 }
 0x15d   :  { %9389 = vst [vmem:[#allocation37_spill] sm:$0xff] %v8041_v22  ;;  %9390 = vst [vmem:[#allocation38_spill] sm:$0xff] %v8049_v23 }
 0x160   :  { %3263 = vperm.xlu0 %6714, %v5551_v17   ;;  %3268 = vperm.xlu1 %6715, %v5552_v9   ;;  %v8051_v35 = vpop.permute.xlu0 %2001  ;;  %v5555_v17 = vld [vmem:[%s9350_s3 + $0x270] sm:$0xff]  ;;  %v5556_v9 = vld [vmem:[%s9350_s3 + $0x278] sm:$0xff] }
 0x161   :  { %1111 = vmatmul.mubr.bf16.gmra.mrb[28].mxu1 %v6767_v51  ;;  %9391 = vst [vmem:[#allocation39_spill] sm:$0xff] %v8051_v35  ;;  %v6770_v51 = vld [vmem:[%s9349_s2 + $0xc0] ss:$8 sps:$4 sm:$0xff]   ;;  %v8071_v35 = vpop.permute.xlu1 %2006 }
 0x162   :  { %1118 = vmatprep.mubr.bf16.mxu1 %v6768_v16  ;;  %v6771_v16 = vld [vmem:[%s9349_s2 + $0xd4] ss:$8 sps:$4 sm:$0xff]   ;;  %9392 = vst [vmem:[#allocation40_spill] sm:$0xff] %v8071_v35  ;;  %v5562_v35 = vld [vmem:[%s9350_s3 + $0x2a8] sm:$0xff] }
 0x164   :  { %3273 = vperm.xlu0 %6714, %v5553_v42   ;;  %3278 = vperm.xlu1 %6715, %v5554_v55   ;;  %v5557_v42 = vld [vmem:[%s9350_s3 + $0x280] sm:$0xff]  ;;  %v5558_v55 = vld [vmem:[%s9350_s3 + $0x288] sm:$0xff]  ;;  %v8073_v23 = vpop.permute.xlu0 %2011 }
 0x165   :  { %9393 = vst [vmem:[#allocation41_spill] sm:$0xff] %v8073_v23  ;;  %v5561_v23 = vld [vmem:[%s9350_s3 + $0x2a0] sm:$0xff] }
 0x168   :  { %3283 = vperm.xlu0 %6714, %v5555_v17   ;;  %3288 = vperm.xlu1 %6715, %v5556_v9   ;;  %v5559_v17 = vld [vmem:[%s9350_s3 + $0x290] sm:$0xff]  ;;  %v5560_v9 = vld [vmem:[%s9350_s3 + $0x298] sm:$0xff] }
 0x169   :  { %1119 = vmatmul.mubr.bf16.gmra.mrb[32].mxu1 %v6770_v51  ;;  %v6773_v51 = vld [vmem:[%s9349_s2 + $0xd0] ss:$8 sps:$4 sm:$0xff]  }
 0x16a   :  { %1126 = vmatprep.mubr.bf16.mxu1 %v6771_v16  ;;  %v6774_v16 = vld [vmem:[%s9349_s2 + $0xe4] ss:$8 sps:$4 sm:$0xff]  }
 0x16c   :  { %3293 = vperm.xlu0 %6714, %v5557_v42   ;;  %3298 = vperm.xlu1 %6715, %v5558_v55   ;;  %v8087_v42 = vpop.permute.xlu1 %2016  ;;  %v8089_v55 = vpop.permute.xlu0 %2021 }
 0x16d   :  { %9394 = vst [vmem:[#allocation42_spill] sm:$0xff] %v8087_v42  ;;  %9395 = vst [vmem:[#allocation43_spill] sm:$0xff] %v8089_v55  ;;  %v6777_v55 = vld [vmem:[%s9349_s2 + $0xf4] ss:$8 sps:$4 sm:$0xff]  }
 0x170   :  { %3303 = vperm.xlu0 %6714, %v5559_v17   ;;  %3308 = vperm.xlu1 %6715, %v5560_v9   ;;  %v5563_v17 = vld [vmem:[%s9350_s3 + $0x2b0] sm:$0xff]  ;;  %v5564_v9 = vld [vmem:[%s9350_s3 + $0x2b8] sm:$0xff]  ;;  %v8109_v42 = vpop.permute.xlu1 %2026 }
 0x171   :  { %1127 = vmatmul.mubr.bf16.gmra.mrb[36].mxu1 %v6773_v51  ;;  %v6776_v51 = vld [vmem:[%s9349_s2 + $0xe0] ss:$8 sps:$4 sm:$0xff]   ;;  %9396 = vst [vmem:[#allocation44_spill] sm:$0xff] %v8109_v42 }
 0x172   :  { %1134 = vmatprep.mubr.bf16.mxu1 %v6774_v16  ;;  %v5566_v16 = vld [vmem:[%s9350_s3 + $0x2c8] sm:$0xff] }
 0x174   :  { %3313 = vperm.xlu0 %6714, %v5561_v23   ;;  %3318 = vperm.xlu1 %6715, %v5562_v35   ;;  %v8111_v23 = vpop.permute.xlu0 %2031  ;;  %v5565_v35 = vld [vmem:[%s9350_s3 + $0x2c0] sm:$0xff]  ;;  %v8119_v22 = vpop.permute.xlu1 %2036 }
 0x175   :  { %9397 = vst [vmem:[#allocation45_spill] sm:$0xff] %v8111_v23  ;;  %9398 = vst [vmem:[#allocation46_spill] sm:$0xff] %v8119_v22 }
 0x178   :  { %3323 = vperm.xlu0 %6714, %v5563_v17   ;;  %3328 = vperm.xlu1 %6715, %v5564_v9   ;;  %v8121_v7 = vpop.permute.xlu0 %2041  ;;  %v5567_v17 = vld [vmem:[%s9350_s3 + $0x2d0] sm:$0xff]  ;;  %v5568_v9 = vld [vmem:[%s9350_s3 + $0x2d8] sm:$0xff] }
 0x179   :  { %1135 = vmatmul.mubr.bf16.gmra.mrb[40].mxu1 %v6776_v51  ;;  %9399 = vst [vmem:[#allocation47_spill] sm:$0xff] %v8121_v7  ;;  %v6779_v51 = vld [vmem:[%s9349_s2 + $0xf0] ss:$8 sps:$4 sm:$0xff]  }
 0x17a   :  { %1142 = vmatprep.mubr.bf16.mxu1 %v6777_v55  ;;  %v5569_v55 = vld [vmem:[%s9350_s3 + $0x2e0] sm:$0xff] }
 0x17c   :  { %3333 = vperm.xlu0 %6714, %v5565_v35   ;;  %3338 = vperm.xlu1 %6715, %v5566_v16   ;;  %v5570_v35 = vld [vmem:[%s9350_s3 + $0x2e8] sm:$0xff]  ;;  %v8138_v16 = vpop.permute.xlu1 %2046  ;;  %v8140_v7 = vpop.permute.xlu0 %2051 }
 0x17d   :  { %9400 = vst [vmem:[#allocation48_spill] sm:$0xff] %v8138_v16  ;;  %9401 = vst [vmem:[#allocation49_spill] sm:$0xff] %v8140_v7  ;;  %v5606_v7 = vld [vmem:[%s9352_s5 + $0x8] sm:$0xf] }
 0x180   :  { %3343 = vperm.xlu0 %6714, %v5567_v17   ;;  %3348 = vperm.xlu1 %6715, %v5568_v9   ;;  %v5571_v17 = vld [vmem:[%s9350_s3 + $0x2f0] sm:$0xff]  ;;  %v5572_v9 = vld [vmem:[%s9350_s3 + $0x2f8] sm:$0xff]  ;;  %v8150_v22 = vpop.permute.xlu0 %2061 }
 0x181   :  { %1143 = vmatmul.mubr.bf16.gmra.mrb[44].mxu1 %v6779_v51  ;;  %v8148_v51 = vpop.permute.xlu1 %2056  ;;  %9403 = vst [vmem:[#allocation51_spill] sm:$0xff] %v8150_v22 }
 0x182   :  { %9402 = vst [vmem:[#allocation50_spill] sm:$0xff] %v8148_v51 }
 0x184   :  { %3353 = vperm.xlu0 %6714, %v5569_v55   ;;  %3358 = vperm.xlu1 %6715, %v5570_v35   ;;  %v5608_v55 = vld [vmem:[%s9354_s7 + $0x8] sm:$0xf]  ;;  %v9358_v35 = vmov 0.0   ;;  %v8167_v51 = vpop.permute.xlu0 %2071 }
 0x185   :  { %6427 = vmatprep.subr.bf16.mxu0 %v9358_v35  ;;  %v8165_v22 = vpop.permute.xlu1 %2066  ;;  %9405 = vst [vmem:[#allocation53_spill] sm:$0xff] %v8167_v51  ;;  %v5641_v35 = vld [vmem:[%s9348_s1 + $0x300] sm:$0xff]  ;;  %v5659_v51 = vld [vmem:[%s9348_s1 + $0x390] sm:$0xff] }
 0x186   :  { %9404 = vst [vmem:[#allocation52_spill] sm:$0xff] %v8165_v22 }
 0x188   :  { %3363 = vperm.xlu0 %6714, %v5571_v17   ;;  %3368 = vperm.xlu1 %6715, %v5572_v9   ;;  %v5657_v17 = vld [vmem:[%s9348_s1 + $0x380] sm:$0xff]  ;;  %v5658_v9 = vld [vmem:[%s9348_s1 + $0x388] sm:$0xff]  ;;  %v8177_v16 = vpop.permute.xlu0 %2081 }
 0x189   :  { %9407 = vst [vmem:[#allocation55_spill] sm:$0xff] %v8177_v16 }
 0x18c   :  { %3746 = vperm.xlu0 %6714, %v5606_v7   ;;  %3795 = vperm.xlu1 %6715, %v5608_v55   ;;  %v5642_v7 = vld [vmem:[%s9348_s1 + $0x308] sm:$0xff]  ;;  %v8175_v55 = vpop.permute.xlu1 %2076  ;;  %v8193_v16 = vpop.permute.xlu0 %2091 }
 0x18d   :  { %9406 = vst [vmem:[#allocation54_spill] sm:$0xff] %v8175_v55  ;;  %9409 = vst [vmem:[#allocation57_spill] sm:$0xff] %v8193_v16  ;;  %v5661_v55 = vld [vmem:[%s9348_s1 + $0x3a0] sm:$0xff] }
 0x18e   :  { %v5645_v16 = vld [vmem:[%s9348_s1 + $0x320] sm:$0xff] }
 0x190   :  { %3999 = vperm.xlu0 %6714, %v5657_v17   ;;  %4004 = vperm.xlu1 %6715, %v5658_v9   ;;  %v5660_v17 = vld [vmem:[%s9348_s1 + $0x398] sm:$0xff]  ;;  %v5643_v9 = vld [vmem:[%s9348_s1 + $0x310] sm:$0xff]  ;;  %v8203_v22 = vpop.permute.xlu0 %2474 }
 0x191   :  { %9411 = vst [vmem:[#allocation59_spill] sm:$0xff] %v8203_v22 }
 0x194   :  { %3919 = vperm.xlu0 %6714, %v5641_v35   ;;  %3924 = vperm.xlu1 %6715, %v5642_v7   ;;  %v5644_v35 = vld [vmem:[%s9348_s1 + $0x318] sm:$0xff]  ;;  %v8191_v7 = vpop.permute.xlu1 %2086  ;;  %v8219_v22 = vpop.permute.xlu0 %2727 }
 0x195   :  { %9408 = vst [vmem:[#allocation56_spill] sm:$0xff] %v8191_v7  ;;  %9413 = vst [vmem:[#allocation61_spill] sm:$0xff] %v8219_v22  ;;  %v5665_v22 = vld [vmem:[%s9348_s1 + $0x3c0] sm:$0xff] }
 0x198   :  { %4009 = vperm.xlu0 %6714, %v5659_v51   ;;  %4014 = vperm.xlu1 %6715, %v5660_v17   ;;  %v5662_v51 = vld [vmem:[%s9348_s1 + $0x3a8] sm:$0xff]  ;;  %v8201_v17 = vpop.permute.xlu1 %2096  ;;  %v8229_v7 = vpop.permute.xlu0 %2647 }
 0x199   :  { %9410 = vst [vmem:[#allocation58_spill] sm:$0xff] %v8201_v17  ;;  %v5647_v17 = vld [vmem:[%s9348_s1 + $0x330] sm:$0xff]  ;;  %9415 = vst [vmem:[#allocation63_spill] sm:$0xff] %v8229_v7 }
 0x19a   :  { %v5667_v7 = vld [vmem:[%s9348_s1 + $0x3d0] sm:$0xff] }
 0x19c   :  { %3929 = vperm.xlu0 %6714, %v5643_v9   ;;  %3934 = vperm.xlu1 %6715, %v5644_v35   ;;  %v5646_v9 = vld [vmem:[%s9348_s1 + $0x328] sm:$0xff]  ;;  %v5663_v35 = vld [vmem:[%s9348_s1 + $0x3b0] sm:$0xff] }
 0x1a0   :  { %4019 = vperm.xlu0 %6714, %v5661_v55   ;;  %4024 = vperm.xlu1 %6715, %v5662_v51   ;;  %v5664_v55 = vld [vmem:[%s9348_s1 + $0x3b8] sm:$0xff]  ;;  %v8217_v51 = vpop.permute.xlu1 %2523 }
 0x1a1   :  { %9412 = vst [vmem:[#allocation60_spill] sm:$0xff] %v8217_v51 }
 0x1a4   :  { %3939 = vperm.xlu0 %6714, %v5645_v16   ;;  %3944 = vperm.xlu1 %6715, %v5646_v9   ;;  %v5648_v16 = vld [vmem:[%s9348_s1 + $0x338] sm:$0xff]  ;;  %v8227_v9 = vpop.permute.xlu1 %2732 }
 0x1a5   :  { %9414 = vst [vmem:[#allocation62_spill] sm:$0xff] %v8227_v9  ;;  %v8245_v9 = vpop.permute.xlu0 %2737 }
 0x1a6   :  { %9417 = vst [vmem:[#allocation65_spill] sm:$0xff] %v8245_v9  ;;  %v5669_v9 = vld [vmem:[%s9348_s1 + $0x3e0] sm:$0xff] }
 0x1a8   :  { %4029 = vperm.xlu0 %6714, %v5663_v35   ;;  %4034 = vperm.xlu1 %6715, %v5664_v55   ;;  %v5666_v35 = vld [vmem:[%s9348_s1 + $0x3c8] sm:$0xff]  ;;  %v5649_v55 = vld [vmem:[%s9348_s1 + $0x340] sm:$0xff] }
 0x1ac   :  { %3949 = vperm.xlu0 %6714, %v5647_v17   ;;  %3954 = vperm.xlu1 %6715, %v5648_v16   ;;  %v5650_v17 = vld [vmem:[%s9348_s1 + $0x348] sm:$0xff]  ;;  %v8243_v16 = vpop.permute.xlu1 %2652 }
 0x1ad   :  { %9416 = vst [vmem:[#allocation64_spill] sm:$0xff] %v8243_v16  ;;  %v8257_v16 = vpop.permute.xlu0 %2657 }
 0x1ae   :  { %9420 = vst [vmem:[#allocation67_spill] sm:$0xff] %v8257_v16  ;;  %v5653_v16 = vld [vmem:[%s9348_s1 + $0x360] sm:$0xff] }
 0x1b0   :  { %4039 = vperm.xlu0 %6714, %v5665_v22   ;;  %4044 = vperm.xlu1 %6715, %v5666_v35   ;;  %v5668_v22 = vld [vmem:[%s9348_s1 + $0x3d8] sm:$0xff]  ;;  %v9418_v35 = vmov 0.0   ;;  %v8255_v51 = vpop.permute.xlu1 %2742 }
 0x1b1   :  { %6443 = vmatprep.mubr.msk.bf16.mxu0 %vm7031_vm2, %v9418_v35  ;;  %9419 = vst [vmem:[#allocation66_spill] sm:$0xff] %v8255_v51  ;;  %v8273_v51 = vpop.permute.xlu0 %2747 }
 0x1b2   :  { %9422 = vst [vmem:[#allocation69_spill] sm:$0xff] %v8273_v51  ;;  %v5671_v51 = vld [vmem:[%s9348_s1 + $0x3f0] sm:$0xff] }
 0x1b4   :  { %3959 = vperm.xlu0 %6714, %v5649_v55   ;;  %3964 = vperm.xlu1 %6715, %v5650_v17   ;;  %v5651_v55 = vld [vmem:[%s9348_s1 + $0x350] sm:$0xff]  ;;  %v5652_v17 = vld [vmem:[%s9348_s1 + $0x358] sm:$0xff] }
 0x1b5   :  { %v8283_v23 = vpop.permute.xlu0 %2667 }
 0x1b6   :  { %9424 = vst [vmem:[#allocation71_spill] sm:$0xff] %v8283_v23  ;;  %v5737_v23 = vld [vmem:[%s9350_s3 + $0x300] sm:$0xff] }
 0x1b8   :  { %4049 = vperm.xlu0 %6714, %v5667_v7   ;;  %4054 = vperm.xlu1 %6715, %v5668_v22   ;;  %v5670_v7 = vld [vmem:[%s9348_s1 + $0x3e8] sm:$0xff]  ;;  %v8271_v22 = vpop.permute.xlu1 %2662 }
 0x1b9   :  { %9421 = vst [vmem:[#allocation68_spill] sm:$0xff] %v8271_v22 }
 0x1bc   :  { %3969 = vperm.xlu0 %6714, %v5651_v55   ;;  %3974 = vperm.xlu1 %6715, %v5652_v17   ;;  %v5654_v55 = vld [vmem:[%s9348_s1 + $0x368] sm:$0xff]  ;;  %v8281_v17 = vpop.permute.xlu1 %2752 }
 0x1bd   :  { %9423 = vst [vmem:[#allocation70_spill] sm:$0xff] %v8281_v17  ;;  %v8299_v17 = vpop.permute.xlu0 %2757 }
 0x1be   :  { %9426 = vst [vmem:[#allocation73_spill] sm:$0xff] %v8299_v17  ;;  %v5739_v17 = vld [vmem:[%s9350_s3 + $0x310] sm:$0xff] }
 0x1c0   :  { %4059 = vperm.xlu0 %6714, %v5669_v9   ;;  %4064 = vperm.xlu1 %6715, %v5670_v7   ;;  %v5672_v9 = vld [vmem:[%s9348_s1 + $0x3f8] sm:$0xff]  ;;  %v5655_v7 = vld [vmem:[%s9348_s1 + $0x370] sm:$0xff] }
 0x1c1   :  { %v8309_v22 = vpop.permute.xlu0 %2677 }
 0x1c2   :  { %9428 = vst [vmem:[#allocation75_spill] sm:$0xff] %v8309_v22 }
 0x1c4   :  { %3979 = vperm.xlu0 %6714, %v5653_v16   ;;  %3984 = vperm.xlu1 %6715, %v5654_v55   ;;  %v5656_v16 = vld [vmem:[%s9348_s1 + $0x378] sm:$0xff]  ;;  %v8297_v55 = vpop.permute.xlu1 %2672 }
 0x1c5   :  { %9425 = vst [vmem:[#allocation72_spill] sm:$0xff] %v8297_v55  ;;  %v5743_v55 = vld [vmem:[%s9350_s3 + $0x330] sm:$0xff] }
 0x1c8   :  { %4069 = vperm.xlu0 %6714, %v5671_v51   ;;  %4074 = vperm.xlu1 %6715, %v5672_v9   ;;  %v5738_v51 = vld [vmem:[%s9350_s3 + $0x308] sm:$0xff]  ;;  %v8307_v9 = vpop.permute.xlu1 %2762 }
 0x1c9   :  { %9427 = vst [vmem:[#allocation74_spill] sm:$0xff] %v8307_v9  ;;  %v8325_v9 = vpop.permute.xlu0 %2767 }
 0x1ca   :  { %9430 = vst [vmem:[#allocation77_spill] sm:$0xff] %v8325_v9  ;;  %v5745_v9 = vld [vmem:[%s9350_s3 + $0x340] sm:$0xff] }
 0x1cc   :  { %3989 = vperm.xlu0 %6714, %v5655_v7   ;;  %3994 = vperm.xlu1 %6715, %v5656_v16   ;;  %v5740_v7 = vld [vmem:[%s9350_s3 + $0x318] sm:$0xff]  ;;  %v5741_v16 = vld [vmem:[%s9350_s3 + $0x320] sm:$0xff] }
 0x1cd   :  { %v8335_v22 = vpop.permute.xlu0 %2687 }
 0x1ce   :  { %9432 = vst [vmem:[#allocation79_spill] sm:$0xff] %v8335_v22  ;;  %v5749_v22 = vld [vmem:[%s9350_s3 + $0x360] sm:$0xff] }
 0x1d0   :  { %4485 = vperm.xlu0 %6714, %v5737_v23   ;;  %4490 = vperm.xlu1 %6715, %v5738_v51   ;;  %v5742_v23 = vld [vmem:[%s9350_s3 + $0x328] sm:$0xff]  ;;  %v8323_v51 = vpop.permute.xlu1 %2682 }
 0x1d1   :  { %9429 = vst [vmem:[#allocation76_spill] sm:$0xff] %v8323_v51 }
 0x1d4   :  { %4495 = vperm.xlu0 %6714, %v5739_v17   ;;  %4500 = vperm.xlu1 %6715, %v5740_v7   ;;  %v5744_v17 = vld [vmem:[%s9350_s3 + $0x338] sm:$0xff]  ;;  %v8333_v7 = vpop.permute.xlu1 %2772 }
 0x1d5   :  { %9431 = vst [vmem:[#allocation78_spill] sm:$0xff] %v8333_v7  ;;  %v8351_v7 = vpop.permute.xlu0 %2777 }
 0x1d6   :  { %9434 = vst [vmem:[#allocation81_spill] sm:$0xff] %v8351_v7  ;;  %v5751_v7 = vld [vmem:[%s9350_s3 + $0x370] sm:$0xff] }
 0x1d8   :  { %4505 = vperm.xlu0 %6714, %v5741_v16   ;;  %4510 = vperm.xlu1 %6715, %v5742_v23   ;;  %v5746_v16 = vld [vmem:[%s9350_s3 + $0x348] sm:$0xff]  ;;  %v5747_v23 = vld [vmem:[%s9350_s3 + $0x350] sm:$0xff] }
 0x1d9   :  { %v8361_v51 = vpop.permute.xlu0 %2697 }
 0x1da   :  { %9436 = vst [vmem:[#allocation83_spill] sm:$0xff] %v8361_v51 }
 0x1dc   :  { %4515 = vperm.xlu0 %6714, %v5743_v55   ;;  %4520 = vperm.xlu1 %6715, %v5744_v17   ;;  %v5748_v55 = vld [vmem:[%s9350_s3 + $0x358] sm:$0xff]  ;;  %v8349_v17 = vpop.permute.xlu1 %2692 }
 0x1dd   :  { %9433 = vst [vmem:[#allocation80_spill] sm:$0xff] %v8349_v17  ;;  %v5755_v17 = vld [vmem:[%s9350_s3 + $0x390] sm:$0xff] }
 0x1e0   :  { %4525 = vperm.xlu0 %6714, %v5745_v9   ;;  %4530 = vperm.xlu1 %6715, %v5746_v16   ;;  %v5750_v9 = vld [vmem:[%s9350_s3 + $0x368] sm:$0xff]  ;;  %v8359_v16 = vpop.permute.xlu1 %2782 }
 0x1e1   :  { %9435 = vst [vmem:[#allocation82_spill] sm:$0xff] %v8359_v16  ;;  %v8377_v16 = vpop.permute.xlu0 %2787 }
 0x1e2   :  { %9438 = vst [vmem:[#allocation85_spill] sm:$0xff] %v8377_v16  ;;  %v5757_v16 = vld [vmem:[%s9350_s3 + $0x3a0] sm:$0xff] }
 0x1e4   :  { %4535 = vperm.xlu0 %6714, %v5747_v23   ;;  %4540 = vperm.xlu1 %6715, %v5748_v55   ;;  %v5752_v23 = vld [vmem:[%s9350_s3 + $0x378] sm:$0xff]  ;;  %v5753_v55 = vld [vmem:[%s9350_s3 + $0x380] sm:$0xff] }
 0x1e5   :  { %v8387_v51 = vpop.permute.xlu0 %2707 }
 0x1e6   :  { %9440 = vst [vmem:[#allocation87_spill] sm:$0xff] %v8387_v51 }
 0x1e8   :  { %4545 = vperm.xlu0 %6714, %v5749_v22   ;;  %4550 = vperm.xlu1 %6715, %v5750_v9   ;;  %v5754_v22 = vld [vmem:[%s9350_s3 + $0x388] sm:$0xff]  ;;  %v8375_v9 = vpop.permute.xlu1 %2702 }
 0x1e9   :  { %9437 = vst [vmem:[#allocation84_spill] sm:$0xff] %v8375_v9 }
 0x1ec   :  { %4555 = vperm.xlu0 %6714, %v5751_v7   ;;  %4560 = vperm.xlu1 %6715, %v5752_v23   ;;  %v5756_v7 = vld [vmem:[%s9350_s3 + $0x398] sm:$0xff]  ;;  %v8385_v23 = vpop.permute.xlu1 %2792 }
 0x1ed   :  { %9439 = vst [vmem:[#allocation86_spill] sm:$0xff] %v8385_v23  ;;  %v8403_v23 = vpop.permute.xlu0 %2797 }
 0x1ee   :  { %9442 = vst [vmem:[#allocation89_spill] sm:$0xff] %v8403_v23 }
 0x1f0   :  { %4565 = vperm.xlu0 %6714, %v5753_v55   ;;  %4570 = vperm.xlu1 %6715, %v5754_v22   ;;  %v5758_v55 = vld [vmem:[%s9350_s3 + $0x3a8] sm:$0xff]  ;;  %v5759_v22 = vld [vmem:[%s9350_s3 + $0x3b0] sm:$0xff] }
 0x1f4   :  { %4575 = vperm.xlu0 %6714, %v5755_v17   ;;  %4580 = vperm.xlu1 %6715, %v5756_v7   ;;  %v5760_v17 = vld [vmem:[%s9350_s3 + $0x3b8] sm:$0xff]  ;;  %v8401_v7 = vpop.permute.xlu1 %2712 }
 0x1f5   :  { %9441 = vst [vmem:[#allocation88_spill] sm:$0xff] %v8401_v7  ;;  %v5762_v7 = vld [vmem:[%s9350_s3 + $0x3c8] sm:$0xff] }
 0x1f8   :  { %4585 = vperm.xlu0 %6714, %v5757_v16   ;;  %4590 = vperm.xlu1 %6715, %v5758_v55   ;;  %v5761_v16 = vld [vmem:[%s9350_s3 + $0x3c0] sm:$0xff] }
 0x1fc   :  { %v5838_v51 = vpop.f32.mrb[32].mxu0  ;;  %v5862_v9 = vpop.f32.mrb[0].mxu1  ;;  %4595 = vperm.xlu0 %6714, %v5759_v22   ;;  %4600 = vperm.xlu1 %6715, %v5760_v17   ;;  %v5763_v22 = vld [vmem:[%s9350_s3 + $0x3d0] sm:$0xff] }
 0x1fd   :  { %v5839_v42 = vpop.f32.mrb[33].mxu0  ;;  %v5863_v60 = vpop.f32.mrb[1].mxu1 }
 0x1fe   :  { %v5840_v55 = vadd.f32 %v5839_v42, %v5838_v51  ;;  %v5864_v6 = vadd.f32 %v5863_v60, %v5862_v9  ;;  %v5841_v32 = vpop.f32.mrb[34].mxu0  ;;  %v5865_v46 = vpop.f32.mrb[2].mxu1  ;;  %v5764_v9 = vld [vmem:[%s9350_s3 + $0x3d8] sm:$0xff] }
 0x1ff   :  { %v5842_v30 = vpop.f32.mrb[35].mxu0  ;;  %v5866_v23 = vpop.f32.mrb[3].mxu1 }
 0x200   :  { %v5843_v56 = vadd.f32 %v5842_v30, %v5841_v32  ;;  %v5867_v48 = vadd.f32 %v5866_v23, %v5865_v46  ;;  %4605 = vperm.xlu0 %6714, %v5761_v16   ;;  %4610 = vperm.xlu1 %6715, %v5762_v7   ;;  %v1025_v17 = vadd.f32 %v5840_v55, %v7522_v28  ;;  %v8421_v30 = vpop.permute.xlu1 %2802  ;;  %v8423_v46 = vpop.permute.xlu0 %2717 }
 0x201   :  { %v1057_v60 = vadd.f32 %v5864_v6, %v7562_v58  ;;  %9443 = vst [vmem:[#allocation90_spill] sm:$0xff] %v8421_v30  ;;  %9444 = vst [vmem:[#allocation91_spill] sm:$0xff] %v8423_v46  ;;  %v5767_v30 = vld [vmem:[%s9350_s3 + $0x3f0] sm:$0xff]  ;;  %v5768_v46 = vld [vmem:[%s9350_s3 + $0x3f8] sm:$0xff] }
 0x202   :  { %v1028_v42 = vadd.f32 %v5843_v56, %v7524_v29  ;;  %v1060_v51 = vadd.f32 %v5867_v48, %v7564_v59  ;;  %v5765_v29 = vld [vmem:[%s9350_s3 + $0x3e0] sm:$0xff]  ;;  %v5766_v56 = vld [vmem:[%s9350_s3 + $0x3e8] sm:$0xff] }
 0x204   :  { %v1151_v32 = vpack.c.bf16 %v1028_v42, %v1025_v17  ;;  %v8425_v23 = vpack.c.bf16 %v1060_v51, %v1057_v60  ;;  %4615 = vperm.xlu0 %6714, %v5763_v22   ;;  %v5844_v7 = vpop.f32.mrb[36].mxu0  ;;  %v5868_v28 = vpop.f32.mrb[4].mxu1  ;;  %4620 = vperm.xlu1 %6715, %v5764_v9  }
 0x205   :  { %v5845_v59 = vpop.f32.mrb[37].mxu0  ;;  %v5869_v48 = vpop.f32.mrb[5].mxu1 }
 0x206   :  { %v1167_v58 = vmul.bf16 1009007652, %v1151_v32  ;;  %v5846_v6 = vadd.f32 %v5845_v59, %v5844_v7  ;;  %v5870_v16 = vadd.f32 %v5869_v48, %v5868_v28  ;;  %v5847_v55 = vpop.f32.mrb[38].mxu0  ;;  %v5871_v17 = vpop.f32.mrb[6].mxu1 }
 0x207   :  { %v5848_v22 = vpop.f32.mrb[39].mxu0  ;;  %v5872_v42 = vpop.f32.mrb[7].mxu1 }
 0x208   :  { %v1183_v60 = vmax.bf16 %v1167_v58, %v1151_v32  ;;  %4625 = vperm.xlu0 %6714, %v5765_v29   ;;  %v5849_v51 = vadd.f32 %v5848_v22, %v5847_v55  ;;  %v5873_v9 = vadd.f32 %v5872_v42, %v5871_v17  ;;  %4630 = vperm.xlu1 %6715, %v5766_v56   ;;  %v8439_v7 = vpop.permute.xlu1 %2722  ;;  %v8446_v56 = vpop.permute.xlu0 %3213 }
 0x209   :  { %v1033_v28 = vadd.f32 %v5846_v6, %v7532_v36  ;;  %v1065_v32 = vadd.f32 %v5870_v16, %v7572_v2  ;;  %9445 = vst [vmem:[#allocation92_spill] sm:$0xff] %v8446_v56  ;;  %v5802_v36 = vld [vmem:[%s9352_s5 + $0xc] sm:$0xf] }
 0x20a   :  { %6428 = vmatpush3.bf16.msra.mxu0 %v1183_v60  ;;  %v1036_v29 = vadd.f32 %v5849_v51, %v7534_v37  ;;  %v1068_v58 = vadd.f32 %v5873_v9, %v7574_v3  ;;  %v5804_v37 = vld [vmem:[%s9354_s7 + $0xc] sm:$0xf]  ;;  %s7032_s7 = smov [#allocation4]  }
 0x20b   :  { %6429 = vmatprep.subr.bf16.mxu0 %v9418_v35  ;;  %s5141_s1 = sshll.u32 %s7032_s7, 4  ;;  %s5142_s1 = int_to_ptr.vmem [resolvable:$true] %s5141_s1 }
 0x20c   :  { %v5850_v59 = vpop.f32.mrb[40].mxu0  ;;  %v5874_v48 = vpop.f32.mrb[8].mxu1  ;;  %4635 = vperm.xlu0 %6714, %v5767_v30   ;;  %v1152_v55 = vpack.c.bf16 %v1036_v29, %v1033_v28  ;;  %v8448_v17 = vpack.c.bf16 %v1068_v58, %v1065_v32  ;;  %4640 = vperm.xlu1 %6715, %v5768_v46   ;;  %s6985_s15 = scalar_lea.vmem %s5142_s1, 32  ;;  %p6986_p1 = scmp.lt.s32.totalorder %s5142_s1, %s5142_s1 }
 0x20d   :  { %v5851_v2 = vpop.f32.mrb[41].mxu0  ;;  %v5875_v6 = vpop.f32.mrb[9].mxu1 }
 0x20e   :  { %v1168_v3 = vmul.bf16 1009007652, %v1152_v55  ;;  %v5852_v16 = vadd.f32 %v5851_v2, %v5850_v59  ;;  %v5876_v60 = vadd.f32 %v5875_v6, %v5874_v48  ;;  %v5853_v30 = vpop.f32.mrb[42].mxu0  ;;  %v5877_v22 = vpop.f32.mrb[10].mxu1 }
 0x20f   :  { %v5854_v42 = vpop.f32.mrb[43].mxu0  ;;  %v5878_v51 = vpop.f32.mrb[11].mxu1 }
 0x210   :  { %5018 = vperm.xlu0 %6714, %v5802_v36   ;;  %v8456_v9 = vpop.permute.xlu1 %3218  ;;  %v1184_v46 = vmax.bf16 %v1168_v3, %v1152_v55  ;;  %5067 = vperm.xlu1 %6715, %v5804_v37   ;;  %v5855_v28 = vadd.f32 %v5854_v42, %v5853_v30  ;;  %v5879_v32 = vadd.f32 %v5878_v51, %v5877_v22 }
 0x211   :  { %9446 = vst [vmem:[#allocation93_spill] sm:$0xff] %v8456_v9  ;;  %v1041_v29 = vadd.f32 %v5852_v16, %v7542_v44  ;;  %v1073_v58 = vadd.f32 %v5876_v60, %v7582_v10 }
 0x212   :  { %6430 = vmatpush3.bf16.msra.mxu0 %v1184_v46  ;;  %v1044_v56 = vadd.f32 %v5855_v28, %v7544_v45  ;;  %v1076_v59 = vadd.f32 %v5879_v32, %v7584_v11 }
 0x213   :  { %6431 = vmatprep.subr.bf16.mxu0 %v9418_v35 }
 0x214   :  { %v5856_v48 = vpop.f32.mrb[44].mxu0  ;;  %v5880_v2 = vpop.f32.mrb[12].mxu1  ;;  %v1153_v36 = vpack.c.bf16 %v1044_v56, %v1041_v29  ;;  %v1157_v6 = vpack.c.bf16 %v1076_v59, %v1073_v58 }
 0x215   :  { %v5857_v9 = vpop.f32.mrb[45].mxu0  ;;  %v5881_v55 = vpop.f32.mrb[13].mxu1 }
 0x216   :  { %v5858_v37 = vadd.f32 %v5857_v9, %v5856_v48  ;;  %v5882_v3 = vadd.f32 %v5881_v55, %v5880_v2  ;;  %v5859_v30 = vpop.f32.mrb[46].mxu0  ;;  %v5883_v22 = vpop.f32.mrb[14].mxu1  ;;  %v1169_v42 = vmul.bf16 1009007652, %v1153_v36 }
 0x217   :  { %v5860_v44 = vpop.f32.mrb[47].mxu0  ;;  %v5884_v16 = vpop.f32.mrb[15].mxu1 }
 0x218   :  { %v5861_v10 = vadd.f32 %v5860_v44, %v5859_v30  ;;  %v5885_v60 = vadd.f32 %v5884_v16, %v5883_v22  ;;  %v1185_v45 = vmax.bf16 %v1169_v42, %v1153_v36  ;;  %v1049_v11 = vadd.f32 %v5858_v37, %v7552_v52 }
 0x219   :  { %v1081_v51 = vadd.f32 %v5882_v3, %v7594_v33  ;;  %v1171_v36 = vmul.bf16 1009007652, %v8425_v23  ;;  %v1172_v3 = vmul.bf16 1009007652, %v8448_v17 }
 0x21a   :  { %v1052_v46 = vadd.f32 %v5861_v10, %v7554_v53  ;;  %v1084_v56 = vadd.f32 %v5885_v60, %v7596_v40  ;;  %6432 = vmatpush3.bf16.msra.mxu0 %v1185_v45  ;;  %v1173_v10 = vmul.bf16 1009007652, %v1157_v6 }
 0x21b   :  { %6433 = vmatprep.subr.bf16.mxu0 %v9418_v35  ;;  %v1187_v37 = vmax.bf16 %v1171_v36, %v8425_v23 }
 0x21c   :  { %v5886_v28 = vpop.f32.mrb[16].mxu1  ;;  %v1154_v9 = vpack.c.bf16 %v1052_v46, %v1049_v11  ;;  %v1158_v32 = vpack.c.bf16 %v1084_v56, %v1081_v51  ;;  %v1189_v11 = vmax.bf16 %v1173_v10, %v1157_v6  ;;  %v1199_v6 = vld [vmem:[%s9351_s4] sm:$0x3] }
 0x21d   :  { %v5887_v29 = vpop.f32.mrb[17].mxu1 }
 0x21e   :  { %v1170_v58 = vmul.bf16 1009007652, %v1154_v9  ;;  %v5888_v59 = vadd.f32 %v5887_v29, %v5886_v28  ;;  %v5889_v48 = vpop.f32.mrb[18].mxu1  ;;  %v1174_v51 = vmul.bf16 1009007652, %v1158_v32 }
 0x21f   :  { %v5890_v2 = vpop.f32.mrb[19].mxu1 }
 0x220   :  { %v1186_v52 = vmax.bf16 %v1170_v58, %v1154_v9  ;;  %v5891_v55 = vadd.f32 %v5890_v2, %v5889_v48  ;;  %v1089_v33 = vadd.f32 %v5888_v59, %v7610_v62  ;;  %v1188_v62 = vmax.bf16 %v1172_v3, %v8448_v17  ;;  %v9447_v3 = vld [vmem:[#allocation8_spill] sm:$0xff] }
 0x221   :  { %v1190_v17 = vmax.bf16 %v1174_v51, %v1158_v32  ;;  %v9449_v51 = vld [vmem:[#allocation10_spill] sm:$0xff] }
 0x222   :  { %v1092_v53 = vadd.f32 %v5891_v55, %v7612_v63  ;;  %6434 = vmatpush3.bf16.msra.mxu0 %v1186_v52 }
 0x223   :  { %6435 = vmatprep.subr.bf16.mxu0 %v9418_v35 }
 0x224   :  { %v5892_v40 = vpop.f32.mrb[20].mxu1  ;;  %v1159_v30 = vpack.c.bf16 %v1092_v53, %v1089_v33 }
 0x225   :  { %v5893_v22 = vpop.f32.mrb[21].mxu1 }
 0x226   :  { %v5894_v42 = vadd.f32 %v5893_v22, %v5892_v40  ;;  %v5895_v44 = vpop.f32.mrb[22].mxu1  ;;  %6436 = vmatpush3.bf16.msra.mxu0 %v1187_v37  ;;  %v1175_v58 = vmul.bf16 1009007652, %v1159_v30 }
 0x227   :  { %v5896_v16 = vpop.f32.mrb[23].mxu1  ;;  %6437 = vmatprep.subr.bf16.mxu0 %v9418_v35 }
 0x228   :  { %v5897_v63 = vadd.f32 %v5896_v16, %v5895_v44  ;;  %v1097_v60 = vadd.f32 %v5894_v42, %v7622_v19  ;;  %v1191_v2 = vmax.bf16 %v1175_v58, %v1159_v30 }
 0x22a   :  { %v1100_v45 = vadd.f32 %v5897_v63, %v7624_v24  ;;  %6438 = vmatpush3.bf16.msra.mxu0 %v1188_v62 }
 0x22b   :  { %6439 = vmatprep.subr.bf16.mxu0 %v9418_v35 }
 0x22c   :  { %v5898_v23 = vpop.f32.mrb[24].mxu1  ;;  %v1160_v46 = vpack.c.bf16 %v1100_v45, %v1097_v60 }
 0x22d   :  { %v5899_v56 = vpop.f32.mrb[25].mxu1 }
 0x22e   :  { %v5900_v28 = vadd.f32 %v5899_v56, %v5898_v23  ;;  %v5901_v9 = vpop.f32.mrb[26].mxu1  ;;  %6440 = vmatpush3.bf16.msra.mxu0 %v1189_v11  ;;  %v1176_v36 = vmul.bf16 1009007652, %v1160_v46  ;;  %v9448_v11 = vld [vmem:[#allocation9_spill] sm:$0xff] }
 0x22f   :  { %v5902_v29 = vpop.f32.mrb[27].mxu1  ;;  %6441 = vmatprep.subr.bf16.mxu0 %v9418_v35 }
 0x230   :  { %v5903_v59 = vadd.f32 %v5902_v29, %v5901_v9  ;;  %v1105_v19 = vadd.f32 %v5900_v28, %v7638_v57 }
 0x232   :  { %v1108_v24 = vadd.f32 %v5903_v59, %v7640_v34  ;;  %6442 = vmatpush3.bf16.msra.mxu0 %v1190_v17  ;;  %v1192_v34 = vmax.bf16 %v1176_v36, %v1160_v46 }
 0x233   :  { %6447 = vmatprep.subr.bf16.mxu0 %v9418_v35 }
 0x234   :  { %v5904_v48 = vpop.f32.mrb[28].mxu1  ;;  %v1161_v52 = vpack.c.bf16 %v1108_v24, %v1105_v19 }
 0x235   :  { %v5905_v55 = vpop.f32.mrb[29].mxu1  ;;  %6444 = vmatmul.mubr.bf16.vlgmr.msra.gmra.mrb[48].mxu0 %v1199_v6  ;;  %v9450_v6 = vld [vmem:[#allocation11_spill] sm:$0xff] }
 0x236   :  { %v5906_v32 = vadd.f32 %v5905_v55, %v5904_v48  ;;  %v5907_v33 = vpop.f32.mrb[30].mxu1  ;;  %6448 = vmatpush3.bf16.msra.mxu0 %v1191_v2  ;;  %6463 = vmatprep.mubr.msk.bf16.mxu0 %vm7031_vm2, %v9418_v35  ;;  %v1177_v53 = vmul.bf16 1009007652, %v1161_v52  ;;  %v9451_v2 = vld [vmem:[#allocation12_spill] sm:$0xff] }
 0x237   :  { %v5908_v57 = vpop.f32.mrb[31].mxu1  ;;  %6449 = vmatprep.subr.bf16.mxu0 %v9418_v35 }
 0x238   :  { %v5909_v40 = vadd.f32 %v5908_v57, %v5907_v33  ;;  %v1113_v37 = vadd.f32 %v5906_v32, %v7650_v15  ;;  %v1193_v42 = vmax.bf16 %v1177_v53, %v1161_v52 }
 0x23a   :  { %v1116_v30 = vadd.f32 %v5909_v40, %v9447_v3  ;;  %6450 = vmatpush3.bf16.msra.mxu0 %v1192_v34  ;;  %v9452_v3 = vld [vmem:[#allocation13_spill] sm:$0xff] }
 0x23b   :  { %6451 = vmatprep.subr.bf16.mxu0 %v9418_v35 }
 0x23c   :  { %v5910_v22 = vpop.f32.mrb[32].mxu1  ;;  %v1162_v44 = vpack.c.bf16 %v1116_v30, %v1113_v37 }
 0x23d   :  { %v5911_v16 = vpop.f32.mrb[33].mxu1 }
 0x23e   :  { %v1178_v62 = vmul.bf16 1009007652, %v1162_v44  ;;  %v5912_v10 = vadd.f32 %v5911_v16, %v5910_v22  ;;  %v5913_v63 = vpop.f32.mrb[34].mxu1  ;;  %6452 = vmatpush3.bf16.msra.mxu0 %v1193_v42  ;;  %v9453_v22 = vld [vmem:[#allocation14_spill] sm:$0xff] }
 0x23f   :  { %v5914_v60 = vpop.f32.mrb[35].mxu1  ;;  %6453 = vmatprep.subr.bf16.mxu0 %v9418_v35 }
 0x240   :  { %v1194_v45 = vmax.bf16 %v1178_v62, %v1162_v44  ;;  %v5915_v23 = vadd.f32 %v5914_v60, %v5913_v63  ;;  %v1121_v15 = vadd.f32 %v5912_v10, %v9448_v11 }
 0x242   :  { %v1124_v46 = vadd.f32 %v5915_v23, %v9449_v51  ;;  %6454 = vmatpush3.bf16.msra.mxu0 %v1194_v45 }
 0x243   :  { %6455 = vmatprep.subr.bf16.mxu0 %v9418_v35 }
 0x244   :  { %v5916_v56 = vpop.f32.mrb[36].mxu1  ;;  %v1163_v28 = vpack.c.bf16 %v1124_v46, %v1121_v15  ;;  %v9454_v15 = vld [vmem:[#allocation15_spill] sm:$0xff]  ;;  %v9455_v46 = vld [vmem:[#allocation16_spill] sm:$0xff] }
 0x245   :  { %v5917_v9 = vpop.f32.mrb[37].mxu1 }
 0x246   :  { %v1179_v29 = vmul.bf16 1009007652, %v1163_v28  ;;  %v5918_v17 = vadd.f32 %v5917_v9, %v5916_v56  ;;  %v5919_v58 = vpop.f32.mrb[38].mxu1 }
 0x247   :  { %v5920_v59 = vpop.f32.mrb[39].mxu1 }
 0x248   :  { %v1195_v19 = vmax.bf16 %v1179_v29, %v1163_v28  ;;  %v5921_v24 = vadd.f32 %v5920_v59, %v5919_v58  ;;  %v1129_v48 = vadd.f32 %v5918_v17, %v9450_v6  ;;  %v1246_v17 = vld [vmem:[%s9353_s6] sm:$0x3] }
 0x249   :  { %v6780_v58 = vld [vmem:[%s9347_s0 + $0x80] sm:$0xff]  }
 0x24a   :  { %v1132_v36 = vadd.f32 %v5921_v24, %v9451_v2  ;;  %6456 = vmatpush3.bf16.msra.mxu0 %v1195_v19 }
 0x24b   :  { %6457 = vmatprep.subr.bf16.mxu0 %v9418_v35 }
 0x24c   :  { %v5922_v52 = vpop.f32.mrb[40].mxu1  ;;  %v1164_v55 = vpack.c.bf16 %v1132_v36, %v1129_v48  ;;  %v9456_v48 = vld [vmem:[#allocation17_spill] sm:$0xff] }
 0x24d   :  { %v5923_v32 = vpop.f32.mrb[41].mxu1 }
 0x24e   :  { %v1180_v33 = vmul.bf16 1009007652, %v1164_v55  ;;  %v5924_v57 = vadd.f32 %v5923_v32, %v5922_v52  ;;  %v5925_v34 = vpop.f32.mrb[42].mxu1  ;;  %v9457_v32 = vld [vmem:[#allocation18_spill] sm:$0xff] }
 0x24f   :  { %v5926_v53 = vpop.f32.mrb[43].mxu1 }
 0x250   :  { %v1196_v40 = vmax.bf16 %v1180_v33, %v1164_v55  ;;  %v5927_v37 = vadd.f32 %v5926_v53, %v5925_v34  ;;  %v1137_v30 = vadd.f32 %v5924_v57, %v9452_v3  ;;  %v6980_v57 = vld [vmem:[%s9355_s8] sm:$0xf] }
 0x252   :  { %v1140_v42 = vadd.f32 %v5927_v37, %v9453_v22  ;;  %6458 = vmatpush3.bf16.msra.mxu0 %v1196_v40 }
 0x253   :  { %6459 = vmatprep.subr.bf16.mxu0 %v9418_v35 }
 0x254   :  { %v5928_v44 = vpop.f32.mrb[44].mxu1  ;;  %v1165_v16 = vpack.c.bf16 %v1140_v42, %v1137_v30  ;;  %v6781_v42 = vld [vmem:[%s9347_s0 + $0x88] sm:$0xff]  }
 0x255   :  { %v5929_v62 = vpop.f32.mrb[45].mxu1 }
 0x256   :  { %v1181_v10 = vmul.bf16 1009007652, %v1165_v16  ;;  %v5930_v63 = vadd.f32 %v5929_v62, %v5928_v44  ;;  %v5931_v60 = vpop.f32.mrb[46].mxu1  ;;  %v6782_v44 = vld [vmem:[%s9347_s0 + $0x90] sm:$0xff]   ;;  %v6784_v62 = vld [vmem:[%s9347_s0 + $0xa0] sm:$0xff]  }
 0x257   :  { %v5932_v45 = vpop.f32.mrb[47].mxu1 }
 0x258   :  { %v1197_v23 = vmax.bf16 %v1181_v10, %v1165_v16  ;;  %v5933_v11 = vadd.f32 %v5932_v45, %v5931_v60  ;;  %v1145_v51 = vadd.f32 %v5930_v63, %v9454_v15  ;;  %v6783_v16 = vld [vmem:[%s9347_s0 + $0x98] sm:$0xff]   ;;  %v6785_v10 = vld [vmem:[%s9347_s0 + $0xa8] sm:$0xff]   ;;  %v6786_v63 = vld [vmem:[%s9347_s0 + $0xb0] sm:$0xff]  }
 0x259   :  { %v6787_v60 = vld [vmem:[%s9347_s0 + $0xb8] sm:$0xff]   ;;  %v6788_v45 = vld [vmem:[%s9347_s0 + $0xc0] sm:$0xff]  }
 0x25a   :  { %v1148_v56 = vadd.f32 %v5933_v11, %v9455_v46  ;;  %6460 = vmatpush3.bf16.msra.mxu0 %v1197_v23  ;;  %v6789_v23 = vld [vmem:[%s9347_s0 + $0xc8] sm:$0xff]   ;;  %v6790_v11 = vld [vmem:[%s9347_s0 + $0xd0] sm:$0xff]   ;;  %v6791_v15 = vld [vmem:[%s9347_s0 + $0xd8] sm:$0xff]  }
 0x25b   :  { %6461 = vmatprep.subr.bf16.mxu0 %v9418_v35  ;;  %v6793_v46 = vld [vmem:[%s9347_s0 + $0xe8] sm:$0xff]  }
 0x25c   :  { %v1166_v28 = vpack.c.bf16 %v1148_v56, %v1145_v51  ;;  %v6792_v51 = vld [vmem:[%s9347_s0 + $0xe0] sm:$0xff]   ;;  %v6794_v56 = vld [vmem:[%s9347_s0 + $0xf0] sm:$0xff]  }
 0x25e   :  { %v1182_v9 = vmul.bf16 1009007652, %v1166_v28 }
 0x260   :  { %v1198_v29 = vmax.bf16 %v1182_v9, %v1166_v28  ;;  %v6795_v28 = vld [vmem:[%s9347_s0 + $0xf8] sm:$0xff]   ;;  %v6798_v9 = vld [vmem:[%s9349_s2 + $0x104] ss:$8 sps:$4 sm:$0xff]  }
 0x261   :  { %2291 = vmatprep.mubr.bf16.mxu1 %v6798_v9 }
 0x262   :  { %6462 = vmatpush3.bf16.msra.mxu0 %v1198_v29 }
 0x265   :  { %6464 = vmatmul.mubr.bf16.vlgmr.msra.gmra.mrb[52].mxu0 %v1246_v17 }
 0x266   :  { %6469 = vmatprep.mubr.msk.bf16.mxu0 %vm344_vm1, %v6780_v58 }
 0x308   :  { %v1240_v59 = vpop.f32.mrb[48].mxu0 }
 0x309   :  { %v6445_v19 = vpop.f32.mrb[49].mxu0  ;;  %v8513_v2 = vadd.f32 %v1240_v59, %v9456_v48 }
 0x30a   :  { %v1243_v24 = vpop.f32.mrb[50].mxu0 }
 0x30b   :  { %v6446_v6 = vpop.f32.mrb[51].mxu0  ;;  %v1293_v36 = vmul.f32 1.442695, %v8513_v2 }
 0x30d   :  { %6972 = vpow2.f32 %v1293_v36 }
 0x317   :  { %v6973_v52 = vpop.eup %6972 }
 0x318   :  { %v1295_v34 = vmul.f32 %v6980_v57, %v6973_v52 }
 0x338   :  { %v1287_v55 = vpop.f32.mrb[52].mxu0 }
 0x339   :  { %v1288_v33 = vadd.f32 %v1287_v55, %v9457_v32  ;;  %v6465_v53 = vpop.f32.mrb[53].mxu0 }
 0x33a   :  { %v1290_v40 = vpop.f32.mrb[54].mxu0 }
 0x33b   :  { %v8520_v37 = vadd.f32 %v1295_v34, %v1288_v33  ;;  %v6466_v3 = vpop.f32.mrb[55].mxu0 }
 0x33d   :  { %v1339_v30 = vpack.c.bf16 %v8520_v37, %v8520_v37 }
 0x33f   :  { %6706 = vmatprep.subr.msk.bf16.mxu0 %vm393_vm0, %v1339_v30  ;;  %v1662_v22 = vsel %vm393_vm0, %v1339_v30, 0 }
 0x340   :  { %6468 = vmatpush3.bf16.msra.mxu0 %v1662_v22 }
 0x341   :  { %6501 = vmatprep.subr.bf16.mxu0 %v9418_v35 }
 0x343   :  { %6470 = vmatmul.mubr.msk.bf16.vlgmr.msra.gmra.mrb[56].mxu0 %vm344_vm1, %v6781_v42 }
 0x344   :  { %6473 = vmatprep.mubr.msk.bf16.mxu0 %vm344_vm1, %v6782_v44 }
 0x34b   :  { %6474 = vmatmul.mubr.msk.bf16.gmra.mrb[60].mxu0 %vm344_vm1, %v6783_v16 }
 0x34c   :  { %6477 = vmatprep.mubr.msk.bf16.mxu0 %vm344_vm1, %v6784_v62 }
 0x353   :  { %6478 = vmatmul.mubr.msk.bf16.gmra.mrb[64].mxu0 %vm344_vm1, %v6785_v10 }
 0x354   :  { %6481 = vmatprep.mubr.msk.bf16.mxu0 %vm344_vm1, %v6786_v63 }
 0x35b   :  { %6482 = vmatmul.mubr.msk.bf16.gmra.mrb[68].mxu0 %vm344_vm1, %v6787_v60 }
 0x35c   :  { %6485 = vmatprep.mubr.msk.bf16.mxu0 %vm344_vm1, %v6788_v45 }
 0x363   :  { %6486 = vmatmul.mubr.msk.bf16.gmra.mrb[72].mxu0 %vm344_vm1, %v6789_v23 }
 0x364   :  { %6489 = vmatprep.mubr.msk.bf16.mxu0 %vm344_vm1, %v6790_v11 }
 0x36b   :  { %6490 = vmatmul.mubr.msk.bf16.gmra.mrb[76].mxu0 %vm344_vm1, %v6791_v15 }
 0x36c   :  { %6493 = vmatprep.mubr.msk.bf16.mxu0 %vm344_vm1, %v6792_v51 }
 0x373   :  { %6494 = vmatmul.mubr.msk.bf16.gmra.mrb[80].mxu0 %vm344_vm1, %v6793_v46 }
 0x374   :  { %6497 = vmatprep.mubr.msk.bf16.mxu0 %vm344_vm1, %v6794_v56 }
 0x37b   :  { %6498 = vmatmul.mubr.msk.bf16.gmra.mrb[84].mxu0 %vm344_vm1, %v6795_v28 }
 0x37c   :  { %6517 = vmatprep.mubr.msk.bf16.mxu0 %vm7031_vm2, %v9418_v35 }
 0x416   :  { %v6471_v29 = vpop.f32.mrb[56].mxu0 }
 0x417   :  { %v1698_v17 = vpop.f32.mrb[57].mxu0  ;;  %v1707_v59 = vadd.f32 %v6471_v29, %v7773_v18 }
 0x418   :  { %v6472_v58 = vpop.f32.mrb[58].mxu0  ;;  %v1699_v6 = vadd.f32 %v1698_v17, %v7745_v20 }
 0x419   :  { %v1710_v19 = vadd.f32 %v6472_v58, %v7775_v54  ;;  %v1701_v24 = vpop.f32.mrb[59].mxu0 }
 0x41a   :  { %v1702_v48 = vadd.f32 %v1701_v24, %v7747_v38 }
 0x41b   :  { %v1826_v36 = vpack.c.bf16 %v1710_v19, %v1707_v59 }
 0x41c   :  { %v1825_v52 = vpack.c.bf16 %v1702_v48, %v1699_v6 }
 0x41d   :  { %v1842_v24 = vmul.bf16 1009007652, %v1826_v36 }
 0x41e   :  { %v6475_v55 = vpop.f32.mrb[60].mxu0  ;;  %v1841_v9 = vmul.bf16 1009007652, %v1825_v52 }
 0x41f   :  { %v1714_v32 = vpop.f32.mrb[61].mxu0  ;;  %v1723_v57 = vadd.f32 %v6475_v55, %v7825_v41 }
 0x420   :  { %v6476_v33 = vpop.f32.mrb[62].mxu0  ;;  %v1715_v40 = vadd.f32 %v1714_v32, %v7801_v47  ;;  %v1857_v6 = vmax.bf16 %v1841_v9, %v1825_v52  ;;  %v9465_v9 = vld [vmem:[#allocation24_spill] sm:$0xff] }
 0x421   :  { %v1726_v34 = vadd.f32 %v6476_v33, %v7827_v21  ;;  %v1717_v53 = vpop.f32.mrb[63].mxu0 }
 0x422   :  { %v1718_v18 = vadd.f32 %v1717_v53, %v7803_v8 }
 0x423   :  { %v8600_v54 = vpack.c.bf16 %v1726_v34, %v1723_v57  ;;  %v1858_v57 = vmax.bf16 %v1842_v24, %v1826_v36 }
 0x424   :  { %v1827_v3 = vpack.c.bf16 %v1718_v18, %v1715_v40 }
 0x426   :  { %v6479_v20 = vpop.f32.mrb[64].mxu0  ;;  %v1843_v34 = vmul.bf16 1009007652, %v1827_v3 }
 0x427   :  { %v1730_v30 = vpop.f32.mrb[65].mxu0  ;;  %v1739_v22 = vadd.f32 %v6479_v20, %v7890_v26  ;;  %v1844_v20 = vmul.bf16 1009007652, %v8600_v54 }
 0x428   :  { %v6480_v38 = vpop.f32.mrb[66].mxu0  ;;  %v1731_v41 = vadd.f32 %v1730_v30, %v7858_v0  ;;  %v9458_v30 = vld [vmem:[#allocation21_spill] sm:$0xff] }
 0x429   :  { %v1742_v42 = vadd.f32 %v6480_v38, %v7892_v25  ;;  %v1733_v44 = vpop.f32.mrb[67].mxu0  ;;  %v9459_v38 = vld [vmem:[#allocation22_spill] sm:$0xff] }
 0x42a   :  { %v1734_v21 = vadd.f32 %v1733_v44, %v7860_v5  ;;  %v9460_v44 = vld [vmem:[#allocation19_spill] sm:$0xff] }
 0x42b   :  { %v8606_v16 = vpack.c.bf16 %v1742_v42, %v1739_v22 }
 0x42c   :  { %v8608_v47 = vpack.c.bf16 %v1734_v21, %v1731_v41  ;;  %v9461_v21 = vld [vmem:[#allocation20_spill] sm:$0xff] }
 0x42e   :  { %v6483_v8 = vpop.f32.mrb[68].mxu0 }
 0x42f   :  { %v1746_v62 = vpop.f32.mrb[69].mxu0  ;;  %v1755_v63 = vadd.f32 %v6483_v8, %v7951_v50 }
 0x430   :  { %v6484_v10 = vpop.f32.mrb[70].mxu0  ;;  %v1747_v26 = vadd.f32 %v1746_v62, %v7922_v1 }
 0x431   :  { %v1758_v60 = vadd.f32 %v6484_v10, %v7953_v4  ;;  %v1749_v45 = vpop.f32.mrb[71].mxu0 }
 0x432   :  { %v1750_v25 = vadd.f32 %v1749_v45, %v7924_v31 }
 0x433   :  { %v8614_v23 = vpack.c.bf16 %v1758_v60, %v1755_v63  ;;  %v1860_v63 = vmax.bf16 %v1844_v20, %v8600_v54  ;;  %v1845_v60 = vmul.bf16 1009007652, %v8608_v47  ;;  %v6820_v20 = vld [vmem:[%s9349_s2 + $0x184] ss:$8 sps:$4 sm:$0xff]  }
 0x434   :  { %v8616_v0 = vpack.c.bf16 %v1750_v25, %v1747_v26 }
 0x436   :  { %v6487_v5 = vpop.f32.mrb[72].mxu0 }
 0x437   :  { %v1762_v11 = vpop.f32.mrb[73].mxu0  ;;  %v1771_v51 = vadd.f32 %v6487_v5, %v7759_v43 }
 0x438   :  { %v6488_v15 = vpop.f32.mrb[74].mxu0  ;;  %v1763_v50 = vadd.f32 %v1762_v11, %v7731_v27 }
 0x439   :  { %v1774_v46 = vadd.f32 %v6488_v15, %v7761_v61  ;;  %v1765_v56 = vpop.f32.mrb[75].mxu0  ;;  %v1846_v15 = vmul.bf16 1009007652, %v8606_v16 }
 0x43a   :  { %v1766_v4 = vadd.f32 %v1765_v56, %v7733_v12 }
 0x43b   :  { %v1834_v28 = vpack.c.bf16 %v1774_v46, %v1771_v51  ;;  %v1861_v51 = vmax.bf16 %v1845_v60, %v8608_v47  ;;  %v9462_v46 = vld [vmem:[#allocation25_spill] sm:$0xff] }
 0x43c   :  { %v1833_v1 = vpack.c.bf16 %v1766_v4, %v1763_v50  ;;  %v9463_v50 = vld [vmem:[#allocation26_spill] sm:$0xff] }
 0x43d   :  { %v1850_v31 = vmul.bf16 1009007652, %v1834_v28  ;;  %v6843_v60 = vld [vmem:[%s9349_s2 + $0x1f0] ss:$8 sps:$4 sm:$0xff]  }
 0x43e   :  { %v1849_v29 = vmul.bf16 1009007652, %v1833_v1  ;;  %v6491_v17 = vpop.f32.mrb[76].mxu0 }
 0x43f   :  { %v1778_v58 = vpop.f32.mrb[77].mxu0  ;;  %v1787_v43 = vadd.f32 %v6491_v17, %v7813_v39  ;;  %v1866_v55 = vmax.bf16 %v1850_v31, %v1834_v28 }
 0x440   :  { %v6492_v59 = vpop.f32.mrb[78].mxu0  ;;  %v1865_v19 = vmax.bf16 %v1849_v29, %v1833_v1  ;;  %v1779_v27 = vadd.f32 %v1778_v58, %v7787_v13  ;;  %v1859_v13 = vmax.bf16 %v1843_v34, %v1827_v3  ;;  %v9464_v1 = vld [vmem:[#allocation23_spill] sm:$0xff] }
 0x441   :  { %v1790_v61 = vadd.f32 %v6492_v59, %v7815_v14  ;;  %v1781_v48 = vpop.f32.mrb[79].mxu0  ;;  %v1862_v59 = vmax.bf16 %v1846_v15, %v8606_v16  ;;  %v6796_v16 = vld [vmem:[%s9349_s2 + $0x100] ss:$8 sps:$4 sm:$0xff]  }
 0x442   :  { %v1782_v12 = vadd.f32 %v1781_v48, %v7789_v49  ;;  %5969 = vmatprep.subr.bf16.mxu1 %v1865_v19  ;;  %v1847_v19 = vmul.bf16 1009007652, %v8616_v0  ;;  %v6810_v34 = vld [vmem:[%s9349_s2 + $0x140] ss:$8 sps:$4 sm:$0xff]  }
 0x443   :  { %v1836_v32 = vpack.c.bf16 %v1790_v61, %v1787_v43  ;;  %5970 = vmatpush3.bf16.msra.mxu1 %v1857_v6  ;;  %v1848_v43 = vmul.bf16 1009007652, %v8614_v23  ;;  %v9466_v15 = vld [vmem:[#allocation27_spill] sm:$0xff] }
 0x444   :  { %v1835_v33 = vpack.c.bf16 %v1782_v12, %v1779_v27  ;;  %5971 = vmatprep.subr.bf16.mxu1 %v1866_v55  ;;  %v1863_v61 = vmax.bf16 %v1847_v19, %v8616_v0  ;;  %v6799_v12 = vld [vmem:[%s9349_s2 + $0x114] ss:$8 sps:$4 sm:$0xff]   ;;  %v6801_v0 = vld [vmem:[%s9349_s2 + $0x110] ss:$8 sps:$4 sm:$0xff]   ;;  %v6804_v55 = vld [vmem:[%s9349_s2 + $0x120] ss:$8 sps:$4 sm:$0xff]  }
 0x445   :  { %v1852_v53 = vmul.bf16 1009007652, %v1836_v32  ;;  %v1864_v27 = vmax.bf16 %v1848_v43, %v8614_v23  ;;  %v6802_v23 = vld [vmem:[%s9349_s2 + $0x124] ss:$8 sps:$4 sm:$0xff]   ;;  %v9469_v19 = vld [vmem:[#allocation30_spill] sm:$0xff] }
 0x446   :  { %v1851_v40 = vmul.bf16 1009007652, %v1835_v33  ;;  %v6495_v52 = vpop.f32.mrb[80].mxu0 }
 0x447   :  { %v1794_v18 = vpop.f32.mrb[81].mxu0  ;;  %5972 = vmatpush3.bf16.msra.mxu1 %v1858_v57  ;;  %v1803_v49 = vadd.f32 %v6495_v52, %v9458_v30  ;;  %v1868_v8 = vmax.bf16 %v1852_v53, %v1836_v32  ;;  %v6805_v32 = vld [vmem:[%s9349_s2 + $0x134] ss:$8 sps:$4 sm:$0xff]   ;;  %v6808_v57 = vld [vmem:[%s9349_s2 + $0x144] ss:$8 sps:$4 sm:$0xff]  }
 0x448   :  { %v6496_v39 = vpop.f32.mrb[82].mxu0  ;;  %v1867_v14 = vmax.bf16 %v1851_v40, %v1835_v33  ;;  %v1795_v41 = vadd.f32 %v1794_v18, %v9460_v44  ;;  %v6807_v33 = vld [vmem:[%s9349_s2 + $0x130] ss:$8 sps:$4 sm:$0xff]   ;;  %v6811_v53 = vld [vmem:[%s9349_s2 + $0x154] ss:$8 sps:$4 sm:$0xff]  }
 0x449   :  { %v1806_v22 = vadd.f32 %v6496_v39, %v9459_v38  ;;  %v1797_v42 = vpop.f32.mrb[83].mxu0  ;;  %v6813_v40 = vld [vmem:[%s9349_s2 + $0x150] ss:$8 sps:$4 sm:$0xff]   ;;  %v6814_v52 = vld [vmem:[%s9349_s2 + $0x164] ss:$8 sps:$4 sm:$0xff]  }
 0x44a   :  { %v1798_v36 = vadd.f32 %v1797_v42, %v9461_v21  ;;  %5973 = vmatprep.subr.bf16.mxu1 %v1867_v14  ;;  %v6816_v18 = vld [vmem:[%s9349_s2 + $0x160] ss:$8 sps:$4 sm:$0xff]   ;;  %v6817_v39 = vld [vmem:[%s9349_s2 + $0x174] ss:$8 sps:$4 sm:$0xff]   ;;  %v6819_v14 = vld [vmem:[%s9349_s2 + $0x170] ss:$8 sps:$4 sm:$0xff]  }
 0x44b   :  { %v1838_v62 = vpack.c.bf16 %v1806_v22, %v1803_v49  ;;  %5974 = vmatpush3.bf16.msra.mxu1 %v1859_v13  ;;  %v6822_v13 = vld [vmem:[%s9349_s2 + $0x180] ss:$8 sps:$4 sm:$0xff]   ;;  %v6823_v30 = vld [vmem:[%s9349_s2 + $0x194] ss:$8 sps:$4 sm:$0xff]   ;;  %v6825_v49 = vld [vmem:[%s9349_s2 + $0x190] ss:$8 sps:$4 sm:$0xff]  }
 0x44c   :  { %v1837_v10 = vpack.c.bf16 %v1798_v36, %v1795_v41  ;;  %5975 = vmatprep.subr.bf16.mxu1 %v1868_v8  ;;  %v6826_v38 = vld [vmem:[%s9349_s2 + $0x1a4] ss:$8 sps:$4 sm:$0xff]   ;;  %v6828_v22 = vld [vmem:[%s9349_s2 + $0x1a0] ss:$8 sps:$4 sm:$0xff]   ;;  %v6829_v42 = vld [vmem:[%s9349_s2 + $0x1b4] ss:$8 sps:$4 sm:$0xff]  }
 0x44d   :  { %v1854_v3 = vmul.bf16 1009007652, %v1838_v62  ;;  %v6831_v44 = vld [vmem:[%s9349_s2 + $0x1b0] ss:$8 sps:$4 sm:$0xff]   ;;  %v6832_v41 = vld [vmem:[%s9349_s2 + $0x1c4] ss:$8 sps:$4 sm:$0xff]  }
 0x44e   :  { %v1853_v45 = vmul.bf16 1009007652, %v1837_v10  ;;  %v6499_v26 = vpop.f32.mrb[84].mxu0  ;;  %v6834_v21 = vld [vmem:[%s9349_s2 + $0x1c0] ss:$8 sps:$4 sm:$0xff]  }
 0x44f   :  { %v1810_v25 = vpop.f32.mrb[85].mxu0  ;;  %5976 = vmatpush3.bf16.msra.mxu1 %v1860_v63  ;;  %v1819_v56 = vadd.f32 %v6499_v26, %v9462_v46  ;;  %v1870_v29 = vmax.bf16 %v1854_v3, %v1838_v62  ;;  %v6835_v36 = vld [vmem:[%s9349_s2 + $0x1d4] ss:$8 sps:$4 sm:$0xff]   ;;  %v6837_v8 = vld [vmem:[%s9349_s2 + $0x1d0] ss:$8 sps:$4 sm:$0xff]   ;;  %v9467_v46 = vld [vmem:[#allocation28_spill] sm:$0xff] }
 0x450   :  { %v6500_v5 = vpop.f32.mrb[86].mxu0  ;;  %v1869_v11 = vmax.bf16 %v1853_v45, %v1837_v10  ;;  %v1811_v54 = vadd.f32 %v1810_v25, %v9464_v1  ;;  %v6838_v62 = vld [vmem:[%s9349_s2 + $0x1e4] ss:$8 sps:$4 sm:$0xff]   ;;  %v6840_v10 = vld [vmem:[%s9349_s2 + $0x1e0] ss:$8 sps:$4 sm:$0xff]  }
 0x451   :  { %v1822_v4 = vadd.f32 %v6500_v5, %v9463_v50  ;;  %v1813_v28 = vpop.f32.mrb[87].mxu0  ;;  %v6841_v63 = vld [vmem:[%s9349_s2 + $0x1f4] ss:$8 sps:$4 sm:$0xff]  }
 0x452   :  { %v1814_v31 = vadd.f32 %v1813_v28, %v9465_v9  ;;  %5977 = vmatprep.subr.bf16.mxu1 %v1869_v11 }
 0x453   :  { %v1840_v17 = vpack.c.bf16 %v1822_v4, %v1819_v56  ;;  %5978 = vmatpush3.bf16.msra.mxu1 %v1861_v51 }
 0x454   :  { %v1839_v58 = vpack.c.bf16 %v1814_v31, %v1811_v54  ;;  %5979 = vmatprep.subr.bf16.mxu1 %v1870_v29 }
 0x455   :  { %v1856_v47 = vmul.bf16 1009007652, %v1840_v17 }
 0x456   :  { %v1855_v24 = vmul.bf16 1009007652, %v1839_v58 }
 0x457   :  { %5980 = vmatpush3.bf16.msra.mxu1 %v1862_v59  ;;  %v1872_v48 = vmax.bf16 %v1856_v47, %v1840_v17 }
 0x458   :  { %v1871_v6 = vmax.bf16 %v1855_v24, %v1839_v58  ;;  %v9468_v58 = vld [vmem:[#allocation29_spill] sm:$0xff] }
 0x45a   :  { %5981 = vmatprep.subr.bf16.mxu1 %v1871_v6 }
 0x45b   :  { %5982 = vmatpush3.bf16.msra.mxu1 %v1863_v61 }
 0x45c   :  { %5983 = vmatprep.subr.bf16.mxu1 %v1872_v48 }
 0x45f   :  { %5984 = vmatpush3.bf16.msra.mxu1 %v1864_v27 }
 0x460   :  { %6575 = vmatprep.subr.bf16.mxu1 %v9418_v35 }
 0x462   :  { %2292 = vmatmul.mubr.bf16.vlgmr.msra.gmra.mrb[48].mxu1 %v6796_v16 }
 0x463   :  { %2299 = vmatprep.mubr.bf16.mxu1 %v6799_v12 }
 0x46a   :  { %2300 = vmatmul.mubr.bf16.gmra.mrb[52].mxu1 %v6801_v0 }
 0x46b   :  { %2307 = vmatprep.mubr.bf16.mxu1 %v6802_v23  ;;  %v9470_v23 = vld [vmem:[#allocation31_spill] sm:$0xff] }
 0x472   :  { %2308 = vmatmul.mubr.bf16.gmra.mrb[56].mxu1 %v6804_v55 }
 0x473   :  { %2315 = vmatprep.mubr.bf16.mxu1 %v6805_v32  ;;  %v9471_v32 = vld [vmem:[#allocation32_spill] sm:$0xff] }
 0x47a   :  { %2316 = vmatmul.mubr.bf16.gmra.mrb[60].mxu1 %v6807_v33 }
 0x47b   :  { %2323 = vmatprep.mubr.bf16.mxu1 %v6808_v57 }
 0x482   :  { %2324 = vmatmul.mubr.bf16.gmra.mrb[64].mxu1 %v6810_v34 }
 0x483   :  { %2331 = vmatprep.mubr.bf16.mxu1 %v6811_v53 }
 0x48a   :  { %2332 = vmatmul.mubr.bf16.gmra.mrb[68].mxu1 %v6813_v40 }
 0x48b   :  { %2339 = vmatprep.mubr.bf16.mxu1 %v6814_v52 }
 0x492   :  { %2340 = vmatmul.mubr.bf16.gmra.mrb[72].mxu1 %v6816_v18 }
 0x493   :  { %2347 = vmatprep.mubr.bf16.mxu1 %v6817_v39 }
 0x49a   :  { %2348 = vmatmul.mubr.bf16.gmra.mrb[76].mxu1 %v6819_v14 }
 0x49b   :  { %2355 = vmatprep.mubr.bf16.mxu1 %v6820_v20 }
 0x4a2   :  { %2356 = vmatmul.mubr.bf16.gmra.mrb[80].mxu1 %v6822_v13  ;;  %v9472_v13 = vld [vmem:[#allocation33_spill] sm:$0xff] }
 0x4a3   :  { %2363 = vmatprep.mubr.bf16.mxu1 %v6823_v30 }
 0x4aa   :  { %2364 = vmatmul.mubr.bf16.gmra.mrb[84].mxu1 %v6825_v49  ;;  %v9473_v49 = vld [vmem:[#allocation34_spill] sm:$0xff] }
 0x4ab   :  { %2371 = vmatprep.mubr.bf16.mxu1 %v6826_v38 }
 0x4b2   :  { %2372 = vmatmul.mubr.bf16.gmra.mrb[88].mxu1 %v6828_v22 }
 0x4b3   :  { %2379 = vmatprep.mubr.bf16.mxu1 %v6829_v42 }
 0x4ba   :  { %2380 = vmatmul.mubr.bf16.gmra.mrb[92].mxu1 %v6831_v44 }
 0x4bb   :  { %2387 = vmatprep.mubr.bf16.mxu1 %v6832_v41 }
 0x4c2   :  { %2388 = vmatmul.mubr.bf16.gmra.mrb[96].mxu1 %v6834_v21 }
 0x4c3   :  { %2395 = vmatprep.mubr.bf16.mxu1 %v6835_v36 }
 0x4ca   :  { %2396 = vmatmul.mubr.bf16.gmra.mrb[100].mxu1 %v6837_v8 }
 0x4cb   :  { %2403 = vmatprep.mubr.bf16.mxu1 %v6838_v62 }
 0x4d2   :  { %2404 = vmatmul.mubr.bf16.gmra.mrb[104].mxu1 %v6840_v10 }
 0x4d3   :  { %2411 = vmatprep.mubr.bf16.mxu1 %v6841_v63  ;;  %v9474_v63 = vld [vmem:[#allocation35_spill] sm:$0xff] }
 0x4da   :  { %2412 = vmatmul.mubr.bf16.gmra.mrb[108].mxu1 %v6843_v60 }
 0x4db   :  { %6591 = vmatprep.mubr.msk.bf16.mxu1 %vm7031_vm2, %v9418_v35 }
 0x535   :  { %v5985_v3 = vpop.f32.mrb[48].mxu1 }
 0x536   :  { %v5986_v45 = vpop.f32.mrb[49].mxu1 }
 0x537   :  { %v5987_v26 = vadd.f32 %v5986_v45, %v5985_v3  ;;  %v5988_v25 = vpop.f32.mrb[50].mxu1  ;;  %v9475_v3 = vld [vmem:[#allocation36_spill] sm:$0xff] }
 0x538   :  { %v5989_v5 = vpop.f32.mrb[51].mxu1 }
 0x539   :  { %v5990_v11 = vadd.f32 %v5989_v5, %v5988_v25  ;;  %v2294_v51 = vadd.f32 %v5987_v26, %v9466_v15 }
 0x53b   :  { %v2297_v56 = vadd.f32 %v5990_v11, %v9467_v46 }
 0x53d   :  { %v2420_v50 = vpack.c.bf16 %v2297_v56, %v2294_v51  ;;  %v5991_v4 = vpop.f32.mrb[52].mxu1 }
 0x53e   :  { %v5992_v28 = vpop.f32.mrb[53].mxu1 }
 0x53f   :  { %v2436_v1 = vmul.bf16 1009007652, %v2420_v50  ;;  %v5993_v54 = vadd.f32 %v5992_v28, %v5991_v4  ;;  %v5994_v9 = vpop.f32.mrb[54].mxu1  ;;  %v9476_v4 = vld [vmem:[#allocation37_spill] sm:$0xff] }
 0x540   :  { %v5995_v31 = vpop.f32.mrb[55].mxu1 }
 0x541   :  { %v2452_v29 = vmax.bf16 %v2436_v1, %v2420_v50  ;;  %v5996_v17 = vadd.f32 %v5995_v31, %v5994_v9  ;;  %v2302_v59 = vadd.f32 %v5993_v54, %v9468_v58  ;;  %v9477_v1 = vld [vmem:[#allocation38_spill] sm:$0xff] }
 0x543   :  { %v2305_v47 = vadd.f32 %v5996_v17, %v9469_v19  ;;  %6502 = vmatpush3.bf16.msra.mxu0 %v2452_v29 }
 0x544   :  { %6503 = vmatprep.subr.bf16.mxu0 %v9418_v35 }
 0x545   :  { %v2421_v24 = vpack.c.bf16 %v2305_v47, %v2302_v59  ;;  %v5997_v6 = vpop.f32.mrb[56].mxu1 }
 0x546   :  { %v5998_v43 = vpop.f32.mrb[57].mxu1 }
 0x547   :  { %v2437_v61 = vmul.bf16 1009007652, %v2421_v24  ;;  %v5999_v48 = vadd.f32 %v5998_v43, %v5997_v6  ;;  %v6000_v27 = vpop.f32.mrb[58].mxu1  ;;  %v9478_v6 = vld [vmem:[#allocation39_spill] sm:$0xff] }
 0x548   :  { %v6001_v16 = vpop.f32.mrb[59].mxu1 }
 0x549   :  { %v2453_v12 = vmax.bf16 %v2437_v61, %v2421_v24  ;;  %v6002_v0 = vadd.f32 %v6001_v16, %v6000_v27  ;;  %v2310_v55 = vadd.f32 %v5999_v48, %v9470_v23  ;;  %v9479_v61 = vld [vmem:[#allocation40_spill] sm:$0xff] }
 0x54b   :  { %v2313_v33 = vadd.f32 %v6002_v0, %v9471_v32  ;;  %6504 = vmatpush3.bf16.msra.mxu0 %v2453_v12 }
 0x54c   :  { %6505 = vmatprep.subr.bf16.mxu0 %v9418_v35 }
 0x54d   :  { %v2422_v57 = vpack.c.bf16 %v2313_v33, %v2310_v55  ;;  %v6003_v34 = vpop.f32.mrb[60].mxu1 }
 0x54e   :  { %v6004_v53 = vpop.f32.mrb[61].mxu1 }
 0x54f   :  { %v2438_v40 = vmul.bf16 1009007652, %v2422_v57  ;;  %v6005_v52 = vadd.f32 %v6004_v53, %v6003_v34  ;;  %v6006_v18 = vpop.f32.mrb[62].mxu1  ;;  %v9480_v34 = vld [vmem:[#allocation41_spill] sm:$0xff] }
 0x550   :  { %v6007_v39 = vpop.f32.mrb[63].mxu1 }
 0x551   :  { %v2454_v14 = vmax.bf16 %v2438_v40, %v2422_v57  ;;  %v6008_v20 = vadd.f32 %v6007_v39, %v6006_v18  ;;  %v2318_v30 = vadd.f32 %v6005_v52, %v9472_v13  ;;  %v9481_v40 = vld [vmem:[#allocation42_spill] sm:$0xff] }
 0x553   :  { %v2321_v38 = vadd.f32 %v6008_v20, %v9473_v49  ;;  %6506 = vmatpush3.bf16.msra.mxu0 %v2454_v14 }
 0x554   :  { %6507 = vmatprep.subr.bf16.mxu0 %v9418_v35 }
 0x555   :  { %v2423_v22 = vpack.c.bf16 %v2321_v38, %v2318_v30  ;;  %v6009_v42 = vpop.f32.mrb[64].mxu1 }
 0x556   :  { %v6010_v44 = vpop.f32.mrb[65].mxu1 }
 0x557   :  { %v2439_v41 = vmul.bf16 1009007652, %v2423_v22  ;;  %v6011_v21 = vadd.f32 %v6010_v44, %v6009_v42  ;;  %v6012_v36 = vpop.f32.mrb[66].mxu1  ;;  %v9482_v42 = vld [vmem:[#allocation43_spill] sm:$0xff] }
 0x558   :  { %v6013_v8 = vpop.f32.mrb[67].mxu1 }
 0x559   :  { %v2455_v62 = vmax.bf16 %v2439_v41, %v2423_v22  ;;  %v6014_v10 = vadd.f32 %v6013_v8, %v6012_v36  ;;  %v2326_v60 = vadd.f32 %v6011_v21, %v9474_v63  ;;  %v9483_v41 = vld [vmem:[#allocation44_spill] sm:$0xff]  ;;  %v5409_v36 = vld [vmem:[%s9351_s4 + $0x2] sm:$0x3] }
 0x55b   :  { %v2329_v45 = vadd.f32 %v6014_v10, %v9475_v3  ;;  %6508 = vmatpush3.bf16.msra.mxu0 %v2455_v62 }
 0x55c   :  { %6509 = vmatprep.subr.bf16.mxu0 %v9418_v35 }
 0x55d   :  { %v2424_v26 = vpack.c.bf16 %v2329_v45, %v2326_v60  ;;  %v6015_v25 = vpop.f32.mrb[68].mxu1 }
 0x55e   :  { %v6016_v5 = vpop.f32.mrb[69].mxu1 }
 0x55f   :  { %v2440_v11 = vmul.bf16 1009007652, %v2424_v26  ;;  %v6017_v15 = vadd.f32 %v6016_v5, %v6015_v25  ;;  %v6018_v51 = vpop.f32.mrb[70].mxu1  ;;  %v9484_v5 = vld [vmem:[#allocation45_spill] sm:$0xff] }
 0x560   :  { %v6019_v46 = vpop.f32.mrb[71].mxu1 }
 0x561   :  { %v2456_v56 = vmax.bf16 %v2440_v11, %v2424_v26  ;;  %v6020_v50 = vadd.f32 %v6019_v46, %v6018_v51  ;;  %v2334_v28 = vadd.f32 %v6017_v15, %v9476_v4  ;;  %v9485_v15 = vld [vmem:[#allocation46_spill] sm:$0xff] }
 0x563   :  { %v2337_v54 = vadd.f32 %v6020_v50, %v9477_v1  ;;  %6510 = vmatpush3.bf16.msra.mxu0 %v2456_v56 }
 0x564   :  { %6511 = vmatprep.subr.bf16.mxu0 %v9418_v35 }
 0x565   :  { %v2425_v9 = vpack.c.bf16 %v2337_v54, %v2334_v28  ;;  %v6021_v31 = vpop.f32.mrb[72].mxu1 }
 0x566   :  { %v6022_v29 = vpop.f32.mrb[73].mxu1 }
 0x567   :  { %v2441_v17 = vmul.bf16 1009007652, %v2425_v9  ;;  %v6023_v58 = vadd.f32 %v6022_v29, %v6021_v31  ;;  %v6024_v59 = vpop.f32.mrb[74].mxu1  ;;  %v9486_v29 = vld [vmem:[#allocation47_spill] sm:$0xff] }
 0x568   :  { %v6025_v19 = vpop.f32.mrb[75].mxu1 }
 0x569   :  { %v2457_v47 = vmax.bf16 %v2441_v17, %v2425_v9  ;;  %v6026_v24 = vadd.f32 %v6025_v19, %v6024_v59  ;;  %v2342_v43 = vadd.f32 %v6023_v58, %v9478_v6  ;;  %v9487_v58 = vld [vmem:[#allocation48_spill] sm:$0xff] }
 0x56b   :  { %v2345_v48 = vadd.f32 %v6026_v24, %v9479_v61  ;;  %6512 = vmatpush3.bf16.msra.mxu0 %v2457_v47 }
 0x56c   :  { %6513 = vmatprep.subr.bf16.mxu0 %v9418_v35 }
 0x56d   :  { %v2426_v27 = vpack.c.bf16 %v2345_v48, %v2342_v43  ;;  %v6027_v16 = vpop.f32.mrb[76].mxu1 }
 0x56e   :  { %v6028_v12 = vpop.f32.mrb[77].mxu1 }
 0x56f   :  { %v2442_v0 = vmul.bf16 1009007652, %v2426_v27  ;;  %v6029_v23 = vadd.f32 %v6028_v12, %v6027_v16  ;;  %v6030_v55 = vpop.f32.mrb[78].mxu1  ;;  %v9488_v12 = vld [vmem:[#allocation49_spill] sm:$0xff] }
 0x570   :  { %v6031_v32 = vpop.f32.mrb[79].mxu1 }
 0x571   :  { %v2458_v33 = vmax.bf16 %v2442_v0, %v2426_v27  ;;  %v6032_v57 = vadd.f32 %v6031_v32, %v6030_v55  ;;  %v2350_v53 = vadd.f32 %v6029_v23, %v9480_v34  ;;  %v9489_v23 = vld [vmem:[#allocation50_spill] sm:$0xff] }
 0x573   :  { %v2353_v52 = vadd.f32 %v6032_v57, %v9481_v40  ;;  %6514 = vmatpush3.bf16.msra.mxu0 %v2458_v33 }
 0x574   :  { %6515 = vmatprep.subr.bf16.mxu0 %v9418_v35 }
 0x575   :  { %v2427_v18 = vpack.c.bf16 %v2353_v52, %v2350_v53  ;;  %v6033_v39 = vpop.f32.mrb[80].mxu1 }
 0x576   :  { %v6034_v14 = vpop.f32.mrb[81].mxu1 }
 0x577   :  { %v2443_v20 = vmul.bf16 1009007652, %v2427_v18  ;;  %v6035_v13 = vadd.f32 %v6034_v14, %v6033_v39  ;;  %v6036_v30 = vpop.f32.mrb[82].mxu1  ;;  %v9490_v14 = vld [vmem:[#allocation51_spill] sm:$0xff] }
 0x578   :  { %v6037_v49 = vpop.f32.mrb[83].mxu1 }
 0x579   :  { %v2459_v38 = vmax.bf16 %v2443_v20, %v2427_v18  ;;  %v6038_v22 = vadd.f32 %v6037_v49, %v6036_v30  ;;  %v2358_v44 = vadd.f32 %v6035_v13, %v9482_v42  ;;  %v9491_v13 = vld [vmem:[#allocation52_spill] sm:$0xff] }
 0x57b   :  { %v2361_v21 = vadd.f32 %v6038_v22, %v9483_v41  ;;  %6516 = vmatpush3.bf16.msra.mxu0 %v2459_v38 }
 0x57c   :  { %6521 = vmatprep.subr.bf16.mxu0 %v9418_v35 }
 0x57d   :  { %v2428_v8 = vpack.c.bf16 %v2361_v21, %v2358_v44  ;;  %v6039_v62 = vpop.f32.mrb[84].mxu1 }
 0x57e   :  { %v6040_v10 = vpop.f32.mrb[85].mxu1  ;;  %6518 = vmatmul.mubr.bf16.vlgmr.msra.gmra.mrb[88].mxu0 %v5409_v36 }
 0x57f   :  { %v2444_v63 = vmul.bf16 1009007652, %v2428_v8  ;;  %v6041_v60 = vadd.f32 %v6040_v10, %v6039_v62  ;;  %v6042_v3 = vpop.f32.mrb[86].mxu1  ;;  %6537 = vmatprep.mubr.msk.bf16.mxu0 %vm7031_vm2, %v9418_v35  ;;  %v9492_v62 = vld [vmem:[#allocation53_spill] sm:$0xff] }
 0x580   :  { %v6043_v45 = vpop.f32.mrb[87].mxu1 }
 0x581   :  { %v2460_v26 = vmax.bf16 %v2444_v63, %v2428_v8  ;;  %v6044_v25 = vadd.f32 %v6043_v45, %v6042_v3  ;;  %v2366_v11 = vadd.f32 %v6041_v60, %v9484_v5  ;;  %v9493_v63 = vld [vmem:[#allocation54_spill] sm:$0xff] }
 0x583   :  { %v2369_v51 = vadd.f32 %v6044_v25, %v9485_v15  ;;  %6522 = vmatpush3.bf16.msra.mxu0 %v2460_v26 }
 0x584   :  { %6523 = vmatprep.subr.bf16.mxu0 %v9418_v35 }
 0x585   :  { %v2429_v46 = vpack.c.bf16 %v2369_v51, %v2366_v11  ;;  %v6045_v56 = vpop.f32.mrb[88].mxu1 }
 0x586   :  { %v6046_v50 = vpop.f32.mrb[89].mxu1 }
 0x587   :  { %v2445_v4 = vmul.bf16 1009007652, %v2429_v46  ;;  %v6047_v28 = vadd.f32 %v6046_v50, %v6045_v56  ;;  %v6048_v1 = vpop.f32.mrb[90].mxu1  ;;  %v9494_v56 = vld [vmem:[#allocation55_spill] sm:$0xff] }
 0x588   :  { %v6049_v54 = vpop.f32.mrb[91].mxu1 }
 0x589   :  { %v2461_v9 = vmax.bf16 %v2445_v4, %v2429_v46  ;;  %v6050_v31 = vadd.f32 %v6049_v54, %v6048_v1  ;;  %v2374_v17 = vadd.f32 %v6047_v28, %v9486_v29  ;;  %v9495_v4 = vld [vmem:[#allocation56_spill] sm:$0xff] }
 0x58b   :  { %v2377_v59 = vadd.f32 %v6050_v31, %v9487_v58  ;;  %6524 = vmatpush3.bf16.msra.mxu0 %v2461_v9 }
 0x58c   :  { %6525 = vmatprep.subr.bf16.mxu0 %v9418_v35 }
 0x58d   :  { %v2430_v19 = vpack.c.bf16 %v2377_v59, %v2374_v17  ;;  %v6051_v47 = vpop.f32.mrb[92].mxu1 }
 0x58e   :  { %v6052_v24 = vpop.f32.mrb[93].mxu1 }
 0x58f   :  { %v2446_v6 = vmul.bf16 1009007652, %v2430_v19  ;;  %v6053_v43 = vadd.f32 %v6052_v24, %v6051_v47  ;;  %v6054_v61 = vpop.f32.mrb[94].mxu1  ;;  %v9496_v47 = vld [vmem:[#allocation57_spill] sm:$0xff] }
 0x590   :  { %v6055_v48 = vpop.f32.mrb[95].mxu1 }
 0x591   :  { %v2462_v27 = vmax.bf16 %v2446_v6, %v2430_v19  ;;  %v6056_v16 = vadd.f32 %v6055_v48, %v6054_v61  ;;  %v2382_v0 = vadd.f32 %v6053_v43, %v9488_v12  ;;  %v9497_v6 = vld [vmem:[#allocation58_spill] sm:$0xff]  ;;  %v6844_v12 = vld [vmem:[%s9347_s0 + $0x100] sm:$0xff]  }
 0x593   :  { %v2385_v55 = vadd.f32 %v6056_v16, %v9489_v23  ;;  %6526 = vmatpush3.bf16.msra.mxu0 %v2462_v27  ;;  %v5411_v16 = vld [vmem:[%s9353_s6 + $0x2] sm:$0x3] }
 0x594   :  { %6527 = vmatprep.subr.bf16.mxu0 %v9418_v35 }
 0x595   :  { %v2431_v32 = vpack.c.bf16 %v2385_v55, %v2382_v0  ;;  %v6057_v33 = vpop.f32.mrb[96].mxu1  ;;  %v1298_v0 = vsel %vm1297_vm3, %v8513_v2, 0.0 }
 0x596   :  { %v6058_v57 = vpop.f32.mrb[97].mxu1  ;;  %v1299_v23 = vrot.slane %v1298_v0, 4 }
 0x597   :  { %v2447_v34 = vmul.bf16 1009007652, %v2431_v32  ;;  %v6059_v53 = vadd.f32 %v6058_v57, %v6057_v33  ;;  %v6060_v40 = vpop.f32.mrb[98].mxu1  ;;  %v9498_v33 = vld [vmem:[#allocation59_spill] sm:$0xff] }
 0x598   :  { %v6061_v52 = vpop.f32.mrb[99].mxu1  ;;  %v1300_v55 = vadd.f32 %v1299_v23, %v1298_v0 }
 0x599   :  { %v2463_v18 = vmax.bf16 %v2447_v34, %v2431_v32  ;;  %v6062_v39 = vadd.f32 %v6061_v52, %v6060_v40  ;;  %v2390_v20 = vadd.f32 %v6059_v53, %v9490_v14 }
 0x59a   :  { %v1301_v53 = vrot.slane %v1300_v55, 2 }
 0x59b   :  { %v2393_v30 = vadd.f32 %v6062_v39, %v9491_v13  ;;  %6528 = vmatpush3.bf16.msra.mxu0 %v2463_v18 }
 0x59c   :  { %6529 = vmatprep.subr.bf16.mxu0 %v9418_v35  ;;  %v1302_v14 = vadd.f32 %v1301_v53, %v1300_v55 }
 0x59d   :  { %v2432_v49 = vpack.c.bf16 %v2393_v30, %v2390_v20  ;;  %v6063_v38 = vpop.f32.mrb[100].mxu1 }
 0x59e   :  { %v6064_v22 = vpop.f32.mrb[101].mxu1  ;;  %v1303_v30 = vrot.slane %v1302_v14, 1 }
 0x59f   :  { %v2448_v42 = vmul.bf16 1009007652, %v2432_v49  ;;  %v6065_v44 = vadd.f32 %v6064_v22, %v6063_v38  ;;  %v6066_v41 = vpop.f32.mrb[102].mxu1 }
 0x5a0   :  { %v6067_v21 = vpop.f32.mrb[103].mxu1  ;;  %v1304_v22 = vadd.f32 %v1303_v30, %v1302_v14 }
 0x5a1   :  { %v2464_v36 = vmax.bf16 %v2448_v42, %v2432_v49  ;;  %v6068_v8 = vadd.f32 %v6067_v21, %v6066_v41  ;;  %v2398_v10 = vadd.f32 %v6065_v44, %v9492_v62 }
 0x5a3   :  { %v2401_v60 = vadd.f32 %v6068_v8, %v9493_v63  ;;  %6530 = vmatpush3.bf16.msra.mxu0 %v2464_v36  ;;  %v9499_v36 = vld [vmem:[#allocation60_spill] sm:$0xff] }
 0x5a4   :  { %6531 = vmatprep.subr.bf16.mxu0 %v9418_v35 }
 0x5a5   :  { %v2433_v3 = vpack.c.bf16 %v2401_v60, %v2398_v10  ;;  %v6069_v45 = vpop.f32.mrb[104].mxu1 }
 0x5a6   :  { %v6070_v26 = vpop.f32.mrb[105].mxu1 }
 0x5a7   :  { %v2449_v25 = vmul.bf16 1009007652, %v2433_v3  ;;  %v6071_v5 = vadd.f32 %v6070_v26, %v6069_v45  ;;  %v6072_v11 = vpop.f32.mrb[106].mxu1 }
 0x5a8   :  { %v6073_v15 = vpop.f32.mrb[107].mxu1 }
 0x5a9   :  { %v2465_v51 = vmax.bf16 %v2449_v25, %v2433_v3  ;;  %v6074_v46 = vadd.f32 %v6073_v15, %v6072_v11  ;;  %v2406_v50 = vadd.f32 %v6071_v5, %v9494_v56  ;;  %v6845_v25 = vld [vmem:[%s9347_s0 + $0x108] sm:$0xff]   ;;  %v6847_v5 = vld [vmem:[%s9347_s0 + $0x118] sm:$0xff]   ;;  %v6848_v11 = vld [vmem:[%s9347_s0 + $0x120] sm:$0xff]  }
 0x5aa   :  { %v6849_v15 = vld [vmem:[%s9347_s0 + $0x128] sm:$0xff]   ;;  %v6852_v56 = vld [vmem:[%s9347_s0 + $0x140] sm:$0xff]  }
 0x5ab   :  { %v2409_v28 = vadd.f32 %v6074_v46, %v9495_v4  ;;  %6532 = vmatpush3.bf16.msra.mxu0 %v2465_v51  ;;  %v6850_v51 = vld [vmem:[%s9347_s0 + $0x130] sm:$0xff]   ;;  %v6851_v46 = vld [vmem:[%s9347_s0 + $0x138] sm:$0xff]  }
 0x5ac   :  { %6533 = vmatprep.subr.bf16.mxu0 %v9418_v35  ;;  %v6854_v4 = vld [vmem:[%s9347_s0 + $0x150] sm:$0xff]  }
 0x5ad   :  { %v2434_v1 = vpack.c.bf16 %v2409_v28, %v2406_v50  ;;  %v6075_v54 = vpop.f32.mrb[108].mxu1  ;;  %v6853_v50 = vld [vmem:[%s9347_s0 + $0x148] sm:$0xff]   ;;  %v6855_v28 = vld [vmem:[%s9347_s0 + $0x158] sm:$0xff]  }
 0x5ae   :  { %v6076_v9 = vpop.f32.mrb[109].mxu1 }
 0x5af   :  { %v2450_v31 = vmul.bf16 1009007652, %v2434_v1  ;;  %v6077_v29 = vadd.f32 %v6076_v9, %v6075_v54  ;;  %v6078_v17 = vpop.f32.mrb[110].mxu1  ;;  %v6857_v54 = vld [vmem:[%s9347_s0 + $0x168] sm:$0xff]   ;;  %v6858_v9 = vld [vmem:[%s9347_s0 + $0x170] sm:$0xff]  }
 0x5b0   :  { %v6079_v58 = vpop.f32.mrb[111].mxu1 }
 0x5b1   :  { %v2466_v59 = vmax.bf16 %v2450_v31, %v2434_v1  ;;  %v6080_v19 = vadd.f32 %v6079_v58, %v6078_v17  ;;  %v2414_v24 = vadd.f32 %v6077_v29, %v9496_v47  ;;  %v6856_v1 = vld [vmem:[%s9347_s0 + $0x160] sm:$0xff]   ;;  %v6859_v31 = vld [vmem:[%s9347_s0 + $0x178] sm:$0xff]  }
 0x5b2   :  { %v6862_v29 = vld [vmem:[%s9349_s2 + $0x204] ss:$8 sps:$4 sm:$0xff]  }
 0x5b3   :  { %v2417_v43 = vadd.f32 %v6080_v19, %v9497_v6  ;;  %6534 = vmatpush3.bf16.msra.mxu0 %v2466_v59  ;;  %v9500_v19 = vld [vmem:[#allocation67_spill] sm:$0xff] }
 0x5b4   :  { %6535 = vmatprep.subr.bf16.mxu0 %v9418_v35 }
 0x5b5   :  { %v2435_v61 = vpack.c.bf16 %v2417_v43, %v2414_v24  ;;  %v9501_v24 = vld [vmem:[#allocation68_spill] sm:$0xff] }
 0x5b7   :  { %v2451_v48 = vmul.bf16 1009007652, %v2435_v61 }
 0x5b9   :  { %v2467_v27 = vmax.bf16 %v2451_v48, %v2435_v61  ;;  %v9502_v61 = vld [vmem:[#allocation63_spill] sm:$0xff] }
 0x5bb   :  { %6536 = vmatpush3.bf16.msra.mxu0 %v2467_v27  ;;  %v9503_v27 = vld [vmem:[#allocation64_spill] sm:$0xff] }
 0x5be   :  { %6538 = vmatmul.mubr.bf16.vlgmr.msra.gmra.mrb[92].mxu0 %v5411_v16 }
 0x5bf   :  { %6543 = vmatprep.mubr.msk.bf16.mxu0 %vm344_vm1, %v6844_v12 }
 0x651   :  { %v2511_v32 = vpop.f32.mrb[88].mxu0 }
 0x652   :  { %v2512_v57 = vadd.f32 %v2511_v32, %v9498_v33  ;;  %v6519_v34 = vpop.f32.mrb[89].mxu0  ;;  %v9504_v33 = vld [vmem:[#allocation75_spill] sm:$0xff] }
 0x653   :  { %v2514_v40 = vpop.f32.mrb[90].mxu0  ;;  %v9505_v34 = vld [vmem:[#allocation76_spill] sm:$0xff] }
 0x654   :  { %v2570_v52 = vsel %vm1297_vm3, %v2512_v57, 0.0  ;;  %v6520_v18 = vpop.f32.mrb[91].mxu0  ;;  %v2566_v44 = vmul.f32 1.442695, %v2512_v57 }
 0x655   :  { %v2571_v39 = vrot.slane %v2570_v52, 4 }
 0x656   :  { %6974 = vpow2.f32 %v2566_v44  ;;  %v9509_v44 = vld [vmem:[#allocation84_spill] sm:$0xff] }
 0x657   :  { %v2572_v20 = vadd.f32 %v2571_v39, %v2570_v52  ;;  %v9506_v52 = vld [vmem:[#allocation71_spill] sm:$0xff]  ;;  %v9507_v39 = vld [vmem:[#allocation72_spill] sm:$0xff] }
 0x659   :  { %v2573_v13 = vrot.slane %v2572_v20, 2 }
 0x65b   :  { %v2574_v49 = vadd.f32 %v2573_v13, %v2572_v20 }
 0x65d   :  { %v2575_v38 = vrot.slane %v2574_v49, 1 }
 0x65f   :  { %v2576_v2 = vadd.f32 %v2575_v38, %v2574_v49 }
 0x660   :  { %v6975_v41 = vpop.eup %6974 }
 0x661   :  { %v8803_v42 = vadd.f32 %v2576_v2, %v1304_v22  ;;  %v2568_v62 = vmul.f32 %v6975_v41, %v8520_v37  ;;  %v6846_v37 = vld [vmem:[%s9347_s0 + $0x110] sm:$0xff]   ;;  %v9508_v22 = vld [vmem:[#allocation83_spill] sm:$0xff] }
 0x691   :  { %v2560_v21 = vpop.f32.mrb[92].mxu0 }
 0x692   :  { %v2561_v8 = vadd.f32 %v2560_v21, %v9499_v36  ;;  %v6539_v10 = vpop.f32.mrb[93].mxu0  ;;  %v9510_v36 = vld [vmem:[#allocation79_spill] sm:$0xff] }
 0x693   :  { %v2563_v63 = vpop.f32.mrb[94].mxu0 }
 0x694   :  { %v8807_v60 = vadd.f32 %v2568_v62, %v2561_v8  ;;  %v6540_v3 = vpop.f32.mrb[95].mxu0  ;;  %v9511_v62 = vld [vmem:[#allocation80_spill] sm:$0xff] }
 0x696   :  { %v2611_v45 = vpack.c.bf16 %v8807_v60, %v8807_v60 }
 0x698   :  { %6707 = vmatprep.subr.msk.bf16.mxu0 %vm393_vm0, %v2611_v45  ;;  %v2934_v26 = vsel %vm393_vm0, %v2611_v45, 0 }
 0x699   :  { %6542 = vmatpush3.bf16.msra.mxu0 %v2934_v26 }
 0x69c   :  { %6544 = vmatmul.mubr.msk.bf16.vlgmr.msra.gmra.mrb[96].mxu0 %vm344_vm1, %v6845_v25 }
 0x69d   :  { %6547 = vmatprep.mubr.msk.bf16.mxu0 %vm344_vm1, %v6846_v37  ;;  %v9512_v37 = vld [vmem:[#allocation91_spill] sm:$0xff] }
 0x6a4   :  { %6548 = vmatmul.mubr.msk.bf16.gmra.mrb[100].mxu0 %vm344_vm1, %v6847_v5 }
 0x6a5   :  { %6551 = vmatprep.mubr.msk.bf16.mxu0 %vm344_vm1, %v6848_v11 }
 0x6ac   :  { %6552 = vmatmul.mubr.msk.bf16.gmra.mrb[104].mxu0 %vm344_vm1, %v6849_v15 }
 0x6ad   :  { %6555 = vmatprep.mubr.msk.bf16.mxu0 %vm344_vm1, %v6850_v51  ;;  %v9513_v51 = vld [vmem:[#allocation87_spill] sm:$0xff] }
 0x6b4   :  { %6556 = vmatmul.mubr.msk.bf16.gmra.mrb[108].mxu0 %vm344_vm1, %v6851_v46 }
 0x6b5   :  { %6559 = vmatprep.mubr.msk.bf16.mxu0 %vm344_vm1, %v6852_v56  ;;  %v9514_v56 = vld [vmem:[#allocation88_spill] sm:$0xff] }
 0x6bc   :  { %6560 = vmatmul.mubr.msk.bf16.gmra.mrb[112].mxu0 %vm344_vm1, %v6853_v50 }
 0x6bd   :  { %6563 = vmatprep.mubr.msk.bf16.mxu0 %vm344_vm1, %v6854_v4 }
 0x6c4   :  { %6564 = vmatmul.mubr.msk.bf16.gmra.mrb[116].mxu0 %vm344_vm1, %v6855_v28 }
 0x6c5   :  { %6567 = vmatprep.mubr.msk.bf16.mxu0 %vm344_vm1, %v6856_v1 }
 0x6cc   :  { %6568 = vmatmul.mubr.msk.bf16.gmra.mrb[120].mxu0 %vm344_vm1, %v6857_v54 }
 0x6cd   :  { %6571 = vmatprep.mubr.msk.bf16.mxu0 %vm344_vm1, %v6858_v9 }
 0x6d4   :  { %6572 = vmatmul.mubr.msk.bf16.gmra.mrb[124].mxu0 %vm344_vm1, %v6859_v31  ;;  %v9515_v31 = vld [vmem:[#allocation65_spill] sm:$0xff] }
 0x6d5   :  { %3563 = vmatprep.mubr.bf16.mxu0 %v6862_v29 }
 0x76f   :  { %v6545_v17 = vpop.f32.mrb[96].mxu0 }
 0x770   :  { %v2970_v58 = vpop.f32.mrb[97].mxu0  ;;  %v2979_v47 = vadd.f32 %v6545_v17, %v9500_v19  ;;  %v9516_v17 = vld [vmem:[#allocation66_spill] sm:$0xff]  ;;  %v9517_v19 = vld [vmem:[#allocation61_spill] sm:$0xff] }
 0x771   :  { %v6546_v59 = vpop.f32.mrb[98].mxu0  ;;  %v2971_v48 = vadd.f32 %v2970_v58, %v9502_v61 }
 0x772   :  { %v2982_v6 = vadd.f32 %v6546_v59, %v9501_v24  ;;  %v2973_v43 = vpop.f32.mrb[99].mxu0 }
 0x773   :  { %v2974_v16 = vadd.f32 %v2973_v43, %v9503_v27 }
 0x774   :  { %v3098_v12 = vpack.c.bf16 %v2982_v6, %v2979_v47 }
 0x775   :  { %v3097_v0 = vpack.c.bf16 %v2974_v16, %v2971_v48 }
 0x777   :  { %v6549_v23 = vpop.f32.mrb[100].mxu0  ;;  %v3113_v61 = vmul.bf16 1009007652, %v3097_v0 }
 0x778   :  { %v2986_v55 = vpop.f32.mrb[101].mxu0  ;;  %v2995_v57 = vadd.f32 %v6549_v23, %v9504_v33  ;;  %v3114_v33 = vmul.bf16 1009007652, %v3098_v12 }
 0x779   :  { %v6550_v32 = vpop.f32.mrb[102].mxu0  ;;  %v2987_v18 = vadd.f32 %v2986_v55, %v9506_v52 }
 0x77a   :  { %v2998_v53 = vadd.f32 %v6550_v32, %v9505_v34  ;;  %v2989_v40 = vpop.f32.mrb[103].mxu0  ;;  %v9519_v34 = vld [vmem:[#allocation73_spill] sm:$0xff] }
 0x77b   :  { %v2990_v14 = vadd.f32 %v2989_v40, %v9507_v39  ;;  %v9520_v40 = vld [vmem:[#allocation74_spill] sm:$0xff]  ;;  %v9521_v39 = vld [vmem:[#allocation69_spill] sm:$0xff] }
 0x77c   :  { %v8884_v20 = vpack.c.bf16 %v2998_v53, %v2995_v57  ;;  %v3129_v57 = vmax.bf16 %v3113_v61, %v3097_v0 }
 0x77d   :  { %v3099_v13 = vpack.c.bf16 %v2990_v14, %v2987_v18 }
 0x77f   :  { %v6553_v30 = vpop.f32.mrb[104].mxu0 }
 0x780   :  { %v3002_v49 = vpop.f32.mrb[105].mxu0  ;;  %v3011_v2 = vadd.f32 %v6553_v30, %v9508_v22  ;;  %v9522_v30 = vld [vmem:[#allocation70_spill] sm:$0xff] }
 0x781   :  { %v6554_v38 = vpop.f32.mrb[106].mxu0  ;;  %v3003_v8 = vadd.f32 %v3002_v49, %v9510_v36 }
 0x782   :  { %v3014_v41 = vadd.f32 %v6554_v38, %v9509_v44  ;;  %v3005_v21 = vpop.f32.mrb[107].mxu0  ;;  %v3130_v44 = vmax.bf16 %v3114_v33, %v3098_v12 }
 0x783   :  { %v3006_v10 = vadd.f32 %v3005_v21, %v9511_v62 }
 0x784   :  { %v8890_v63 = vpack.c.bf16 %v3014_v41, %v3011_v2  ;;  %v3115_v41 = vmul.bf16 1009007652, %v3099_v13 }
 0x785   :  { %v8892_v3 = vpack.c.bf16 %v3006_v10, %v3003_v8 }
 0x787   :  { %v6557_v45 = vpop.f32.mrb[108].mxu0 }
 0x788   :  { %v3018_v26 = vpop.f32.mrb[109].mxu0  ;;  %v3027_v5 = vadd.f32 %v6557_v45, %v9512_v37  ;;  %v3116_v45 = vmul.bf16 1009007652, %v8884_v20 }
 0x789   :  { %v6558_v25 = vpop.f32.mrb[110].mxu0  ;;  %v3019_v46 = vadd.f32 %v3018_v26, %v9513_v51  ;;  %v3131_v26 = vmax.bf16 %v3115_v41, %v3099_v13  ;;  %v9525_v51 = vld [vmem:[#allocation77_spill] sm:$0xff] }
 0x78a   :  { %v3030_v11 = vadd.f32 %v6558_v25, %v8439_v7  ;;  %v3021_v15 = vpop.f32.mrb[111].mxu0  ;;  %v9518_v7 = vld [vmem:[#allocation62_spill] sm:$0xff]  ;;  %v9523_v25 = vld [vmem:[#allocation81_spill] sm:$0xff] }
 0x78b   :  { %v3022_v50 = vadd.f32 %v3021_v15, %v9514_v56  ;;  %v9526_v56 = vld [vmem:[#allocation78_spill] sm:$0xff] }
 0x78c   :  { %v8898_v4 = vpack.c.bf16 %v3030_v11, %v3027_v5  ;;  %v9524_v5 = vld [vmem:[#allocation82_spill] sm:$0xff] }
 0x78d   :  { %v8900_v28 = vpack.c.bf16 %v3022_v50, %v3019_v46  ;;  %v6875_v41 = vld [vmem:[%s9349_s2 + $0x254] ss:$8 sps:$4 sm:$0xff]  }
 0x78f   :  { %v6561_v1 = vpop.f32.mrb[112].mxu0 }
 0x790   :  { %v3034_v54 = vpop.f32.mrb[113].mxu0  ;;  %v3043_v29 = vadd.f32 %v6561_v1, %v9515_v31  ;;  %v3117_v31 = vmul.bf16 1009007652, %v8892_v3 }
 0x791   :  { %v6562_v9 = vpop.f32.mrb[114].mxu0  ;;  %v3035_v47 = vadd.f32 %v3034_v54, %v9517_v19 }
 0x792   :  { %v3046_v58 = vadd.f32 %v6562_v9, %v9516_v17  ;;  %v3037_v59 = vpop.f32.mrb[115].mxu0  ;;  %v3132_v9 = vmax.bf16 %v3116_v45, %v8884_v20  ;;  %v6886_v45 = vld [vmem:[%s9349_s2 + $0x280] ss:$8 sps:$4 sm:$0xff]  }
 0x793   :  { %v3038_v24 = vadd.f32 %v3037_v59, %v9518_v7  ;;  %v3133_v7 = vmax.bf16 %v3117_v31, %v8892_v3 }
 0x794   :  { %v3106_v6 = vpack.c.bf16 %v3046_v58, %v3043_v29 }
 0x795   :  { %v3105_v43 = vpack.c.bf16 %v3038_v24, %v3035_v47  ;;  %v3118_v47 = vmul.bf16 1009007652, %v8890_v63  ;;  %v9527_v24 = vld [vmem:[#allocation89_spill] sm:$0xff] }
 0x796   :  { %v3122_v48 = vmul.bf16 1009007652, %v3106_v6 }
 0x797   :  { %v3121_v27 = vmul.bf16 1009007652, %v3105_v43  ;;  %v6565_v16 = vpop.f32.mrb[116].mxu0 }
 0x798   :  { %v3050_v23 = vpop.f32.mrb[117].mxu0  ;;  %v3059_v53 = vadd.f32 %v6565_v16, %v9519_v34  ;;  %v3138_v38 = vmax.bf16 %v3122_v48, %v3106_v6  ;;  %v9530_v16 = vld [vmem:[#allocation86_spill] sm:$0xff]  ;;  %v3119_v34 = vmul.bf16 1009007652, %v8900_v28 }
 0x799   :  { %v6566_v55 = vpop.f32.mrb[118].mxu0  ;;  %v3137_v32 = vmax.bf16 %v3121_v27, %v3105_v43  ;;  %v3051_v14 = vadd.f32 %v3050_v23, %v9521_v39  ;;  %v9528_v43 = vld [vmem:[#allocation90_spill] sm:$0xff]  ;;  %v9529_v27 = vld [vmem:[#allocation85_spill] sm:$0xff] }
 0x79a   :  { %v3062_v52 = vadd.f32 %v6566_v55, %v9520_v40  ;;  %v3053_v18 = vpop.f32.mrb[119].mxu0 }
 0x79b   :  { %v3054_v49 = vadd.f32 %v3053_v18, %v9522_v30  ;;  %6116 = vmatprep.subr.bf16.mxu0 %v3137_v32  ;;  %v3135_v18 = vmax.bf16 %v3119_v34, %v8900_v28  ;;  %v6863_v30 = vld [vmem:[%s9349_s2 + $0x214] ss:$8 sps:$4 sm:$0xff]   ;;  %v6865_v28 = vld [vmem:[%s9349_s2 + $0x210] ss:$8 sps:$4 sm:$0xff]  }
 0x79c   :  { %v3108_v22 = vpack.c.bf16 %v3062_v52, %v3059_v53  ;;  %6117 = vmatpush3.bf16.msra.mxu0 %v3129_v57  ;;  %v3134_v57 = vmax.bf16 %v3118_v47, %v8890_v63  ;;  %v3120_v52 = vmul.bf16 1009007652, %v8898_v4  ;;  %v6860_v63 = vld [vmem:[%s9349_s2 + $0x200] ss:$8 sps:$4 sm:$0xff]  }
 0x79d   :  { %v3107_v2 = vpack.c.bf16 %v3054_v49, %v3051_v14  ;;  %6118 = vmatprep.subr.bf16.mxu0 %v3138_v38  ;;  %v6868_v49 = vld [vmem:[%s9349_s2 + $0x220] ss:$8 sps:$4 sm:$0xff]   ;;  %v6869_v38 = vld [vmem:[%s9349_s2 + $0x234] ss:$8 sps:$4 sm:$0xff]  }
 0x79e   :  { %v3124_v21 = vmul.bf16 1009007652, %v3108_v22  ;;  %v3136_v14 = vmax.bf16 %v3120_v52, %v8898_v4  ;;  %v6866_v4 = vld [vmem:[%s9349_s2 + $0x224] ss:$8 sps:$4 sm:$0xff]  }
 0x79f   :  { %v3123_v36 = vmul.bf16 1009007652, %v3107_v2  ;;  %v6569_v0 = vpop.f32.mrb[120].mxu0 }
 0x7a0   :  { %v3066_v8 = vpop.f32.mrb[121].mxu0  ;;  %6119 = vmatpush3.bf16.msra.mxu0 %v3130_v44  ;;  %v3075_v37 = vadd.f32 %v6569_v0, %v9523_v25  ;;  %v3140_v50 = vmax.bf16 %v3124_v21, %v3108_v22  ;;  %v6871_v22 = vld [vmem:[%s9349_s2 + $0x230] ss:$8 sps:$4 sm:$0xff]   ;;  %v6874_v44 = vld [vmem:[%s9349_s2 + $0x240] ss:$8 sps:$4 sm:$0xff]  }
 0x7a1   :  { %v6570_v62 = vpop.f32.mrb[122].mxu0  ;;  %v3139_v10 = vmax.bf16 %v3123_v36, %v3107_v2  ;;  %v3067_v46 = vadd.f32 %v3066_v8, %v9525_v51  ;;  %v6872_v2 = vld [vmem:[%s9349_s2 + $0x244] ss:$8 sps:$4 sm:$0xff]   ;;  %v6877_v21 = vld [vmem:[%s9349_s2 + $0x250] ss:$8 sps:$4 sm:$0xff]  }
 0x7a2   :  { %v3078_v11 = vadd.f32 %v6570_v62, %v9524_v5  ;;  %v3069_v15 = vpop.f32.mrb[123].mxu0  ;;  %v6878_v36 = vld [vmem:[%s9349_s2 + $0x264] ss:$8 sps:$4 sm:$0xff]   ;;  %v6880_v0 = vld [vmem:[%s9349_s2 + $0x260] ss:$8 sps:$4 sm:$0xff]  }
 0x7a3   :  { %v3070_v12 = vadd.f32 %v3069_v15, %v9526_v56  ;;  %6120 = vmatprep.subr.bf16.mxu0 %v3139_v10  ;;  %v6881_v8 = vld [vmem:[%s9349_s2 + $0x274] ss:$8 sps:$4 sm:$0xff]   ;;  %v6883_v62 = vld [vmem:[%s9349_s2 + $0x270] ss:$8 sps:$4 sm:$0xff]   ;;  %v6884_v10 = vld [vmem:[%s9349_s2 + $0x284] ss:$8 sps:$4 sm:$0xff]  }
 0x7a4   :  { %v3110_v1 = vpack.c.bf16 %v3078_v11, %v3075_v37  ;;  %6121 = vmatpush3.bf16.msra.mxu0 %v3131_v26  ;;  %v6887_v26 = vld [vmem:[%s9349_s2 + $0x294] ss:$8 sps:$4 sm:$0xff]   ;;  %v6889_v25 = vld [vmem:[%s9349_s2 + $0x290] ss:$8 sps:$4 sm:$0xff]   ;;  %v6890_v37 = vld [vmem:[%s9349_s2 + $0x2a4] ss:$8 sps:$4 sm:$0xff]  }
 0x7a5   :  { %v3109_v54 = vpack.c.bf16 %v3070_v12, %v3067_v46  ;;  %6122 = vmatprep.subr.bf16.mxu0 %v3140_v50  ;;  %v6892_v5 = vld [vmem:[%s9349_s2 + $0x2a0] ss:$8 sps:$4 sm:$0xff]   ;;  %v6893_v11 = vld [vmem:[%s9349_s2 + $0x2b4] ss:$8 sps:$4 sm:$0xff]   ;;  %v6895_v15 = vld [vmem:[%s9349_s2 + $0x2b0] ss:$8 sps:$4 sm:$0xff]  }
 0x7a6   :  { %v3126_v13 = vmul.bf16 1009007652, %v3110_v1  ;;  %v6896_v51 = vld [vmem:[%s9349_s2 + $0x2c4] ss:$8 sps:$4 sm:$0xff]   ;;  %v6898_v46 = vld [vmem:[%s9349_s2 + $0x2c0] ss:$8 sps:$4 sm:$0xff]  }
 0x7a7   :  { %v3125_v29 = vmul.bf16 1009007652, %v3109_v54  ;;  %v6573_v17 = vpop.f32.mrb[124].mxu0  ;;  %v6899_v56 = vld [vmem:[%s9349_s2 + $0x2d4] ss:$8 sps:$4 sm:$0xff]  }
 0x7a8   :  { %v3082_v58 = vpop.f32.mrb[125].mxu0  ;;  %6123 = vmatpush3.bf16.msra.mxu0 %v3132_v9  ;;  %v3091_v6 = vadd.f32 %v6573_v17, %v9527_v24  ;;  %v3142_v55 = vmax.bf16 %v3126_v13, %v3110_v1  ;;  %v6901_v12 = vld [vmem:[%s9349_s2 + $0x2d0] ss:$8 sps:$4 sm:$0xff]   ;;  %v6902_v50 = vld [vmem:[%s9349_s2 + $0x2e4] ss:$8 sps:$4 sm:$0xff]  }
 0x7a9   :  { %v6574_v59 = vpop.f32.mrb[126].mxu0  ;;  %v3141_v19 = vmax.bf16 %v3125_v29, %v3109_v54  ;;  %v3083_v20 = vadd.f32 %v3082_v58, %v9529_v27  ;;  %v6904_v1 = vld [vmem:[%s9349_s2 + $0x2e0] ss:$8 sps:$4 sm:$0xff]   ;;  %v6905_v54 = vld [vmem:[%s9349_s2 + $0x2f4] ss:$8 sps:$4 sm:$0xff]  }
 0x7aa   :  { %v3094_v61 = vadd.f32 %v6574_v59, %v9528_v43  ;;  %v3085_v48 = vpop.f32.mrb[127].mxu0  ;;  %v6907_v9 = vld [vmem:[%s9349_s2 + $0x2f0] ss:$8 sps:$4 sm:$0xff]  }
 0x7ab   :  { %v3086_v23 = vadd.f32 %v3085_v48, %v9530_v16  ;;  %6124 = vmatprep.subr.bf16.mxu0 %v3141_v19  ;;  %v9531_v19 = vld [vmem:[#allocation92_spill] sm:$0xff] }
 0x7ac   :  { %v3112_v32 = vpack.c.bf16 %v3094_v61, %v3091_v6  ;;  %6125 = vmatpush3.bf16.msra.mxu0 %v3133_v7  ;;  %v9532_v7 = vld [vmem:[#allocation93_spill] sm:$0xff] }
 0x7ad   :  { %v3111_v33 = vpack.c.bf16 %v3086_v23, %v3083_v20  ;;  %6126 = vmatprep.subr.bf16.mxu0 %v3142_v55 }
 0x7ae   :  { %v3128_v3 = vmul.bf16 1009007652, %v3112_v32 }
 0x7af   :  { %v3127_v53 = vmul.bf16 1009007652, %v3111_v33 }
 0x7b0   :  { %6127 = vmatpush3.bf16.msra.mxu0 %v3134_v57  ;;  %v3144_v39 = vmax.bf16 %v3128_v3, %v3112_v32  ;;  %v3224_v32 = vpop.permute.xlu0 %3223 }
 0x7b1   :  { %v3143_v40 = vmax.bf16 %v3127_v53, %v3111_v33  ;;  %v3229_v33 = vpop.permute.xlu1 %3228 }
 0x7b3   :  { %6128 = vmatprep.subr.bf16.mxu0 %v3143_v40 }
 0x7b4   :  { %6129 = vmatpush3.bf16.msra.mxu0 %v3135_v18 }
 0x7b5   :  { %6130 = vmatprep.subr.bf16.mxu0 %v3144_v39 }
 0x7b8   :  { %6131 = vmatpush3.bf16.msra.mxu0 %v3136_v14 }
 0x7b9   :  { %6649 = vmatprep.subr.bf16.mxu0 %v9418_v35 }
 0x7bb   :  { %3564 = vmatmul.mubr.bf16.vlgmr.msra.gmra.mrb[128].mxu0 %v6860_v63 }
 0x7bc   :  { %3571 = vmatprep.mubr.bf16.mxu0 %v6863_v30 }
 0x7c3   :  { %3572 = vmatmul.mubr.bf16.gmra.mrb[132].mxu0 %v6865_v28  ;;  %v3234_v28 = vpop.permute.xlu0 %3233 }
 0x7c4   :  { %3579 = vmatprep.mubr.bf16.mxu0 %v6866_v4  ;;  %v3239_v4 = vpop.permute.xlu1 %3238 }
 0x7cb   :  { %3580 = vmatmul.mubr.bf16.gmra.mrb[136].mxu0 %v6868_v49 }
 0x7cc   :  { %3587 = vmatprep.mubr.bf16.mxu0 %v6869_v38 }
 0x7d3   :  { %3588 = vmatmul.mubr.bf16.gmra.mrb[140].mxu0 %v6871_v22 }
 0x7d4   :  { %3595 = vmatprep.mubr.bf16.mxu0 %v6872_v2 }
 0x7db   :  { %3596 = vmatmul.mubr.bf16.gmra.mrb[144].mxu0 %v6874_v44 }
 0x7dc   :  { %3603 = vmatprep.mubr.bf16.mxu0 %v6875_v41 }
 0x7e3   :  { %3604 = vmatmul.mubr.bf16.gmra.mrb[148].mxu0 %v6877_v21 }
 0x7e4   :  { %3611 = vmatprep.mubr.bf16.mxu0 %v6878_v36 }
 0x7eb   :  { %3612 = vmatmul.mubr.bf16.gmra.mrb[152].mxu0 %v6880_v0 }
 0x7ec   :  { %3619 = vmatprep.mubr.bf16.mxu0 %v6881_v8 }
 0x7f3   :  { %3620 = vmatmul.mubr.bf16.gmra.mrb[156].mxu0 %v6883_v62 }
 0x7f4   :  { %3627 = vmatprep.mubr.bf16.mxu0 %v6884_v10  ;;  %v3244_v10 = vpop.permute.xlu0 %3243 }
 0x7fb   :  { %3628 = vmatmul.mubr.bf16.gmra.mrb[160].mxu0 %v6886_v45  ;;  %v3249_v45 = vpop.permute.xlu1 %3248 }
 0x7fc   :  { %3635 = vmatprep.mubr.bf16.mxu0 %v6887_v26 }
 0x803   :  { %3636 = vmatmul.mubr.bf16.gmra.mrb[164].mxu0 %v6889_v25 }
 0x804   :  { %3643 = vmatprep.mubr.bf16.mxu0 %v6890_v37 }
 0x80b   :  { %3644 = vmatmul.mubr.bf16.gmra.mrb[168].mxu0 %v6892_v5 }
 0x80c   :  { %3651 = vmatprep.mubr.bf16.mxu0 %v6893_v11 }
 0x813   :  { %3652 = vmatmul.mubr.bf16.gmra.mrb[172].mxu0 %v6895_v15 }
 0x814   :  { %3659 = vmatprep.mubr.bf16.mxu0 %v6896_v51 }
 0x81b   :  { %3660 = vmatmul.mubr.bf16.gmra.mrb[176].mxu0 %v6898_v46 }
 0x81c   :  { %3667 = vmatprep.mubr.bf16.mxu0 %v6899_v56 }
 0x823   :  { %3668 = vmatmul.mubr.bf16.gmra.mrb[180].mxu0 %v6901_v12 }
 0x824   :  { %3675 = vmatprep.mubr.bf16.mxu0 %v6902_v50 }
 0x82b   :  { %3676 = vmatmul.mubr.bf16.gmra.mrb[184].mxu0 %v6904_v1  ;;  %v3254_v1 = vpop.permute.xlu0 %3253 }
 0x82c   :  { %3683 = vmatprep.mubr.bf16.mxu0 %v6905_v54  ;;  %v3259_v54 = vpop.permute.xlu1 %3258 }
 0x833   :  { %3684 = vmatmul.mubr.bf16.gmra.mrb[188].mxu0 %v6907_v9 }
 0x834   :  { %6665 = vmatprep.mubr.msk.bf16.mxu0 %vm7031_vm2, %v9418_v35 }
 0x88e   :  { %v6132_v31 = vpop.f32.mrb[128].mxu0 }
 0x88f   :  { %v6133_v13 = vpop.f32.mrb[129].mxu0 }
 0x890   :  { %v6134_v29 = vadd.f32 %v6133_v13, %v6132_v31  ;;  %v6135_v17 = vpop.f32.mrb[130].mxu0 }
 0x891   :  { %v6136_v58 = vpop.f32.mrb[131].mxu0 }
 0x892   :  { %v6137_v59 = vadd.f32 %v6136_v58, %v6135_v17  ;;  %v3566_v47 = vadd.f32 %v6134_v29, %v9531_v19 }
 0x894   :  { %v3569_v24 = vadd.f32 %v6137_v59, %v9532_v7 }
 0x896   :  { %v3692_v6 = vpack.c.bf16 %v3569_v24, %v3566_v47  ;;  %v6138_v43 = vpop.f32.mrb[132].mxu0 }
 0x897   :  { %v6139_v61 = vpop.f32.mrb[133].mxu0 }
 0x898   :  { %v3708_v48 = vmul.bf16 1009007652, %v3692_v6  ;;  %v6140_v27 = vadd.f32 %v6139_v61, %v6138_v43  ;;  %v6141_v20 = vpop.f32.mrb[134].mxu0  ;;  %v3269_v43 = vpop.permute.xlu1 %3268 }
 0x899   :  { %v6142_v16 = vpop.f32.mrb[135].mxu0 }
 0x89a   :  { %v3724_v23 = vmax.bf16 %v3708_v48, %v3692_v6  ;;  %v6143_v55 = vadd.f32 %v6142_v16, %v6141_v20  ;;  %v3574_v57 = vadd.f32 %v6140_v27, %v3224_v32  ;;  %v3264_v6 = vpop.permute.xlu0 %3263 }
 0x89c   :  { %v3577_v34 = vadd.f32 %v6143_v55, %v3229_v33  ;;  %6576 = vmatpush3.bf16.msra.mxu1 %v3724_v23 }
 0x89d   :  { %6577 = vmatprep.subr.bf16.mxu1 %v9418_v35 }
 0x89e   :  { %v3693_v3 = vpack.c.bf16 %v3577_v34, %v3574_v57  ;;  %v6144_v53 = vpop.f32.mrb[136].mxu0 }
 0x89f   :  { %v6145_v40 = vpop.f32.mrb[137].mxu0 }
 0x8a0   :  { %v3709_v52 = vmul.bf16 1009007652, %v3693_v3  ;;  %v6146_v18 = vadd.f32 %v6145_v40, %v6144_v53  ;;  %v6147_v39 = vpop.f32.mrb[138].mxu0  ;;  %v3279_v53 = vpop.permute.xlu1 %3278 }
 0x8a1   :  { %v6148_v14 = vpop.f32.mrb[139].mxu0 }
 0x8a2   :  { %v3725_v63 = vmax.bf16 %v3709_v52, %v3693_v3  ;;  %v6149_v30 = vadd.f32 %v6148_v14, %v6147_v39  ;;  %v3582_v49 = vadd.f32 %v6146_v18, %v3234_v28  ;;  %v3274_v3 = vpop.permute.xlu0 %3273 }
 0x8a4   :  { %v3585_v38 = vadd.f32 %v6149_v30, %v3239_v4  ;;  %6578 = vmatpush3.bf16.msra.mxu1 %v3725_v63 }
 0x8a5   :  { %6579 = vmatprep.subr.bf16.mxu1 %v9418_v35 }
 0x8a6   :  { %v3694_v22 = vpack.c.bf16 %v3585_v38, %v3582_v49  ;;  %v6150_v2 = vpop.f32.mrb[140].mxu0 }
 0x8a7   :  { %v6151_v44 = vpop.f32.mrb[141].mxu0 }
 0x8a8   :  { %v3710_v41 = vmul.bf16 1009007652, %v3694_v22  ;;  %v6152_v21 = vadd.f32 %v6151_v44, %v6150_v2  ;;  %v6153_v36 = vpop.f32.mrb[142].mxu0  ;;  %v3289_v2 = vpop.permute.xlu1 %3288 }
 0x8a9   :  { %v6154_v0 = vpop.f32.mrb[143].mxu0 }
 0x8aa   :  { %v3726_v8 = vmax.bf16 %v3710_v41, %v3694_v22  ;;  %v6155_v62 = vadd.f32 %v6154_v0, %v6153_v36  ;;  %v3590_v26 = vadd.f32 %v6152_v21, %v3244_v10  ;;  %v3284_v22 = vpop.permute.xlu0 %3283 }
 0x8ac   :  { %v3593_v25 = vadd.f32 %v6155_v62, %v3249_v45  ;;  %6580 = vmatpush3.bf16.msra.mxu1 %v3726_v8 }
 0x8ad   :  { %6581 = vmatprep.subr.bf16.mxu1 %v9418_v35 }
 0x8ae   :  { %v3695_v37 = vpack.c.bf16 %v3593_v25, %v3590_v26  ;;  %v6156_v5 = vpop.f32.mrb[144].mxu0 }
 0x8af   :  { %v6157_v11 = vpop.f32.mrb[145].mxu0 }
 0x8b0   :  { %v3711_v15 = vmul.bf16 1009007652, %v3695_v37  ;;  %v6158_v51 = vadd.f32 %v6157_v11, %v6156_v5  ;;  %v6159_v46 = vpop.f32.mrb[146].mxu0  ;;  %v3299_v5 = vpop.permute.xlu1 %3298 }
 0x8b1   :  { %v6160_v56 = vpop.f32.mrb[147].mxu0 }
 0x8b2   :  { %v3727_v12 = vmax.bf16 %v3711_v15, %v3695_v37  ;;  %v6161_v50 = vadd.f32 %v6160_v56, %v6159_v46  ;;  %v3598_v9 = vadd.f32 %v6158_v51, %v3254_v1  ;;  %v3294_v37 = vpop.permute.xlu0 %3293  ;;  %v5605_v51 = vld [vmem:[%s9351_s4 + $0x4] sm:$0x3] }
 0x8b4   :  { %v3601_v31 = vadd.f32 %v6161_v50, %v3259_v54  ;;  %6582 = vmatpush3.bf16.msra.mxu1 %v3727_v12 }
 0x8b5   :  { %6583 = vmatprep.subr.bf16.mxu1 %v9418_v35 }
 0x8b6   :  { %v3696_v13 = vpack.c.bf16 %v3601_v31, %v3598_v9  ;;  %v6162_v29 = vpop.f32.mrb[148].mxu0 }
 0x8b7   :  { %v6163_v17 = vpop.f32.mrb[149].mxu0 }
 0x8b8   :  { %v3712_v58 = vmul.bf16 1009007652, %v3696_v13  ;;  %v6164_v59 = vadd.f32 %v6163_v17, %v6162_v29  ;;  %v6165_v19 = vpop.f32.mrb[150].mxu0  ;;  %v3304_v29 = vpop.permute.xlu0 %3303 }
 0x8b9   :  { %v6166_v47 = vpop.f32.mrb[151].mxu0  ;;  %v3309_v17 = vpop.permute.xlu1 %3308 }
 0x8ba   :  { %v3728_v7 = vmax.bf16 %v3712_v58, %v3696_v13  ;;  %v6167_v24 = vadd.f32 %v6166_v47, %v6165_v19  ;;  %v3606_v61 = vadd.f32 %v6164_v59, %v3264_v6 }
 0x8bc   :  { %v3609_v48 = vadd.f32 %v6167_v24, %v3269_v43  ;;  %6584 = vmatpush3.bf16.msra.mxu1 %v3728_v7 }
 0x8bd   :  { %6585 = vmatprep.subr.bf16.mxu1 %v9418_v35 }
 0x8be   :  { %v3697_v27 = vpack.c.bf16 %v3609_v48, %v3606_v61  ;;  %v6168_v20 = vpop.f32.mrb[152].mxu0 }
 0x8bf   :  { %v6169_v16 = vpop.f32.mrb[153].mxu0 }
 0x8c0   :  { %v3713_v23 = vmul.bf16 1009007652, %v3697_v27  ;;  %v6170_v55 = vadd.f32 %v6169_v16, %v6168_v20  ;;  %v6171_v32 = vpop.f32.mrb[154].mxu0  ;;  %v3314_v20 = vpop.permute.xlu0 %3313 }
 0x8c1   :  { %v6172_v33 = vpop.f32.mrb[155].mxu0  ;;  %v3319_v16 = vpop.permute.xlu1 %3318 }
 0x8c2   :  { %v3729_v57 = vmax.bf16 %v3713_v23, %v3697_v27  ;;  %v6173_v34 = vadd.f32 %v6172_v33, %v6171_v32  ;;  %v3614_v40 = vadd.f32 %v6170_v55, %v3274_v3 }
 0x8c4   :  { %v3617_v52 = vadd.f32 %v6173_v34, %v3279_v53  ;;  %6586 = vmatpush3.bf16.msra.mxu1 %v3729_v57 }
 0x8c5   :  { %6587 = vmatprep.subr.bf16.mxu1 %v9418_v35 }
 0x8c6   :  { %v3698_v18 = vpack.c.bf16 %v3617_v52, %v3614_v40  ;;  %v6174_v39 = vpop.f32.mrb[156].mxu0 }
 0x8c7   :  { %v6175_v14 = vpop.f32.mrb[157].mxu0 }
 0x8c8   :  { %v3714_v63 = vmul.bf16 1009007652, %v3698_v18  ;;  %v6176_v30 = vadd.f32 %v6175_v14, %v6174_v39  ;;  %v6177_v28 = vpop.f32.mrb[158].mxu0  ;;  %v3324_v39 = vpop.permute.xlu0 %3323 }
 0x8c9   :  { %v6178_v4 = vpop.f32.mrb[159].mxu0  ;;  %v3329_v14 = vpop.permute.xlu1 %3328 }
 0x8ca   :  { %v3730_v49 = vmax.bf16 %v3714_v63, %v3698_v18  ;;  %v6179_v38 = vadd.f32 %v6178_v4, %v6177_v28  ;;  %v3622_v44 = vadd.f32 %v6176_v30, %v3284_v22 }
 0x8cc   :  { %v3625_v41 = vadd.f32 %v6179_v38, %v3289_v2  ;;  %6588 = vmatpush3.bf16.msra.mxu1 %v3730_v49 }
 0x8cd   :  { %6589 = vmatprep.subr.bf16.mxu1 %v9418_v35 }
 0x8ce   :  { %v3699_v21 = vpack.c.bf16 %v3625_v41, %v3622_v44  ;;  %v6180_v36 = vpop.f32.mrb[160].mxu0 }
 0x8cf   :  { %v6181_v0 = vpop.f32.mrb[161].mxu0 }
 0x8d0   :  { %v3715_v8 = vmul.bf16 1009007652, %v3699_v21  ;;  %v6182_v62 = vadd.f32 %v6181_v0, %v6180_v36  ;;  %v6183_v10 = vpop.f32.mrb[162].mxu0  ;;  %v3334_v36 = vpop.permute.xlu0 %3333 }
 0x8d1   :  { %v6184_v45 = vpop.f32.mrb[163].mxu0  ;;  %v3339_v0 = vpop.permute.xlu1 %3338 }
 0x8d2   :  { %v3731_v26 = vmax.bf16 %v3715_v8, %v3699_v21  ;;  %v6185_v25 = vadd.f32 %v6184_v45, %v6183_v10  ;;  %v3630_v11 = vadd.f32 %v6182_v62, %v3294_v37 }
 0x8d4   :  { %v3633_v15 = vadd.f32 %v6185_v25, %v3299_v5  ;;  %6590 = vmatpush3.bf16.msra.mxu1 %v3731_v26 }
 0x8d5   :  { %6595 = vmatprep.subr.bf16.mxu1 %v9418_v35 }
 0x8d6   :  { %v3700_v46 = vpack.c.bf16 %v3633_v15, %v3630_v11  ;;  %v6186_v56 = vpop.f32.mrb[164].mxu0 }
 0x8d7   :  { %v6187_v12 = vpop.f32.mrb[165].mxu0  ;;  %6592 = vmatmul.mubr.bf16.vlgmr.msra.gmra.mrb[112].mxu1 %v5605_v51 }
 0x8d8   :  { %v3716_v50 = vmul.bf16 1009007652, %v3700_v46  ;;  %v6188_v1 = vadd.f32 %v6187_v12, %v6186_v56  ;;  %v6189_v54 = vpop.f32.mrb[166].mxu0  ;;  %6611 = vmatprep.mubr.msk.bf16.mxu1 %vm7031_vm2, %v9418_v35  ;;  %v3349_v56 = vpop.permute.xlu1 %3348 }
 0x8d9   :  { %v6190_v9 = vpop.f32.mrb[167].mxu0 }
 0x8da   :  { %v3732_v31 = vmax.bf16 %v3716_v50, %v3700_v46  ;;  %v6191_v13 = vadd.f32 %v6190_v9, %v6189_v54  ;;  %v3638_v58 = vadd.f32 %v6188_v1, %v3304_v29  ;;  %v3344_v46 = vpop.permute.xlu0 %3343 }
 0x8dc   :  { %v3641_v59 = vadd.f32 %v6191_v13, %v3309_v17  ;;  %6596 = vmatpush3.bf16.msra.mxu1 %v3732_v31 }
 0x8dd   :  { %6597 = vmatprep.subr.bf16.mxu1 %v9418_v35 }
 0x8de   :  { %v3701_v19 = vpack.c.bf16 %v3641_v59, %v3638_v58  ;;  %v6192_v47 = vpop.f32.mrb[168].mxu0 }
 0x8df   :  { %v6193_v7 = vpop.f32.mrb[169].mxu0 }
 0x8e0   :  { %v3717_v24 = vmul.bf16 1009007652, %v3701_v19  ;;  %v6194_v6 = vadd.f32 %v6193_v7, %v6192_v47  ;;  %v6195_v43 = vpop.f32.mrb[170].mxu0  ;;  %v3359_v47 = vpop.permute.xlu1 %3358 }
 0x8e1   :  { %v6196_v61 = vpop.f32.mrb[171].mxu0 }
 0x8e2   :  { %v3733_v48 = vmax.bf16 %v3717_v24, %v3701_v19  ;;  %v6197_v27 = vadd.f32 %v6196_v61, %v6195_v43  ;;  %v3646_v23 = vadd.f32 %v6194_v6, %v3314_v20  ;;  %v3354_v19 = vpop.permute.xlu0 %3353 }
 0x8e4   :  { %v3649_v55 = vadd.f32 %v6197_v27, %v3319_v16  ;;  %6598 = vmatpush3.bf16.msra.mxu1 %v3733_v48 }
 0x8e5   :  { %6599 = vmatprep.subr.bf16.mxu1 %v9418_v35 }
 0x8e6   :  { %v3702_v32 = vpack.c.bf16 %v3649_v55, %v3646_v23  ;;  %v6198_v33 = vpop.f32.mrb[172].mxu0 }
 0x8e7   :  { %v6199_v57 = vpop.f32.mrb[173].mxu0 }
 0x8e8   :  { %v3718_v34 = vmul.bf16 1009007652, %v3702_v32  ;;  %v6200_v3 = vadd.f32 %v6199_v57, %v6198_v33  ;;  %v6201_v53 = vpop.f32.mrb[174].mxu0  ;;  %v3369_v33 = vpop.permute.xlu1 %3368 }
 0x8e9   :  { %v6202_v40 = vpop.f32.mrb[175].mxu0 }
 0x8ea   :  { %v3734_v52 = vmax.bf16 %v3718_v34, %v3702_v32  ;;  %v6203_v18 = vadd.f32 %v6202_v40, %v6201_v53  ;;  %v3654_v63 = vadd.f32 %v6200_v3, %v3324_v39  ;;  %v3364_v32 = vpop.permute.xlu0 %3363 }
 0x8ec   :  { %v3657_v30 = vadd.f32 %v6203_v18, %v3329_v14  ;;  %6600 = vmatpush3.bf16.msra.mxu1 %v3734_v52  ;;  %v5607_v52 = vld [vmem:[%s9353_s6 + $0x4] sm:$0x3] }
 0x8ed   :  { %6601 = vmatprep.subr.bf16.mxu1 %v9418_v35  ;;  %v6908_v18 = vld [vmem:[%s9347_s0 + $0x180] sm:$0xff]  }
 0x8ee   :  { %v3703_v28 = vpack.c.bf16 %v3657_v30, %v3654_v63  ;;  %v6204_v4 = vpop.f32.mrb[176].mxu0  ;;  %v3747_v39 = vpop.permute.xlu0 %3746 }
 0x8ef   :  { %v6205_v49 = vpop.f32.mrb[177].mxu0 }
 0x8f0   :  { %v3719_v38 = vmul.bf16 1009007652, %v3703_v28  ;;  %v6206_v22 = vadd.f32 %v6205_v49, %v6204_v4  ;;  %v6207_v2 = vpop.f32.mrb[178].mxu0 }
 0x8f1   :  { %v6208_v44 = vpop.f32.mrb[179].mxu0 }
 0x8f2   :  { %v3735_v41 = vmax.bf16 %v3719_v38, %v3703_v28  ;;  %v6209_v21 = vadd.f32 %v6208_v44, %v6207_v2  ;;  %v3662_v8 = vadd.f32 %v6206_v22, %v3334_v36 }
 0x8f4   :  { %v3665_v62 = vadd.f32 %v6209_v21, %v3339_v0  ;;  %6602 = vmatpush3.bf16.msra.mxu1 %v3735_v41 }
 0x8f5   :  { %6603 = vmatprep.subr.bf16.mxu1 %v9418_v35 }
 0x8f6   :  { %v3704_v10 = vpack.c.bf16 %v3665_v62, %v3662_v8  ;;  %v6210_v45 = vpop.f32.mrb[180].mxu0  ;;  %v3796_v62 = vpop.permute.xlu1 %3795 }
 0x8f7   :  { %v6211_v26 = vpop.f32.mrb[181].mxu0 }
 0x8f8   :  { %v3720_v25 = vmul.bf16 1009007652, %v3704_v10  ;;  %v6212_v37 = vadd.f32 %v6211_v26, %v6210_v45  ;;  %v6213_v5 = vpop.f32.mrb[182].mxu0 }
 0x8f9   :  { %v6214_v11 = vpop.f32.mrb[183].mxu0 }
 0x8fa   :  { %v3736_v15 = vmax.bf16 %v3720_v25, %v3704_v10  ;;  %v6215_v51 = vadd.f32 %v6214_v11, %v6213_v5  ;;  %v3670_v12 = vadd.f32 %v6212_v37, %v3344_v46  ;;  %v6911_v46 = vld [vmem:[%s9347_s0 + $0x198] sm:$0xff]  }
 0x8fc   :  { %v3673_v50 = vadd.f32 %v6215_v51, %v3349_v56  ;;  %6604 = vmatpush3.bf16.msra.mxu1 %v3736_v15  ;;  %v6909_v51 = vld [vmem:[%s9347_s0 + $0x188] sm:$0xff]   ;;  %v6912_v56 = vld [vmem:[%s9347_s0 + $0x1a0] sm:$0xff]  }
 0x8fd   :  { %6605 = vmatprep.subr.bf16.mxu1 %v9418_v35 }
 0x8fe   :  { %v3705_v1 = vpack.c.bf16 %v3673_v50, %v3670_v12  ;;  %v6216_v54 = vpop.f32.mrb[184].mxu0  ;;  %v6913_v12 = vld [vmem:[%s9347_s0 + $0x1a8] sm:$0xff]   ;;  %v6914_v50 = vld [vmem:[%s9347_s0 + $0x1b0] sm:$0xff]  }
 0x8ff   :  { %v6217_v9 = vpop.f32.mrb[185].mxu0 }
 0x900   :  { %v3721_v31 = vmul.bf16 1009007652, %v3705_v1  ;;  %v6218_v13 = vadd.f32 %v6217_v9, %v6216_v54  ;;  %v6219_v29 = vpop.f32.mrb[186].mxu0  ;;  %v6916_v54 = vld [vmem:[%s9347_s0 + $0x1c0] sm:$0xff]   ;;  %v6917_v9 = vld [vmem:[%s9347_s0 + $0x1c8] sm:$0xff]  }
 0x901   :  { %v6220_v17 = vpop.f32.mrb[187].mxu0 }
 0x902   :  { %v3737_v58 = vmax.bf16 %v3721_v31, %v3705_v1  ;;  %v6221_v59 = vadd.f32 %v6220_v17, %v6219_v29  ;;  %v3678_v7 = vadd.f32 %v6218_v13, %v3354_v19  ;;  %v6915_v1 = vld [vmem:[%s9347_s0 + $0x1b8] sm:$0xff]   ;;  %v6918_v31 = vld [vmem:[%s9347_s0 + $0x1d0] sm:$0xff]   ;;  %v6920_v29 = vld [vmem:[%s9347_s0 + $0x1e0] sm:$0xff]   ;;  %v9124_v19 = vpop.permute.xlu0 %3999 }
 0x903   :  { %v6919_v13 = vld [vmem:[%s9347_s0 + $0x1d8] sm:$0xff]   ;;  %v6921_v17 = vld [vmem:[%s9347_s0 + $0x1e8] sm:$0xff]  }
 0x904   :  { %v3681_v24 = vadd.f32 %v6221_v59, %v3359_v47  ;;  %6606 = vmatpush3.bf16.msra.mxu1 %v3737_v58  ;;  %v6922_v58 = vld [vmem:[%s9347_s0 + $0x1f0] sm:$0xff]   ;;  %v6923_v59 = vld [vmem:[%s9347_s0 + $0x1f8] sm:$0xff]   ;;  %v9126_v47 = vpop.permute.xlu1 %4004 }
 0x905   :  { %6607 = vmatprep.subr.bf16.mxu1 %v9418_v35 }
 0x906   :  { %v3706_v6 = vpack.c.bf16 %v3681_v24, %v3678_v7  ;;  %v6222_v43 = vpop.f32.mrb[188].mxu0  ;;  %v3920_v7 = vpop.permute.xlu0 %3919 }
 0x907   :  { %v6223_v61 = vpop.f32.mrb[189].mxu0 }
 0x908   :  { %v3722_v48 = vmul.bf16 1009007652, %v3706_v6  ;;  %v6224_v27 = vadd.f32 %v6223_v61, %v6222_v43  ;;  %v6225_v20 = vpop.f32.mrb[190].mxu0  ;;  %v3925_v24 = vpop.permute.xlu1 %3924 }
 0x909   :  { %v6226_v16 = vpop.f32.mrb[191].mxu0 }
 0x90a   :  { %v3738_v23 = vmax.bf16 %v3722_v48, %v3706_v6  ;;  %v6227_v55 = vadd.f32 %v6226_v16, %v6225_v20  ;;  %v3686_v57 = vadd.f32 %v6224_v27, %v3364_v32  ;;  %v6926_v6 = vld [vmem:[%s9349_s2 + $0x304] ss:$8 sps:$4 sm:$0xff]   ;;  %v9131_v43 = vpop.permute.xlu0 %4009 }
 0x90c   :  { %v3689_v34 = vadd.f32 %v6227_v55, %v3369_v33  ;;  %6608 = vmatpush3.bf16.msra.mxu1 %v3738_v23  ;;  %v9133_v61 = vpop.permute.xlu1 %4014 }
 0x90d   :  { %6609 = vmatprep.subr.bf16.mxu1 %v9418_v35 }
 0x90e   :  { %v3707_v3 = vpack.c.bf16 %v3689_v34, %v3686_v57  ;;  %v3930_v48 = vpop.permute.xlu0 %3929 }
 0x910   :  { %v3723_v53 = vmul.bf16 1009007652, %v3707_v3  ;;  %v3935_v27 = vpop.permute.xlu1 %3934 }
 0x912   :  { %v3739_v40 = vmax.bf16 %v3723_v53, %v3707_v3  ;;  %v9135_v20 = vpop.permute.xlu0 %4019 }
 0x914   :  { %6610 = vmatpush3.bf16.msra.mxu1 %v3739_v40  ;;  %v9137_v16 = vpop.permute.xlu1 %4024 }
 0x916   :  { %v3940_v23 = vpop.permute.xlu0 %3939 }
 0x917   :  { %6612 = vmatmul.mubr.bf16.vlgmr.msra.gmra.mrb[116].mxu1 %v5607_v52 }
 0x918   :  { %6617 = vmatprep.mubr.msk.bf16.mxu1 %vm344_vm1, %v6908_v18  ;;  %v3945_v55 = vpop.permute.xlu1 %3944 }
 0x91a   :  { %v9139_v32 = vpop.permute.xlu0 %4029 }
 0x91c   :  { %v9141_v33 = vpop.permute.xlu1 %4034 }
 0x91e   :  { %v3950_v57 = vpop.permute.xlu0 %3949 }
 0x920   :  { %v3955_v34 = vpop.permute.xlu1 %3954 }
 0x922   :  { %v9143_v3 = vpop.permute.xlu0 %4039 }
 0x924   :  { %v9145_v53 = vpop.permute.xlu1 %4044 }
 0x926   :  { %v3960_v40 = vpop.permute.xlu0 %3959 }
 0x928   :  { %v3965_v52 = vpop.permute.xlu1 %3964 }
 0x92a   :  { %v9147_v18 = vpop.permute.xlu0 %4049 }
 0x9aa   :  { %v3783_v14 = vpop.f32.mrb[112].mxu1 }
 0x9ab   :  { %v3784_v63 = vadd.f32 %v3783_v14, %v3747_v39  ;;  %v6593_v30 = vpop.f32.mrb[113].mxu1  ;;  %v9149_v39 = vpop.permute.xlu1 %4054 }
 0x9ac   :  { %v3786_v28 = vpop.f32.mrb[114].mxu1 }
 0x9ad   :  { %v3842_v4 = vsel %vm1297_vm3, %v3784_v63, 0.0  ;;  %v6594_v49 = vpop.f32.mrb[115].mxu1  ;;  %v3838_v0 = vmul.f32 1.442695, %v3784_v63  ;;  %v3970_v63 = vpop.permute.xlu0 %3969 }
 0x9ae   :  { %v3843_v38 = vrot.slane %v3842_v4, 4 }
 0x9af   :  { %6976 = vpow2.f32 %v3838_v0  ;;  %v3975_v28 = vpop.permute.xlu1 %3974 }
 0x9b0   :  { %v3844_v22 = vadd.f32 %v3843_v38, %v3842_v4 }
 0x9b1   :  { %v9153_v0 = vpop.permute.xlu0 %4059 }
 0x9b2   :  { %v3845_v2 = vrot.slane %v3844_v22, 2 }
 0x9b4   :  { %v3846_v44 = vadd.f32 %v3845_v2, %v3844_v22 }
 0x9b6   :  { %v3847_v41 = vrot.slane %v3846_v44, 1 }
 0x9b8   :  { %v3848_v21 = vadd.f32 %v3847_v41, %v3846_v44 }
 0x9b9   :  { %v6977_v8 = vpop.eup %6976 }
 0x9ba   :  { %v9055_v36 = vadd.f32 %v3848_v21, %v8803_v42  ;;  %v3840_v26 = vmul.f32 %v6977_v8, %v8807_v60  ;;  %v6910_v60 = vld [vmem:[%s9347_s0 + $0x190] sm:$0xff]   ;;  %v9155_v8 = vpop.permute.xlu1 %4064 }
 0x9ea   :  { %v3832_v10 = vpop.f32.mrb[116].mxu1 }
 0x9eb   :  { %v3833_v45 = vadd.f32 %v3832_v10, %v3796_v62  ;;  %v6613_v25 = vpop.f32.mrb[117].mxu1 }
 0x9ec   :  { %v3835_v37 = vpop.f32.mrb[118].mxu1 }
 0x9ed   :  { %v9058_v5 = vadd.f32 %v3840_v26, %v3833_v45  ;;  %v6614_v11 = vpop.f32.mrb[119].mxu1 }
 0x9ef   :  { %v3883_v15 = vpack.c.bf16 %v9058_v5, %v9058_v5 }
 0x9f1   :  { %6708 = vmatprep.subr.msk.bf16.mxu1 %vm393_vm0, %v3883_v15  ;;  %v4206_v42 = vsel %vm393_vm0, %v3883_v15, 0 }
 0x9f2   :  { %6616 = vmatpush3.bf16.msra.mxu1 %v4206_v42  ;;  %v3980_v42 = vpop.permute.xlu0 %3979 }
 0x9f5   :  { %6618 = vmatmul.mubr.msk.bf16.vlgmr.msra.gmra.mrb[120].mxu1 %vm344_vm1, %v6909_v51 }
 0x9f6   :  { %6621 = vmatprep.mubr.msk.bf16.mxu1 %vm344_vm1, %v6910_v60  ;;  %v3985_v60 = vpop.permute.xlu1 %3984 }
 0x9fd   :  { %6622 = vmatmul.mubr.msk.bf16.gmra.mrb[124].mxu1 %vm344_vm1, %v6911_v46 }
 0x9fe   :  { %6625 = vmatprep.mubr.msk.bf16.mxu1 %vm344_vm1, %v6912_v56 }
 0xa05   :  { %6626 = vmatmul.mubr.msk.bf16.gmra.mrb[128].mxu1 %vm344_vm1, %v6913_v12 }
 0xa06   :  { %6629 = vmatprep.mubr.msk.bf16.mxu1 %vm344_vm1, %v6914_v50 }
 0xa0d   :  { %6630 = vmatmul.mubr.msk.bf16.gmra.mrb[132].mxu1 %vm344_vm1, %v6915_v1  ;;  %v9161_v1 = vpop.permute.xlu0 %4069 }
 0xa0e   :  { %6633 = vmatprep.mubr.msk.bf16.mxu1 %vm344_vm1, %v6916_v54 }
 0xa15   :  { %6634 = vmatmul.mubr.msk.bf16.gmra.mrb[136].mxu1 %vm344_vm1, %v6917_v9 }
 0xa16   :  { %6637 = vmatprep.mubr.msk.bf16.mxu1 %vm344_vm1, %v6918_v31 }
 0xa1d   :  { %6638 = vmatmul.mubr.msk.bf16.gmra.mrb[140].mxu1 %vm344_vm1, %v6919_v13  ;;  %v9163_v13 = vpop.permute.xlu1 %4074 }
 0xa1e   :  { %6641 = vmatprep.mubr.msk.bf16.mxu1 %vm344_vm1, %v6920_v29 }
 0xa25   :  { %6642 = vmatmul.mubr.msk.bf16.gmra.mrb[144].mxu1 %vm344_vm1, %v6921_v17 }
 0xa26   :  { %6645 = vmatprep.mubr.msk.bf16.mxu1 %vm344_vm1, %v6922_v58 }
 0xa2d   :  { %6646 = vmatmul.mubr.msk.bf16.gmra.mrb[148].mxu1 %vm344_vm1, %v6923_v59 }
 0xa2e   :  { %4835 = vmatprep.mubr.bf16.mxu1 %v6926_v6 }
 0xac8   :  { %v6619_v14 = vpop.f32.mrb[120].mxu1 }
 0xac9   :  { %v4242_v30 = vpop.f32.mrb[121].mxu1  ;;  %v4251_v49 = vadd.f32 %v6619_v14, %v3930_v48  ;;  %v3995_v48 = vpop.permute.xlu1 %3994 }
 0xaca   :  { %v6620_v4 = vpop.f32.mrb[122].mxu1  ;;  %v4243_v2 = vadd.f32 %v4242_v30, %v3920_v7 }
 0xacb   :  { %v4254_v38 = vadd.f32 %v6620_v4, %v3935_v27  ;;  %v4245_v22 = vpop.f32.mrb[123].mxu1 }
 0xacc   :  { %v4246_v44 = vadd.f32 %v4245_v22, %v3925_v24  ;;  %v3990_v24 = vpop.permute.xlu0 %3989 }
 0xacd   :  { %v9151_v41 = vpack.c.bf16 %v4254_v38, %v4251_v49 }
 0xace   :  { %v4369_v21 = vpack.c.bf16 %v4246_v44, %v4243_v2 }
 0xad0   :  { %v6623_v62 = vpop.f32.mrb[124].mxu1 }
 0xad1   :  { %v4258_v10 = vpop.f32.mrb[125].mxu1  ;;  %v4267_v26 = vadd.f32 %v6623_v62, %v3950_v57 }
 0xad2   :  { %v6624_v45 = vpop.f32.mrb[126].mxu1  ;;  %v4259_v11 = vadd.f32 %v4258_v10, %v3940_v23  ;;  %v4385_v10 = vmul.bf16 1009007652, %v4369_v21 }
 0xad3   :  { %v4270_v25 = vadd.f32 %v6624_v45, %v3955_v34  ;;  %v4261_v37 = vpop.f32.mrb[127].mxu1 }
 0xad4   :  { %v4262_v15 = vadd.f32 %v4261_v37, %v3945_v55 }
 0xad5   :  { %v9157_v51 = vpack.c.bf16 %v4270_v25, %v4267_v26 }
 0xad6   :  { %v9159_v46 = vpack.c.bf16 %v4262_v15, %v4259_v11 }
 0xad8   :  { %v6627_v56 = vpop.f32.mrb[128].mxu1 }
 0xad9   :  { %v4274_v12 = vpop.f32.mrb[129].mxu1  ;;  %v4283_v54 = vadd.f32 %v6627_v56, %v3970_v63 }
 0xada   :  { %v6628_v50 = vpop.f32.mrb[130].mxu1  ;;  %v4275_v29 = vadd.f32 %v4274_v12, %v3960_v40 }
 0xadb   :  { %v4286_v9 = vadd.f32 %v6628_v50, %v3975_v28  ;;  %v4277_v31 = vpop.f32.mrb[131].mxu1 }
 0xadc   :  { %v4278_v17 = vadd.f32 %v4277_v31, %v3965_v52  ;;  %v4387_v31 = vmul.bf16 1009007652, %v9159_v46 }
 0xadd   :  { %v9165_v58 = vpack.c.bf16 %v4286_v9, %v4283_v54 }
 0xade   :  { %v9167_v59 = vpack.c.bf16 %v4278_v17, %v4275_v29 }
 0xae0   :  { %v6631_v7 = vpop.f32.mrb[132].mxu1 }
 0xae1   :  { %v4290_v6 = vpop.f32.mrb[133].mxu1  ;;  %v4299_v23 = vadd.f32 %v6631_v7, %v3990_v24 }
 0xae2   :  { %v6632_v27 = vpop.f32.mrb[134].mxu1  ;;  %v4291_v34 = vadd.f32 %v4290_v6, %v3980_v42  ;;  %v4386_v42 = vmul.bf16 1009007652, %v9151_v41 }
 0xae3   :  { %v4302_v55 = vadd.f32 %v6632_v27, %v3995_v48  ;;  %v4293_v57 = vpop.f32.mrb[135].mxu1 }
 0xae4   :  { %v4294_v14 = vadd.f32 %v4293_v57, %v3985_v60  ;;  %v4401_v60 = vmax.bf16 %v4385_v10, %v4369_v21  ;;  %v4402_v9 = vmax.bf16 %v4386_v42, %v9151_v41  ;;  %v6935_v42 = vld [vmem:[%s9349_s2 + $0x330] ss:$8 sps:$4 sm:$0xff]  }
 0xae5   :  { %v9169_v63 = vpack.c.bf16 %v4302_v55, %v4299_v23 }
 0xae6   :  { %v9171_v30 = vpack.c.bf16 %v4294_v14, %v4291_v34  ;;  %v4389_v14 = vmul.bf16 1009007652, %v9167_v59 }
 0xae8   :  { %v6635_v40 = vpop.f32.mrb[136].mxu1 }
 0xae9   :  { %v4306_v52 = vpop.f32.mrb[137].mxu1  ;;  %v4315_v4 = vadd.f32 %v6635_v40, %v9131_v43 }
 0xaea   :  { %v6636_v28 = vpop.f32.mrb[138].mxu1  ;;  %v4307_v22 = vadd.f32 %v4306_v52, %v9124_v19 }
 0xaeb   :  { %v4318_v49 = vadd.f32 %v6636_v28, %v9133_v61  ;;  %v4309_v38 = vpop.f32.mrb[139].mxu1 }
 0xaec   :  { %v4310_v2 = vadd.f32 %v4309_v38, %v9126_v47 }
 0xaed   :  { %v4378_v44 = vpack.c.bf16 %v4318_v49, %v4315_v4 }
 0xaee   :  { %v4377_v62 = vpack.c.bf16 %v4310_v2, %v4307_v22 }
 0xaef   :  { %v4394_v45 = vmul.bf16 1009007652, %v4378_v44 }
 0xaf0   :  { %v4393_v26 = vmul.bf16 1009007652, %v4377_v62  ;;  %v6639_v25 = vpop.f32.mrb[140].mxu1 }
 0xaf1   :  { %v4322_v37 = vpop.f32.mrb[141].mxu1  ;;  %v4331_v43 = vadd.f32 %v6639_v25, %v9139_v32  ;;  %v4410_v12 = vmax.bf16 %v4394_v45, %v4378_v44  ;;  %v4391_v45 = vmul.bf16 1009007652, %v9171_v30 }
 0xaf2   :  { %v6640_v11 = vpop.f32.mrb[142].mxu1  ;;  %v4409_v15 = vmax.bf16 %v4393_v26, %v4377_v62  ;;  %v4323_v19 = vadd.f32 %v4322_v37, %v9135_v20  ;;  %v4388_v20 = vmul.bf16 1009007652, %v9157_v51  ;;  %v6927_v37 = vld [vmem:[%s9349_s2 + $0x314] ss:$8 sps:$4 sm:$0xff]  }
 0xaf3   :  { %v4334_v61 = vadd.f32 %v6640_v11, %v9141_v33  ;;  %v4325_v56 = vpop.f32.mrb[143].mxu1  ;;  %v6930_v11 = vld [vmem:[%s9349_s2 + $0x324] ss:$8 sps:$4 sm:$0xff]  }
 0xaf4   :  { %v4326_v47 = vadd.f32 %v4325_v56, %v9137_v16  ;;  %6263 = vmatprep.subr.bf16.mxu1 %v4409_v15  ;;  %v4403_v16 = vmax.bf16 %v4387_v31, %v9159_v46  ;;  %v4404_v34 = vmax.bf16 %v4388_v20, %v9157_v51  ;;  %v6933_v15 = vld [vmem:[%s9349_s2 + $0x334] ss:$8 sps:$4 sm:$0xff]   ;;  %v6941_v56 = vld [vmem:[%s9349_s2 + $0x350] ss:$8 sps:$4 sm:$0xff]   ;;  %v6962_v20 = vld [vmem:[%s9349_s2 + $0x3c0] ss:$8 sps:$4 sm:$0xff]  }
 0xaf5   :  { %v4380_v50 = vpack.c.bf16 %v4334_v61, %v4331_v43  ;;  %6264 = vmatpush3.bf16.msra.mxu1 %v4401_v60  ;;  %v6936_v60 = vld [vmem:[%s9349_s2 + $0x344] ss:$8 sps:$4 sm:$0xff]   ;;  %v6938_v43 = vld [vmem:[%s9349_s2 + $0x340] ss:$8 sps:$4 sm:$0xff]   ;;  %v6939_v61 = vld [vmem:[%s9349_s2 + $0x354] ss:$8 sps:$4 sm:$0xff]  }
 0xaf6   :  { %v4379_v54 = vpack.c.bf16 %v4326_v47, %v4323_v19  ;;  %6265 = vmatprep.subr.bf16.mxu1 %v4410_v12  ;;  %v6942_v19 = vld [vmem:[%s9349_s2 + $0x364] ss:$8 sps:$4 sm:$0xff]   ;;  %v6944_v47 = vld [vmem:[%s9349_s2 + $0x360] ss:$8 sps:$4 sm:$0xff]   ;;  %v6945_v12 = vld [vmem:[%s9349_s2 + $0x374] ss:$8 sps:$4 sm:$0xff]  }
 0xaf7   :  { %v4396_v21 = vmul.bf16 1009007652, %v4380_v50  ;;  %v6951_v31 = vld [vmem:[%s9349_s2 + $0x394] ss:$8 sps:$4 sm:$0xff]  }
 0xaf8   :  { %v4395_v29 = vmul.bf16 1009007652, %v4379_v54  ;;  %v6643_v32 = vpop.f32.mrb[144].mxu1 }
 0xaf9   :  { %v4338_v17 = vpop.f32.mrb[145].mxu1  ;;  %6266 = vmatpush3.bf16.msra.mxu1 %v4402_v9  ;;  %v4347_v24 = vadd.f32 %v6643_v32, %v9147_v18  ;;  %v4412_v23 = vmax.bf16 %v4396_v21, %v4380_v50  ;;  %v6947_v50 = vld [vmem:[%s9349_s2 + $0x370] ss:$8 sps:$4 sm:$0xff]   ;;  %v6950_v9 = vld [vmem:[%s9349_s2 + $0x380] ss:$8 sps:$4 sm:$0xff]  }
 0xafa   :  { %v6644_v33 = vpop.f32.mrb[146].mxu1  ;;  %v4411_v7 = vmax.bf16 %v4395_v29, %v4379_v54  ;;  %v4339_v41 = vadd.f32 %v4338_v17, %v9143_v3  ;;  %v4390_v3 = vmul.bf16 1009007652, %v9165_v58  ;;  %v6948_v54 = vld [vmem:[%s9349_s2 + $0x384] ss:$8 sps:$4 sm:$0xff]  }
 0xafb   :  { %v4350_v6 = vadd.f32 %v6644_v33, %v9149_v39  ;;  %v4341_v48 = vpop.f32.mrb[147].mxu1  ;;  %v6953_v21 = vld [vmem:[%s9349_s2 + $0x390] ss:$8 sps:$4 sm:$0xff]   ;;  %v6954_v29 = vld [vmem:[%s9349_s2 + $0x3a4] ss:$8 sps:$4 sm:$0xff]  }
 0xafc   :  { %v4342_v27 = vadd.f32 %v4341_v48, %v9145_v53  ;;  %6267 = vmatprep.subr.bf16.mxu1 %v4411_v7  ;;  %v4405_v53 = vmax.bf16 %v4389_v14, %v9167_v59  ;;  %v4406_v10 = vmax.bf16 %v4390_v3, %v9165_v58  ;;  %v6924_v58 = vld [vmem:[%s9349_s2 + $0x300] ss:$8 sps:$4 sm:$0xff]   ;;  %v6957_v17 = vld [vmem:[%s9349_s2 + $0x3b4] ss:$8 sps:$4 sm:$0xff]   ;;  %v6959_v33 = vld [vmem:[%s9349_s2 + $0x3b0] ss:$8 sps:$4 sm:$0xff]  }
 0xafd   :  { %v4382_v55 = vpack.c.bf16 %v4350_v6, %v4347_v24  ;;  %6268 = vmatpush3.bf16.msra.mxu1 %v4403_v16  ;;  %v6956_v32 = vld [vmem:[%s9349_s2 + $0x3a0] ss:$8 sps:$4 sm:$0xff]   ;;  %v6960_v7 = vld [vmem:[%s9349_s2 + $0x3c4] ss:$8 sps:$4 sm:$0xff]   ;;  %v6963_v16 = vld [vmem:[%s9349_s2 + $0x3d4] ss:$8 sps:$4 sm:$0xff]  }
 0xafe   :  { %v4381_v57 = vpack.c.bf16 %v4342_v27, %v4339_v41  ;;  %6269 = vmatprep.subr.bf16.mxu1 %v4412_v23  ;;  %v6965_v24 = vld [vmem:[%s9349_s2 + $0x3d0] ss:$8 sps:$4 sm:$0xff]   ;;  %v6966_v6 = vld [vmem:[%s9349_s2 + $0x3e4] ss:$8 sps:$4 sm:$0xff]   ;;  %v6968_v48 = vld [vmem:[%s9349_s2 + $0x3e0] ss:$8 sps:$4 sm:$0xff]  }
 0xaff   :  { %v4398_v46 = vmul.bf16 1009007652, %v4382_v55  ;;  %v6969_v41 = vld [vmem:[%s9349_s2 + $0x3f4] ss:$8 sps:$4 sm:$0xff]   ;;  %v6971_v27 = vld [vmem:[%s9349_s2 + $0x3f0] ss:$8 sps:$4 sm:$0xff]  }
 0xb00   :  { %v4397_v40 = vmul.bf16 1009007652, %v4381_v57  ;;  %v6647_v18 = vpop.f32.mrb[148].mxu1 }
 0xb01   :  { %v4354_v52 = vpop.f32.mrb[149].mxu1  ;;  %6270 = vmatpush3.bf16.msra.mxu1 %v4404_v34  ;;  %v4363_v4 = vadd.f32 %v6647_v18, %v9161_v1  ;;  %v4414_v2 = vmax.bf16 %v4398_v46, %v4382_v55  ;;  %v4491_v18 = vpop.permute.xlu1 %4490 }
 0xb02   :  { %v6648_v39 = vpop.f32.mrb[150].mxu1  ;;  %v4413_v28 = vmax.bf16 %v4397_v40, %v4381_v57  ;;  %v4355_v51 = vadd.f32 %v4354_v52, %v9153_v0  ;;  %v4407_v0 = vmax.bf16 %v4391_v45, %v9171_v30  ;;  %v6929_v30 = vld [vmem:[%s9349_s2 + $0x310] ss:$8 sps:$4 sm:$0xff]   ;;  %v4486_v40 = vpop.permute.xlu0 %4485 }
 0xb03   :  { %v4366_v49 = vadd.f32 %v6648_v39, %v9163_v13  ;;  %v4357_v38 = vpop.f32.mrb[151].mxu1  ;;  %v4392_v13 = vmul.bf16 1009007652, %v9169_v63 }
 0xb04   :  { %v4358_v22 = vadd.f32 %v4357_v38, %v9155_v8  ;;  %6271 = vmatprep.subr.bf16.mxu1 %v4413_v28 }
 0xb05   :  { %v4384_v44 = vpack.c.bf16 %v4366_v49, %v4363_v4  ;;  %6272 = vmatpush3.bf16.msra.mxu1 %v4405_v53  ;;  %v4408_v25 = vmax.bf16 %v4392_v13, %v9169_v63  ;;  %v6932_v63 = vld [vmem:[%s9349_s2 + $0x320] ss:$8 sps:$4 sm:$0xff]  }
 0xb06   :  { %v4383_v62 = vpack.c.bf16 %v4358_v22, %v4355_v51  ;;  %6273 = vmatprep.subr.bf16.mxu1 %v4414_v2 }
 0xb07   :  { %v4400_v59 = vmul.bf16 1009007652, %v4384_v44 }
 0xb08   :  { %v4399_v26 = vmul.bf16 1009007652, %v4383_v62 }
 0xb09   :  { %6274 = vmatpush3.bf16.msra.mxu1 %v4406_v10  ;;  %v4416_v8 = vmax.bf16 %v4400_v59, %v4384_v44  ;;  %v4496_v44 = vpop.permute.xlu0 %4495 }
 0xb0a   :  { %v4415_v1 = vmax.bf16 %v4399_v26, %v4383_v62  ;;  %v4501_v62 = vpop.permute.xlu1 %4500 }
 0xb0c   :  { %6275 = vmatprep.subr.bf16.mxu1 %v4415_v1 }
 0xb0d   :  { %6276 = vmatpush3.bf16.msra.mxu1 %v4407_v0 }
 0xb0e   :  { %6277 = vmatprep.subr.bf16.mxu1 %v4416_v8 }
 0xb11   :  { %6278 = vmatpush3.bf16.msra.mxu1 %v4408_v25 }
 0xb14   :  { %4836 = vmatmul.mubr.bf16.vlgmr.msra.gmra.mrb[152].mxu1 %v6924_v58 }
 0xb15   :  { %4843 = vmatprep.mubr.bf16.mxu1 %v6927_v37 }
 0xb1c   :  { %4844 = vmatmul.mubr.bf16.gmra.mrb[156].mxu1 %v6929_v30  ;;  %v4506_v30 = vpop.permute.xlu0 %4505 }
 0xb1d   :  { %4851 = vmatprep.mubr.bf16.mxu1 %v6930_v11  ;;  %v4511_v11 = vpop.permute.xlu1 %4510 }
 0xb24   :  { %4852 = vmatmul.mubr.bf16.gmra.mrb[160].mxu1 %v6932_v63 }
 0xb25   :  { %4859 = vmatprep.mubr.bf16.mxu1 %v6933_v15 }
 0xb2c   :  { %4860 = vmatmul.mubr.bf16.gmra.mrb[164].mxu1 %v6935_v42 }
 0xb2d   :  { %4867 = vmatprep.mubr.bf16.mxu1 %v6936_v60 }
 0xb34   :  { %4868 = vmatmul.mubr.bf16.gmra.mrb[168].mxu1 %v6938_v43 }
 0xb35   :  { %4875 = vmatprep.mubr.bf16.mxu1 %v6939_v61 }
 0xb3c   :  { %4876 = vmatmul.mubr.bf16.gmra.mrb[172].mxu1 %v6941_v56 }
 0xb3d   :  { %4883 = vmatprep.mubr.bf16.mxu1 %v6942_v19 }
 0xb44   :  { %4884 = vmatmul.mubr.bf16.gmra.mrb[176].mxu1 %v6944_v47 }
 0xb45   :  { %4891 = vmatprep.mubr.bf16.mxu1 %v6945_v12 }
 0xb4c   :  { %4892 = vmatmul.mubr.bf16.gmra.mrb[180].mxu1 %v6947_v50 }
 0xb4d   :  { %4899 = vmatprep.mubr.bf16.mxu1 %v6948_v54  ;;  %v4516_v54 = vpop.permute.xlu0 %4515 }
 0xb54   :  { %4900 = vmatmul.mubr.bf16.gmra.mrb[184].mxu1 %v6950_v9  ;;  %v4521_v9 = vpop.permute.xlu1 %4520 }
 0xb55   :  { %4907 = vmatprep.mubr.bf16.mxu1 %v6951_v31 }
 0xb5c   :  { %4908 = vmatmul.mubr.bf16.gmra.mrb[188].mxu1 %v6953_v21 }
 0xb5d   :  { %4915 = vmatprep.mubr.bf16.mxu1 %v6954_v29 }
 0xb64   :  { %4916 = vmatmul.mubr.bf16.gmra.mrb[192].mxu1 %v6956_v32 }
 0xb65   :  { %4923 = vmatprep.mubr.bf16.mxu1 %v6957_v17 }
 0xb6c   :  { %4924 = vmatmul.mubr.bf16.gmra.mrb[196].mxu1 %v6959_v33 }
 0xb6d   :  { %4931 = vmatprep.mubr.bf16.mxu1 %v6960_v7 }
 0xb74   :  { %4932 = vmatmul.mubr.bf16.gmra.mrb[200].mxu1 %v6962_v20 }
 0xb75   :  { %4939 = vmatprep.mubr.bf16.mxu1 %v6963_v16 }
 0xb7c   :  { %4940 = vmatmul.mubr.bf16.gmra.mrb[204].mxu1 %v6965_v24 }
 0xb7d   :  { %4947 = vmatprep.mubr.bf16.mxu1 %v6966_v6 }
 0xb84   :  { %4948 = vmatmul.mubr.bf16.gmra.mrb[208].mxu1 %v6968_v48  ;;  %v4526_v48 = vpop.permute.xlu0 %4525 }
 0xb85   :  { %4955 = vmatprep.mubr.bf16.mxu1 %v6969_v41  ;;  %v4531_v41 = vpop.permute.xlu1 %4530 }
 0xb8c   :  { %4956 = vmatmul.mubr.bf16.gmra.mrb[212].mxu1 %v6971_v27 }
 0xbe7   :  { %v6279_v23 = vpop.f32.mrb[152].mxu1 }
 0xbe8   :  { %v6280_v55 = vpop.f32.mrb[153].mxu1 }
 0xbe9   :  { %v6281_v57 = vadd.f32 %v6280_v55, %v6279_v23  ;;  %v6282_v34 = vpop.f32.mrb[154].mxu1 }
 0xbea   :  { %v6283_v14 = vpop.f32.mrb[155].mxu1 }
 0xbeb   :  { %v6284_v46 = vadd.f32 %v6283_v14, %v6282_v34  ;;  %v4838_v52 = vadd.f32 %v6281_v57, %v4486_v40 }
 0xbed   :  { %v4841_v39 = vadd.f32 %v6284_v46, %v4491_v18 }
 0xbef   :  { %v4964_v28 = vpack.c.bf16 %v4841_v39, %v4838_v52  ;;  %v6285_v3 = vpop.f32.mrb[156].mxu1 }
 0xbf0   :  { %v6286_v53 = vpop.f32.mrb[157].mxu1 }
 0xbf1   :  { %v4980_v4 = vmul.bf16 1009007652, %v4964_v28  ;;  %v6287_v49 = vadd.f32 %v6286_v53, %v6285_v3  ;;  %v6288_v38 = vpop.f32.mrb[158].mxu1  ;;  %v4541_v3 = vpop.permute.xlu1 %4540 }
 0xbf2   :  { %v6289_v51 = vpop.f32.mrb[159].mxu1 }
 0xbf3   :  { %v4996_v22 = vmax.bf16 %v4980_v4, %v4964_v28  ;;  %v6290_v2 = vadd.f32 %v6289_v51, %v6288_v38  ;;  %v4846_v10 = vadd.f32 %v6287_v49, %v4496_v44  ;;  %v4536_v28 = vpop.permute.xlu0 %4535 }
 0xbf5   :  { %v4849_v45 = vadd.f32 %v6290_v2, %v4501_v62  ;;  %6650 = vmatpush3.bf16.msra.mxu0 %v4996_v22 }
 0xbf6   :  { %6651 = vmatprep.subr.bf16.mxu0 %v9418_v35 }
 0xbf7   :  { %v4965_v59 = vpack.c.bf16 %v4849_v45, %v4846_v10  ;;  %v6291_v26 = vpop.f32.mrb[160].mxu1 }
 0xbf8   :  { %v6292_v1 = vpop.f32.mrb[161].mxu1 }
 0xbf9   :  { %v4981_v13 = vmul.bf16 1009007652, %v4965_v59  ;;  %v6293_v0 = vadd.f32 %v6292_v1, %v6291_v26  ;;  %v6294_v8 = vpop.f32.mrb[162].mxu1  ;;  %v4551_v26 = vpop.permute.xlu1 %4550 }
 0xbfa   :  { %v6295_v25 = vpop.f32.mrb[163].mxu1 }
 0xbfb   :  { %v4997_v58 = vmax.bf16 %v4981_v13, %v4965_v59  ;;  %v6296_v37 = vadd.f32 %v6295_v25, %v6294_v8  ;;  %v4854_v63 = vadd.f32 %v6293_v0, %v4506_v30  ;;  %v4546_v59 = vpop.permute.xlu0 %4545 }
 0xbfd   :  { %v4857_v15 = vadd.f32 %v6296_v37, %v4511_v11  ;;  %6652 = vmatpush3.bf16.msra.mxu0 %v4997_v58 }
 0xbfe   :  { %6653 = vmatprep.subr.bf16.mxu0 %v9418_v35 }
 0xbff   :  { %v4966_v42 = vpack.c.bf16 %v4857_v15, %v4854_v63  ;;  %v6297_v60 = vpop.f32.mrb[164].mxu1 }
 0xc00   :  { %v6298_v43 = vpop.f32.mrb[165].mxu1 }
 0xc01   :  { %v4982_v61 = vmul.bf16 1009007652, %v4966_v42  ;;  %v6299_v56 = vadd.f32 %v6298_v43, %v6297_v60  ;;  %v6300_v19 = vpop.f32.mrb[166].mxu1  ;;  %v4561_v60 = vpop.permute.xlu1 %4560 }
 0xc02   :  { %v6301_v47 = vpop.f32.mrb[167].mxu1 }
 0xc03   :  { %v4998_v12 = vmax.bf16 %v4982_v61, %v4966_v42  ;;  %v6302_v50 = vadd.f32 %v6301_v47, %v6300_v19  ;;  %v4862_v31 = vadd.f32 %v6299_v56, %v4516_v54  ;;  %v4556_v42 = vpop.permute.xlu0 %4555 }
 0xc05   :  { %v4865_v21 = vadd.f32 %v6302_v50, %v4521_v9  ;;  %6654 = vmatpush3.bf16.msra.mxu0 %v4998_v12 }
 0xc06   :  { %6655 = vmatprep.subr.bf16.mxu0 %v9418_v35 }
 0xc07   :  { %v4967_v29 = vpack.c.bf16 %v4865_v21, %v4862_v31  ;;  %v6303_v32 = vpop.f32.mrb[168].mxu1 }
 0xc08   :  { %v6304_v17 = vpop.f32.mrb[169].mxu1 }
 0xc09   :  { %v4983_v33 = vmul.bf16 1009007652, %v4967_v29  ;;  %v6305_v7 = vadd.f32 %v6304_v17, %v6303_v32  ;;  %v6306_v20 = vpop.f32.mrb[170].mxu1  ;;  %v4571_v32 = vpop.permute.xlu1 %4570 }
 0xc0a   :  { %v6307_v16 = vpop.f32.mrb[171].mxu1 }
 0xc0b   :  { %v4999_v24 = vmax.bf16 %v4983_v33, %v4967_v29  ;;  %v6308_v6 = vadd.f32 %v6307_v16, %v6306_v20  ;;  %v4870_v27 = vadd.f32 %v6305_v7, %v4526_v48  ;;  %v4566_v29 = vpop.permute.xlu0 %4565  ;;  %v5801_v7 = vld [vmem:[%s9351_s4 + $0x6] sm:$0x3] }
 0xc0d   :  { %v4873_v23 = vadd.f32 %v6308_v6, %v4531_v41  ;;  %6656 = vmatpush3.bf16.msra.mxu0 %v4999_v24 }
 0xc0e   :  { %6657 = vmatprep.subr.bf16.mxu0 %v9418_v35 }
 0xc0f   :  { %v4968_v55 = vpack.c.bf16 %v4873_v23, %v4870_v27  ;;  %v6309_v57 = vpop.f32.mrb[172].mxu1 }
 0xc10   :  { %v6310_v34 = vpop.f32.mrb[173].mxu1 }
 0xc11   :  { %v4984_v14 = vmul.bf16 1009007652, %v4968_v55  ;;  %v6311_v46 = vadd.f32 %v6310_v34, %v6309_v57  ;;  %v6312_v40 = vpop.f32.mrb[174].mxu1  ;;  %v4576_v57 = vpop.permute.xlu0 %4575 }
 0xc12   :  { %v6313_v18 = vpop.f32.mrb[175].mxu1  ;;  %v4581_v34 = vpop.permute.xlu1 %4580 }
 0xc13   :  { %v5000_v52 = vmax.bf16 %v4984_v14, %v4968_v55  ;;  %v6314_v39 = vadd.f32 %v6313_v18, %v6312_v40  ;;  %v4878_v53 = vadd.f32 %v6311_v46, %v4536_v28 }
 0xc15   :  { %v4881_v4 = vadd.f32 %v6314_v39, %v4541_v3  ;;  %6658 = vmatpush3.bf16.msra.mxu0 %v5000_v52 }
 0xc16   :  { %6659 = vmatprep.subr.bf16.mxu0 %v9418_v35 }
 0xc17   :  { %v4969_v49 = vpack.c.bf16 %v4881_v4, %v4878_v53  ;;  %v6315_v38 = vpop.f32.mrb[176].mxu1 }
 0xc18   :  { %v6316_v51 = vpop.f32.mrb[177].mxu1 }
 0xc19   :  { %v4985_v22 = vmul.bf16 1009007652, %v4969_v49  ;;  %v6317_v2 = vadd.f32 %v6316_v51, %v6315_v38  ;;  %v6318_v44 = vpop.f32.mrb[178].mxu1  ;;  %v4586_v38 = vpop.permute.xlu0 %4585 }
 0xc1a   :  { %v6319_v62 = vpop.f32.mrb[179].mxu1  ;;  %v4591_v51 = vpop.permute.xlu1 %4590 }
 0xc1b   :  { %v5001_v10 = vmax.bf16 %v4985_v22, %v4969_v49  ;;  %v6320_v45 = vadd.f32 %v6319_v62, %v6318_v44  ;;  %v4886_v1 = vadd.f32 %v6317_v2, %v4546_v59 }
 0xc1d   :  { %v4889_v13 = vadd.f32 %v6320_v45, %v4551_v26  ;;  %6660 = vmatpush3.bf16.msra.mxu0 %v5001_v10 }
 0xc1e   :  { %6661 = vmatprep.subr.bf16.mxu0 %v9418_v35 }
 0xc1f   :  { %v4970_v0 = vpack.c.bf16 %v4889_v13, %v4886_v1  ;;  %v6321_v8 = vpop.f32.mrb[180].mxu1 }
 0xc20   :  { %v6322_v25 = vpop.f32.mrb[181].mxu1 }
 0xc21   :  { %v4986_v58 = vmul.bf16 1009007652, %v4970_v0  ;;  %v6323_v37 = vadd.f32 %v6322_v25, %v6321_v8  ;;  %v6324_v30 = vpop.f32.mrb[182].mxu1  ;;  %v4596_v8 = vpop.permute.xlu0 %4595 }
 0xc22   :  { %v6325_v11 = vpop.f32.mrb[183].mxu1  ;;  %v4601_v25 = vpop.permute.xlu1 %4600 }
 0xc23   :  { %v5002_v63 = vmax.bf16 %v4986_v58, %v4970_v0  ;;  %v6326_v15 = vadd.f32 %v6325_v11, %v6324_v30  ;;  %v4894_v43 = vadd.f32 %v6323_v37, %v4556_v42 }
 0xc25   :  { %v4897_v61 = vadd.f32 %v6326_v15, %v4561_v60  ;;  %6662 = vmatpush3.bf16.msra.mxu0 %v5002_v63 }
 0xc26   :  { %6663 = vmatprep.subr.bf16.mxu0 %v9418_v35 }
 0xc27   :  { %v4971_v56 = vpack.c.bf16 %v4897_v61, %v4894_v43  ;;  %v6327_v19 = vpop.f32.mrb[184].mxu1 }
 0xc28   :  { %v6328_v47 = vpop.f32.mrb[185].mxu1 }
 0xc29   :  { %v4987_v12 = vmul.bf16 1009007652, %v4971_v56  ;;  %v6329_v50 = vadd.f32 %v6328_v47, %v6327_v19  ;;  %v6330_v54 = vpop.f32.mrb[186].mxu1  ;;  %v4606_v19 = vpop.permute.xlu0 %4605 }
 0xc2a   :  { %v6331_v9 = vpop.f32.mrb[187].mxu1  ;;  %v4611_v47 = vpop.permute.xlu1 %4610 }
 0xc2b   :  { %v5003_v31 = vmax.bf16 %v4987_v12, %v4971_v56  ;;  %v6332_v21 = vadd.f32 %v6331_v9, %v6330_v54  ;;  %v4902_v17 = vadd.f32 %v6329_v50, %v4566_v29 }
 0xc2d   :  { %v4905_v33 = vadd.f32 %v6332_v21, %v4571_v32  ;;  %6664 = vmatpush3.bf16.msra.mxu0 %v5003_v31 }
 0xc2e   :  { %6669 = vmatprep.subr.bf16.mxu0 %v9418_v35 }
 0xc2f   :  { %v4972_v20 = vpack.c.bf16 %v4905_v33, %v4902_v17  ;;  %v6333_v16 = vpop.f32.mrb[188].mxu1 }
 0xc30   :  { %v6334_v24 = vpop.f32.mrb[189].mxu1  ;;  %6666 = vmatmul.mubr.bf16.vlgmr.msra.gmra.mrb[192].mxu0 %v5801_v7 }
 0xc31   :  { %v4988_v6 = vmul.bf16 1009007652, %v4972_v20  ;;  %v6335_v48 = vadd.f32 %v6334_v24, %v6333_v16  ;;  %v6336_v41 = vpop.f32.mrb[190].mxu1  ;;  %6685 = vmatprep.mubr.msk.bf16.mxu0 %vm7031_vm2, %v9418_v35  ;;  %v4621_v16 = vpop.permute.xlu1 %4620 }
 0xc32   :  { %v6337_v27 = vpop.f32.mrb[191].mxu1 }
 0xc33   :  { %v5004_v23 = vmax.bf16 %v4988_v6, %v4972_v20  ;;  %v6338_v55 = vadd.f32 %v6337_v27, %v6336_v41  ;;  %v4910_v14 = vadd.f32 %v6335_v48, %v4576_v57  ;;  %v4616_v20 = vpop.permute.xlu0 %4615 }
 0xc35   :  { %v4913_v46 = vadd.f32 %v6338_v55, %v4581_v34  ;;  %6670 = vmatpush3.bf16.msra.mxu0 %v5004_v23 }
 0xc36   :  { %6671 = vmatprep.subr.bf16.mxu0 %v9418_v35 }
 0xc37   :  { %v4973_v40 = vpack.c.bf16 %v4913_v46, %v4910_v14  ;;  %v6339_v18 = vpop.f32.mrb[192].mxu1 }
 0xc38   :  { %v6340_v52 = vpop.f32.mrb[193].mxu1 }
 0xc39   :  { %v4989_v39 = vmul.bf16 1009007652, %v4973_v40  ;;  %v6341_v28 = vadd.f32 %v6340_v52, %v6339_v18  ;;  %v6342_v3 = vpop.f32.mrb[194].mxu1  ;;  %v4631_v18 = vpop.permute.xlu1 %4630 }
 0xc3a   :  { %v6343_v53 = vpop.f32.mrb[195].mxu1 }
 0xc3b   :  { %v5005_v4 = vmax.bf16 %v4989_v39, %v4973_v40  ;;  %v6344_v49 = vadd.f32 %v6343_v53, %v6342_v3  ;;  %v4918_v22 = vadd.f32 %v6341_v28, %v4586_v38  ;;  %v4626_v40 = vpop.permute.xlu0 %4625 }
 0xc3d   :  { %v4921_v2 = vadd.f32 %v6344_v49, %v4591_v51  ;;  %6672 = vmatpush3.bf16.msra.mxu0 %v5005_v4 }
 0xc3e   :  { %6673 = vmatprep.subr.bf16.mxu0 %v9418_v35 }
 0xc3f   :  { %v4974_v44 = vpack.c.bf16 %v4921_v2, %v4918_v22  ;;  %v6345_v62 = vpop.f32.mrb[196].mxu1 }
 0xc40   :  { %v6346_v10 = vpop.f32.mrb[197].mxu1 }
 0xc41   :  { %v4990_v45 = vmul.bf16 1009007652, %v4974_v44  ;;  %v6347_v59 = vadd.f32 %v6346_v10, %v6345_v62  ;;  %v6348_v26 = vpop.f32.mrb[198].mxu1  ;;  %v4641_v62 = vpop.permute.xlu1 %4640 }
 0xc42   :  { %v6349_v1 = vpop.f32.mrb[199].mxu1 }
 0xc43   :  { %v5006_v13 = vmax.bf16 %v4990_v45, %v4974_v44  ;;  %v6350_v0 = vadd.f32 %v6349_v1, %v6348_v26  ;;  %v4926_v58 = vadd.f32 %v6347_v59, %v4596_v8  ;;  %v4636_v44 = vpop.permute.xlu0 %4635 }
 0xc45   :  { %v4929_v37 = vadd.f32 %v6350_v0, %v4601_v25  ;;  %6674 = vmatpush3.bf16.msra.mxu0 %v5006_v13  ;;  %v5803_v13 = vld [vmem:[%s9353_s6 + $0x6] sm:$0x3]  ;;  %s6981_s6 = scalar_lea.vmem %s5142_s1, 16 }
 0xc46   :  { %6675 = vmatprep.subr.bf16.mxu0 %v9418_v35  ;;  %p6982_p0 = scmp.ne.s32.totalorder %s5142_s1, %s6981_s6  ;;  %p6987_p2 = scmp.lt.s32.totalorder %s6985_s15, %s6981_s6 }
 0xc47   :  { %v4975_v30 = vpack.c.bf16 %v4929_v37, %v4926_v58  ;;  %v6351_v11 = vpop.f32.mrb[200].mxu1  ;;  %v5019_v0 = vpop.permute.xlu0 %5018 }
 0xc48   :  { %v6352_v63 = vpop.f32.mrb[201].mxu1  ;;  %p6988_p3 = por %p6987_p2, %p6986_p1 }
 0xc49   :  { %v4991_v15 = vmul.bf16 1009007652, %v4975_v30  ;;  %v6353_v42 = vadd.f32 %v6352_v63, %v6351_v11  ;;  %v6354_v60 = vpop.f32.mrb[202].mxu1 }
 0xc4a   :  { %v6355_v43 = vpop.f32.mrb[203].mxu1  ;;  %p6989_p4 = pnand %p6988_p3, %p6982_p0 }
 0xc4b   :  { %v5007_v61 = vmax.bf16 %v4991_v15, %v4975_v30  ;;  %v6356_v56 = vadd.f32 %v6355_v43, %v6354_v60  ;;  %v4934_v12 = vadd.f32 %v6353_v42, %v4606_v19 }
 0xc4d   :  { %v4937_v50 = vadd.f32 %v6356_v56, %v4611_v47  ;;  %6676 = vmatpush3.bf16.msra.mxu0 %v5007_v61 }
 0xc4e   :  { %6677 = vmatprep.subr.bf16.mxu0 %v9418_v35 }
 0xc4f   :  { %v4976_v54 = vpack.c.bf16 %v4937_v50, %v4934_v12  ;;  %v6357_v9 = vpop.f32.mrb[204].mxu1 }
 0xc50   :  { %v6358_v31 = vpop.f32.mrb[205].mxu1 }
 0xc51   :  { %v4992_v21 = vmul.bf16 1009007652, %v4976_v54  ;;  %v6359_v29 = vadd.f32 %v6358_v31, %v6357_v9  ;;  %v6360_v32 = vpop.f32.mrb[206].mxu1 }
 0xc52   :  { %v6361_v17 = vpop.f32.mrb[207].mxu1 }
 0xc53   :  { %v5008_v33 = vmax.bf16 %v4992_v21, %v4976_v54  ;;  %v6362_v7 = vadd.f32 %v6361_v17, %v6360_v32  ;;  %v4942_v24 = vadd.f32 %v6359_v29, %v4616_v20 }
 0xc55   :  { %v4945_v6 = vadd.f32 %v6362_v7, %v4621_v16  ;;  %6678 = vmatpush3.bf16.msra.mxu0 %v5008_v33 }
 0xc56   :  { %6679 = vmatprep.subr.bf16.mxu0 %v9418_v35 }
 0xc57   :  { %v4977_v48 = vpack.c.bf16 %v4945_v6, %v4942_v24  ;;  %v6363_v41 = vpop.f32.mrb[208].mxu1 }
 0xc58   :  { %v6364_v27 = vpop.f32.mrb[209].mxu1 }
 0xc59   :  { %v4993_v23 = vmul.bf16 1009007652, %v4977_v48  ;;  %v6365_v55 = vadd.f32 %v6364_v27, %v6363_v41  ;;  %v6366_v57 = vpop.f32.mrb[210].mxu1 }
 0xc5a   :  { %v6367_v34 = vpop.f32.mrb[211].mxu1 }
 0xc5b   :  { %v5009_v14 = vmax.bf16 %v4993_v23, %v4977_v48  ;;  %v6368_v46 = vadd.f32 %v6367_v34, %v6366_v57  ;;  %v4950_v52 = vadd.f32 %v6365_v55, %v4626_v40 }
 0xc5d   :  { %v4953_v39 = vadd.f32 %v6368_v46, %v4631_v18  ;;  %6680 = vmatpush3.bf16.msra.mxu0 %v5009_v14 }
 0xc5e   :  { %6681 = vmatprep.subr.bf16.mxu0 %v9418_v35 }
 0xc5f   :  { %v4978_v28 = vpack.c.bf16 %v4953_v39, %v4950_v52  ;;  %v6369_v3 = vpop.f32.mrb[212].mxu1 }
 0xc60   :  { %v6370_v53 = vpop.f32.mrb[213].mxu1 }
 0xc61   :  { %v4994_v4 = vmul.bf16 1009007652, %v4978_v28  ;;  %v6371_v49 = vadd.f32 %v6370_v53, %v6369_v3  ;;  %v6372_v38 = vpop.f32.mrb[214].mxu1 }
 0xc62   :  { %v6373_v51 = vpop.f32.mrb[215].mxu1 }
 0xc63   :  { %v5010_v22 = vmax.bf16 %v4994_v4, %v4978_v28  ;;  %v6374_v2 = vadd.f32 %v6373_v51, %v6372_v38  ;;  %v4958_v10 = vadd.f32 %v6371_v49, %v4636_v44 }
 0xc65   :  { %v4961_v45 = vadd.f32 %v6374_v2, %v4641_v62  ;;  %6682 = vmatpush3.bf16.msra.mxu0 %v5010_v22 }
 0xc66   :  { %6683 = vmatprep.subr.bf16.mxu0 %v9418_v35 }
 0xc67   :  { %v4979_v59 = vpack.c.bf16 %v4961_v45, %v4958_v10 }
 0xc69   :  { %v4995_v26 = vmul.bf16 1009007652, %v4979_v59 }
 0xc6b   :  { %v5011_v1 = vmax.bf16 %v4995_v26, %v4979_v59 }
 0xc6d   :  { %6684 = vmatpush3.bf16.msra.mxu0 %v5011_v1 }
 0xc70   :  { %6686 = vmatmul.mubr.bf16.vlgmr.msra.gmra.mrb[196].mxu0 %v5803_v13 }
 0xd03   :  { %v5055_v8 = vpop.f32.mrb[192].mxu0 }
 0xd04   :  { %v5056_v25 = vadd.f32 %v5055_v8, %v5019_v0  ;;  %v6667_v58 = vpop.f32.mrb[193].mxu0 }
 0xd05   :  { %v5058_v37 = vpop.f32.mrb[194].mxu0 }
 0xd06   :  { %v5114_v30 = vsel %vm1297_vm3, %v5056_v25, 0.0  ;;  %v6668_v11 = vpop.f32.mrb[195].mxu0 }
 0xd07   :  { %v5115_v63 = vrot.slane %v5114_v30, 4 }
 0xd09   :  { %v5116_v15 = vadd.f32 %v5115_v63, %v5114_v30 }
 0xd0b   :  { %v5117_v35 = vrot.slane %v5116_v15, 2 }
 0xd0d   :  { %v5118_v42 = vadd.f32 %v5117_v35, %v5116_v15 }
 0xd0f   :  { %v5119_v60 = vrot.slane %v5118_v42, 1 }
 0xd11   :  { %v5120_v43 = vadd.f32 %v5119_v60, %v5118_v42 }
 0xd13   :  { %v5121_v61 = vadd.f32 %v5120_v43, %v9055_v36 }
 0xd15   :  { %5124 = vst.msk [vmem:[#allocation4] sm:$0x1] %vm5123_vm4, %v5121_v61 }
 0xd16   :  { %6992 = shalt.err (!%p6989_p4)
}
 0xd17   :  { %s6993_s18 = scalar_lea.hbm %s9357_s10, 16 }
 0xd18   :  { %p6994_p5 = scmp.ne.s32.totalorder %s9357_s10, %s6993_s18  ;;  %p6997_p6 = scmp.lt.u32.totalorder %s6993_s18, %s9357_s10 }
 0xd1a   :  { %p6999_p7 = pnand %p6997_p6, %p6994_p5 }
 0xd1c   :  { %7002 = shalt.err (!%p6999_p7)
}
 0xd1d   :  { %5144 = dma.vmem_to_hbm [thread:$0]  %s5142_s1, 16, %s9357_s10, [#allocation5]   ;;  %v5110_v36 = vmul.f32 1.442695, %v5056_v25  ;;  %v5068_v19 = vpop.permute.xlu1 %5067 }
 0xd1e   :  { %s7033_s24 = smov [#allocation2]  }
 0xd1f   :  { %6978 = vpow2.f32 %v5110_v36  ;;  %s5131_s25 = sshll.u32 %s7033_s24, 4  ;;  %s5132_s25 = int_to_ptr.vmem [resolvable:$true] %s5131_s25 }
 0xd20   :  { %s7003_s0 = scalar_lea.vmem %s5132_s25, 64  ;;  %p7008_p9 = scmp.lt.s32.totalorder %s5132_s25, %s5132_s25 }
 0xd21   :  { %p7004_p8 = scmp.ne.s32.totalorder %s5132_s25, %s7003_s0  ;;  %p7009_p10 = scmp.lt.s32.totalorder %s7003_s0, %s7003_s0 }
 0xd23   :  { %p7010_p11 = por %p7009_p10, %p7008_p9 }
 0xd25   :  { %p7011_p12 = pnand %p7010_p11, %p7004_p8 }
 0xd29   :  { %v6979_v56 = vpop.eup %6978 }
 0xd2a   :  { %v5112_v54 = vmul.f32 %v6979_v56, %v9058_v5 }
 0xd43   :  { %v5104_v47 = vpop.f32.mrb[196].mxu0 }
 0xd44   :  { %v5105_v12 = vadd.f32 %v5104_v47, %v5068_v19  ;;  %v6687_v50 = vpop.f32.mrb[197].mxu0 }
 0xd45   :  { %v5107_v9 = vpop.f32.mrb[198].mxu0 }
 0xd46   :  { %v6688_v31 = vpop.f32.mrb[199].mxu0  ;;  %v5113_v21 = vadd.f32 %v5112_v54, %v5105_v12 }
 0xd48   :  { %5122 = vst.msk [vmem:[#allocation2] sm:$0xf] %vm1297_vm3, %v5113_v21 }
 0xd49   :  { %7014 = shalt.err (!%p7011_p12)
}
 0xd4a   :  { %s7015_s27 = scalar_lea.hbm %s9356_s9, 64 }
 0xd4b   :  { %p7016_p13 = scmp.ne.s32.totalorder %s9356_s9, %s7015_s27  ;;  %p7019_p0 = scmp.lt.u32.totalorder %s7015_s27, %s9356_s9 }
 0xd4d   :  { %p7021_p1 = pnand %p7019_p0, %p7016_p13 }
 0xd4f   :  { %7024 = shalt.err (!%p7021_p1)
}
 0xd50   :  { %5134 = dma.vmem_to_hbm [thread:$0]  %s5132_s25, 64, %s9356_s9, [#allocation3]  }
 0xd51   :  { %7025 = dma.done.wait [#allocation3], 64  }
 0xd52   :  { %7026 = vsyncadd [#allocation3], 4294967232 }
 0xd53   :  { %7027 = dma.done.wait [#allocation5], 16  }
 0xd54   :  { %7028 = vsyncadd [#allocation5], 4294967280 }
 0xd55   :  { %5151 = vsyncpa [#allocation3], 1 }
 0xd56   :  { %5152 = vsyncpa [#allocation5], 1 }

</bundles_post_ra>
